<compile_context>
chip_gen: v5e
topology: v5e:2x2
jax: 0.10.0
libtpu: 0.0.40
codegen_flags: <defaults>
</compile_context>

<pallas_src>
import numpy as np
import jax
import jax.numpy as jnp
from jax.experimental import pallas as pl
from jax.experimental.pallas import tpu as pltpu


# --------------------------- hardware-aware tiling ---------------------------

def _tpu_vmem_bytes():
    """Physical per-core VMEM; falls back to the smallest (v7x, 64 MiB)."""
    try:
        return int(getattr(pltpu.get_tpu_info(), "vmem_capacity_bytes"))
    except Exception:
        return 64 * 1024 * 1024


def _vmem_limit_bytes():
    return (_tpu_vmem_bytes() * 3) // 4            # ~96 MiB v5e/v6e, ~48 MiB v7x


def _pick_tm(rows, in_row_bytes, out_row_bytes, const_bytes):
    """Largest 128-multiple row tile whose pipelined footprint fits the budget.

    Budget = 5/8 of physical VMEM (~80 MiB on v5e/v6e, ~40 MiB on v7x).
    Streaming blocks are counted twice (double buffering) and so are the
    grid-constant blocks (weights / scales / accumulators).  No "force >= 2
    blocks" split: it only pays off with >= 2 blocks per TensorCore.
    """
    vmem = _tpu_vmem_bytes()
    budget = (vmem * 5) // 8
    cap = 2048 if vmem >= (96 << 20) else 1024
    per_row = 2 * (in_row_bytes + out_row_bytes)
    avail = max(budget - 2 * const_bytes, 128 * per_row)
    tm = int(min(avail // max(per_row, 1), cap))
    tm -= tm % 128
    rows_ceil = -(-rows // 128) * 128
    return max(min(tm, rows_ceil), 128)


# --------------------- trace-time pooling / upsample operators ---------------

def _pool_membership(in_size, out_size):
    """0/1 membership matrix of F.adaptive_avg_pool2d bins, (out_size, in_size)."""
    m = np.zeros((out_size, in_size), np.float32)
    for i in range(out_size):
        s = (i * in_size) // out_size
        e = -((-(i + 1) * in_size) // out_size)     # ceil
        m[i, s:e] = 1.0
    return m


def _bilinear_matrix(out_size, in_size):
    """Row-mixing matrix reproducing bilinear upsampling (align_corners=False)."""
    # TODO(synk): swiftnet calls the deprecated F.upsample; verify align_corners
    # default against the exact PyTorch version (border rows differ if True).
    u = np.zeros((out_size, in_size), np.float32)
    scale = in_size / out_size
    for o in range(out_size):
        src = max((o + 0.5) * scale - 0.5, 0.0)
        i0 = min(int(np.floor(src)), in_size - 1)
        i1 = min(i0 + 1, in_size - 1)
        frac = src - i0
        u[o, i0] += 1.0 - frac
        u[o, i1] += frac
    return u


def _build_spatial_operators(H, W, grid_sizes, hw_pad):
    """Pooling membership A^T (zero padded), bin counts, bilinear weights U.

    AT     : (G_total, hw_pad)  0/1 pooled-cell <- pixel membership
    counts : (G_total,)         pixels per pooled cell
    U      : (H*W, G_total)     bilinear upsample weights (rows sum to 1/level)
    Cell ordering: levels in order; (p, q) flattened as p*gw + q within a level.
    """
    hw = H * W
    at_blocks, cnt_blocks, up_blocks = [], [], []
    for gh, gw in grid_sizes:
        mh = _pool_membership(H, gh)                      # (gh, H)
        mw = _pool_membership(W, gw)                      # (gw, W)
        at_blocks.append(np.einsum('ph,qw->pqhw', mh, mw).reshape(gh * gw, hw))
        cnt_blocks.append(np.outer(mh.sum(1), mw.sum(1)).reshape(gh * gw))
        uh = _bilinear_matrix(H, gh)                      # (H, gh)
        uw = _bilinear_matrix(W, gw)                      # (W, gw)
        up_blocks.append(np.einsum('hp,wq->hwpq', uh, uw).reshape(hw, gh * gw))
    at = np.concatenate(at_blocks, axis=0)
    at_pad = np.zeros((at.shape[0], hw_pad), np.float32)
    at_pad[:, :hw] = at
    counts = np.concatenate(cnt_blocks).astype(np.float32)
    up = np.concatenate(up_blocks, axis=1).astype(np.float32)
    return at_pad, counts, up


# ------------------------------ Pallas kernels -------------------------------

def _make_bn_conv_pool_kernel(tm, hw):
    """relu(bn(x)) @ W + b, plus adaptive-avg-pool partial sums of the result."""
    def kernel(x_ref, at_ref, scale_ref, shift_ref, w_ref, b_ref,
               y_ref, pool_ref):
        j = pl.program_id(1)

        @pl.when(j == 0)
        def _init():
            pool_ref[...] = jnp.zeros_like(pool_ref)

        x = x_ref[...].astype(jnp.float32)                 # BN/ReLU math in f32
        h = jnp.maximum(x * scale_ref[...] + shift_ref[...], 0.0)
        y = jnp.dot(h.astype(jnp.bfloat16), w_ref[...],    # MXU bf16, f32 acc
                    preferred_element_type=jnp.float32) + b_ref[...]
        yb = y.astype(jnp.bfloat16)
        y_ref[...] = yb

        # mask ragged-edge rows so OOB garbage cannot reach the pooled sums
        rows = j * tm + jax.lax.broadcasted_iota(jnp.int32, (tm, 1), 0)
        yp = jnp.where(rows < hw, yb, jnp.zeros_like(yb))
        pool_ref[...] += jnp.dot(at_ref[...], yp,          # (G, bt) partial sums
                                 preferred_element_type=jnp.float32)
    return kernel


def _bn_conv_pool(x3, at, p, tm):
    n, hw, c = x3.shape
    bt = p["w"].shape[1]
    g_total = at.shape[0]
    return pl.pallas_call(
        _make_bn_conv_pool_kernel(tm, hw),
        out_shape=(jax.ShapeDtypeStruct((n, hw, bt), jnp.bfloat16),
                   jax.ShapeDtypeStruct((n, g_total, bt), jnp.float32)),
        grid=(n, pl.cdiv(hw, tm)),
        in_specs=[
            pl.BlockSpec((None, tm, c), lambda ni, ji: (ni, ji, 0)),
            pl.BlockSpec((g_total, tm), lambda ni, ji: (0, ji)),
            pl.BlockSpec((1, c), lambda ni, ji: (0, 0)),
            pl.BlockSpec((1, c), lambda ni, ji: (0, 0)),
            pl.BlockSpec((c, bt), lambda ni, ji: (0, 0)),
            pl.BlockSpec((1, bt), lambda ni, ji: (0, 0)),
        ],
        out_specs=(
            pl.BlockSpec((None, tm, bt), lambda ni, ji: (ni, ji, 0)),
            # pooled-sum accumulator: same block across j -> resident in VMEM
            pl.BlockSpec((None, g_total, bt), lambda ni, ji: (ni, 0, 0)),
        ),
        compiler_params=pltpu.CompilerParams(
            dimension_semantics=("parallel", "arbitrary"),
            vmem_limit_bytes=_vmem_limit_bytes()),
    )(x3, at, p["scale"], p["shift"], p["w"], p["b"])


def _make_fuse_kernel(g_sizes):
    """out = relu(bn0(y)) @ W0 + concat_l relu(up_l(lvl_bn_l)) @ Wlv + b."""
    def kernel(y_ref, u_ref, lvl_ref, scale0_ref, shift0_ref,
               w0_ref, wlv_ref, b_ref, o_ref):
        y = y_ref[...].astype(jnp.float32)
        h0 = jnp.maximum(y * scale0_ref[...] + shift0_ref[...], 0.0)
        acc = jnp.dot(h0.astype(jnp.bfloat16), w0_ref[...],
                      preferred_element_type=jnp.float32)
        u = u_ref[...]                                     # (tm, G) f32
        lv = lvl_ref[...]                                  # (G, level_size) f32
        hs = []
        off = 0
        for gl in g_sizes:                                 # static python loop
            up = jnp.dot(u[:, off:off + gl], lv[off:off + gl, :],
                         preferred_element_type=jnp.float32)   # bilinear upsample
            hs.append(jnp.maximum(up, 0.0).astype(jnp.bfloat16))
            off += gl
        hlv = jnp.concatenate(hs, axis=-1)                 # (tm, L*level_size)
        acc = acc + jnp.dot(hlv, wlv_ref[...],             # merged-K level matmul
                            preferred_element_type=jnp.float32)
        o_ref[...] = (acc + b_ref[...]).astype(o_ref.dtype)
    return kernel


def _fuse_upsample(y3, u, lvl_cat, fp, g_sizes, out_dtype, tm):
    n, hw, bt = y3.shape
    g_total = u.shape[1]
    lsz = lvl_cat.shape[2]
    cout = fp["w0"].shape[1]
    lrows = fp["w_lv"].shape[0]
    return pl.pallas_call(
        _make_fuse_kernel(g_sizes),
        out_shape=jax.ShapeDtypeStruct((n, hw, cout), out_dtype),
        grid=(n, pl.cdiv(hw, tm)),
        in_specs=[
            pl.BlockSpec((None, tm, bt), lambda ni, ji: (ni, ji, 0)),
            pl.BlockSpec((tm, g_total), lambda ni, ji: (ji, 0)),
            pl.BlockSpec((None, g_total, lsz), lambda ni, ji: (ni, 0, 0)),
            pl.BlockSpec((1, bt), lambda ni, ji: (0, 0)),
            pl.BlockSpec((1, bt), lambda ni, ji: (0, 0)),
            pl.BlockSpec((bt, cout), lambda ni, ji: (0, 0)),
            pl.BlockSpec((lrows, cout), lambda ni, ji: (0, 0)),
            pl.BlockSpec((1, cout), lambda ni, ji: (0, 0)),
        ],
        out_specs=pl.BlockSpec((None, tm, cout), lambda ni, ji: (ni, ji, 0)),
        compiler_params=pltpu.CompilerParams(
            dimension_semantics=("parallel", "parallel"),
            vmem_limit_bytes=_vmem_limit_bytes()),
    )(y3, u, lvl_cat, fp["scale0"], fp["shift0"], fp["w0"], fp["w_lv"], fp["b"])


# ------------------------------ module port ----------------------------------

def init_bn_relu_conv_params(key, cin, cout, eps=1e-5):
    """Deterministic synthetic params for one _BNReluConv(k=1), pre-folded.

    Eval-mode BatchNorm (running stats) folded into per-channel scale/shift;
    the conv weight is stored transposed (Cin, Cout) in bf16 for the MXU.
    """
    # TODO(synk): train-mode BatchNorm (batch statistics + momentum update) is
    # not implemented; only the eval-mode folded form is.
    k1, k2 = jax.random.split(key)
    idx = jnp.arange(cin, dtype=jnp.float32)
    gamma = 1.0 + 0.1 * jnp.cos(idx)
    beta = 0.05 * jnp.sin(idx)
    mean = 0.1 * jnp.sin(0.5 * idx)
    var = 1.0 + 0.2 * jnp.abs(jnp.cos(0.3 * idx))
    w = 0.1 * jax.random.normal(k1, (cout, cin), jnp.float32)
    b = 0.05 * jax.random.normal(k2, (cout,), jnp.float32)
    inv_std = 1.0 / jnp.sqrt(var + eps)
    return {
        "scale": (gamma * inv_std).reshape(1, cin),                  # (1, Cin) f32
        "shift": (beta - mean * gamma * inv_std).reshape(1, cin),    # (1, Cin) f32
        "w": w.T.astype(jnp.bfloat16),                               # (Cin, Cout) bf16
        "b": b.reshape(1, cout),                                     # (1, Cout) f32
    }


class SpatialPyramidPoolingPallas:
    def __init__(self, num_maps_in, num_levels, bt_size=512, level_size=128,
                 out_size=256, grids=(6, 3, 2, 1), square_grid=False, key=None):
        # TODO(synk): num_levels == 0 (degenerate config, no pyramid) not ported.
        assert num_levels >= 1, "num_levels >= 1 required by this port"
        self.grids = list(grids)
        self.square_grid = square_grid
        self.num_levels = num_levels

        keys = jax.random.split(key, num_levels + 2)
        spp_bn = init_bn_relu_conv_params(keys[0], num_maps_in, bt_size)
        levels = [init_bn_relu_conv_params(keys[1 + i], bt_size, level_size)
                  for i in range(num_levels)]
        final_size = bt_size + num_levels * level_size
        fuse = init_bn_relu_conv_params(keys[-1], final_size, out_size)

        # Split the fuse layer along Cin: the bt_size slice is applied to y
        # in-kernel; the level slices' BN is folded onto the tiny pooled
        # tensors (bilinear rows sum to 1 => BN commutes with upsampling), and
        # their conv weights are merged into one (L*level_size, out) slab.
        fuse_params = {
            "scale0": fuse["scale"][:, :bt_size],
            "shift0": fuse["shift"][:, :bt_size],
            "w0": fuse["w"][:bt_size, :],
            "w_lv": fuse["w"][bt_size:, :],
            "b": fuse["b"],
            "lvl_scale": [fuse["scale"][:, bt_size + i * level_size:
                                        bt_size + (i + 1) * level_size]
                          for i in range(num_levels)],
            "lvl_shift": [fuse["shift"][:, bt_size + i * level_size:
                                        bt_size + (i + 1) * level_size]
                          for i in range(num_levels)],
        }
        self._params = {"spp_bn": spp_bn, "levels": levels, "fuse": fuse_params,
                        "fuse_full": fuse}     # unsplit copy for the reference check
        self._forward_jit = jax.jit(self._forward)

    def _grid_sizes(self, H, W):
        ar = W / H
        sizes = []
        for i in range(self.num_levels):
            g = self.grids[i]
            gh, gw = (g, g) if self.square_grid else (g, max(1, round(ar * g)))
            sizes.append((gh, gw))
        return sizes

    def _forward(self, params, x_nchw):
        N, C, H, W = x_nchw.shape
        hw = H * W
        grid_sizes = self._grid_sizes(H, W)
        g_sizes = [gh * gw for gh, gw in grid_sizes]
        g_total = sum(g_sizes)

        p0 = params["spp_bn"]
        bt = p0["w"].shape[1]

        # ---- stage 1: fused BN->ReLU->1x1conv + in-pass adaptive-pool sums ----
        tm1 = _pick_tm(
            hw,
            in_row_bytes=C * 2 + g_total * 2,              # bf16 x row + bf16 A^T column
            out_row_bytes=bt * 2,                          # bf16 y row
            const_bytes=C * bt * 2 + 2 * C * 4 + bt * 4 + g_total * bt * 4)
        hw_pad = pl.cdiv(hw, tm1) * tm1

        at_np, counts_np, u_np = _build_spatial_operators(H, W, grid_sizes, hw_pad)
        at = jnp.asarray(at_np, dtype=jnp.bfloat16)        # 0/1 membership, exact in bf16
        counts = jnp.asarray(counts_np)
        u = jnp.asarray(u_np)                              # f32 bilinear weights

        # single entry layout change; cast to bf16 inside the same fused op
        x3 = jnp.transpose(x_nchw, (0, 2, 3, 1)).astype(jnp.bfloat16).reshape(N, hw, C)

        y3, pool_sum = _bn_conv_pool(x3, at, p0, tm1)
        pooled = pool_sum / counts[None, :, None]          # == adaptive_avg_pool2d(y)

        # ---- tiny per-level convs (+ fuse BN folded in) on the pooled grids ----
        fp = params["fuse"]
        lvl_parts = []
        off = 0
        for i, lp in enumerate(params["levels"]):
            gl = g_sizes[i]
            pin = pooled[:, off:off + gl, :]
            h = jnp.maximum(pin * lp["scale"] + lp["shift"], 0.0)
            lvl = jnp.einsum('ngc,cd->ngd', h.astype(jnp.bfloat16), lp["w"],
                             preferred_element_type=jnp.float32) + lp["b"]
            lvl_parts.append(lvl * fp["lvl_scale"][i] + fp["lvl_shift"][i])
            off += gl
        lvl_cat = jnp.concatenate(lvl_parts, axis=1)       # (N, G_total, level_size)

        # ---- stage 2: fused in-VMEM upsample + BN->ReLU->1x1conv fuse layer ----
        cout = fp["w0"].shape[1]
        lsz = lvl_cat.shape[2]
        out_dtype = x_nchw.dtype
        tm2 = _pick_tm(
            hw,
            in_row_bytes=bt * 2 + g_total * 4,
            out_row_bytes=cout * jnp.dtype(out_dtype).itemsize,
            const_bytes=(bt * cout * 2 + fp["w_lv"].shape[0] * cout * 2
                         + g_total * lsz * 4 + 2 * bt * 4 + cout * 4))
        out3 = _fuse_upsample(y3, u, lvl_cat, fp, g_sizes, out_dtype, tm2)

        out = out3.reshape(N, H, W, cout)
        return jnp.transpose(out, (0, 3, 1, 2))            # single exit transpose

    def __call__(self, x):
        return self._forward_jit(self._params, x)


# ------------------------- pure-JAX f32 reference ----------------------------

def reference_forward(module, x_nchw):
    """f32 reference with the torch op ordering (pool -> conv -> upsample -> BN)."""
    params = module._params
    N, C, H, W = x_nchw.shape
    hw = H * W
    grid_sizes = module._grid_sizes(H, W)
    g_sizes = [gh * gw for gh, gw in grid_sizes]
    at_np, counts_np, u_np = _build_spatial_operators(H, W, grid_sizes, hw)
    at = jnp.asarray(at_np[:, :hw])
    counts = jnp.asarray(counts_np)
    u = jnp.asarray(u_np)

    xf = jnp.transpose(x_nchw, (0, 2, 3, 1)).reshape(N, hw, C).astype(jnp.float32)
    p0 = params["spp_bn"]
    y = jnp.maximum(xf * p0["scale"] + p0["shift"], 0.0) @ p0["w"].astype(jnp.float32) \
        + p0["b"]

    parts = [y]
    off = 0
    for i, lp in enumerate(params["levels"]):
        gl = g_sizes[i]
        pooled = jnp.einsum('gp,npc->ngc', at[off:off + gl], y) \
            / counts[off:off + gl][None, :, None]
        h = jnp.maximum(pooled * lp["scale"] + lp["shift"], 0.0)
        lvl = h @ lp["w"].astype(jnp.float32) + lp["b"]
        parts.append(jnp.einsum('pg,ngc->npc', u[:, off:off + gl], lvl))
        off += gl
    cat = jnp.concatenate(parts, axis=-1)
    fz = params["fuse_full"]
    out = jnp.maximum(cat * fz["scale"] + fz["shift"], 0.0) @ fz["w"].astype(jnp.float32) \
        + fz["b"]
    return jnp.transpose(out.reshape(N, H, W, -1), (0, 3, 1, 2))


# ----------------------------------- main -------------------------------------

if __name__ == "__main__":
    key = jax.random.PRNGKey(0)
    k_x, k_p = jax.random.split(key)

    N, C, H, W = 2, 4, 16, 16
    num_levels, bt_size, level_size, out_size = 3, 32, 16, 32

    x = jax.random.normal(k_x, (N, C, H, W), jnp.float32)
    spp = SpatialPyramidPoolingPallas(num_maps_in=C, num_levels=num_levels,
                                      bt_size=bt_size, level_size=level_size,
                                      out_size=out_size, grids=[6, 3, 2, 1],
                                      square_grid=False, key=k_p)
    out = spp(x)
    jax.block_until_ready(out)
    assert out.shape == (N, out_size, H, W), out.shape
    assert bool(jnp.all(jnp.isfinite(out)))

    # numerical check vs a pure-JAX f32 reference (bf16 kernels -> loose tol)
    ref = reference_forward(spp, x)
    err = float(jnp.max(jnp.abs(out.astype(jnp.float32) - ref)))
    assert err < 5e-2, f"max abs error vs reference: {err}"

    print("KERNEL_OK")
</pallas_src>

<mosaic_0001>
module attributes {stable_mosaic.version = 11 : i64} {
  func.func @kernel(%arg0: i32, %arg1: i32, %arg2: memref<1x256x4xbf16, #tpu.memory_space<vmem>>, %arg3: memref<49x256xbf16, #tpu.memory_space<vmem>>, %arg4: memref<1x4xf32, #tpu.memory_space<vmem>>, %arg5: memref<1x4xf32, #tpu.memory_space<vmem>>, %arg6: memref<4x32xbf16, #tpu.memory_space<vmem>>, %arg7: memref<1x32xf32, #tpu.memory_space<vmem>>, %arg8: memref<1x256x32xbf16, #tpu.memory_space<vmem>>, %arg9: memref<1x49x32xf32, #tpu.memory_space<vmem>>) attributes {dimension_semantics = [#tpu.dimension_semantics<parallel>, #tpu.dimension_semantics<arbitrary>], iteration_bounds = array<i64: 2, 1>, scalar_prefetch = 0 : i64, scratch_operands = 0 : i64, tpu.core_type = #tpu.core_type<tc>, window_params = [{transform_indices = @transform_0, window_bounds = array<i64: 1, 256, 4>}, {transform_indices = @transform_1, window_bounds = array<i64: 49, 256>}, {pipeline_mode = #tpu.pipeline_mode<synchronous>, transform_indices = @transform_2, window_bounds = array<i64: 1, 4>}, {pipeline_mode = #tpu.pipeline_mode<synchronous>, transform_indices = @transform_3, window_bounds = array<i64: 1, 4>}, {pipeline_mode = #tpu.pipeline_mode<synchronous>, transform_indices = @transform_4, window_bounds = array<i64: 4, 32>}, {pipeline_mode = #tpu.pipeline_mode<synchronous>, transform_indices = @transform_5, window_bounds = array<i64: 1, 32>}, {transform_indices = @transform_6, window_bounds = array<i64: 1, 256, 32>}, {transform_indices = @transform_7, window_bounds = array<i64: 1, 49, 32>}]} {
    %c0_i32 = arith.constant 0 : i32
    %0 = arith.cmpi eq, %arg1, %c0_i32 : i32
    %1 = arith.extui %0 : i1 to i32
    %c0_i32_0 = arith.constant 0 : i32
    %2 = arith.cmpi ne, %1, %c0_i32_0 : i32
    scf.if %2 {
      %cst_26 = arith.constant 0.000000e+00 : f32
      %42 = vector.broadcast %cst_26 : f32 to vector<49x32xf32>
      %c0_27 = arith.constant 0 : index
      %c0_28 = arith.constant 0 : index
      %c0_29 = arith.constant 0 : index
      %43 = vector.load %arg9[%c0_27, %c0_28, %c0_29] : memref<1x49x32xf32, #tpu.memory_space<vmem>>, vector<1x49x32xf32>
      %44 = vector.shape_cast %43 : vector<1x49x32xf32> to vector<49x32xf32>
      %45 = vector.shape_cast %42 : vector<49x32xf32> to vector<1x49x32xf32>
      tpu.vector_store %arg9[%c0_27, %c0_28, %c0_29], %45 {strides = array<i32>} : memref<1x49x32xf32, #tpu.memory_space<vmem>>, vector<1x49x32xf32>,
    } else {
    }
    %c0 = arith.constant 0 : index
    %c0_1 = arith.constant 0 : index
    %c0_2 = arith.constant 0 : index
    %3 = vector.load %arg2[%c0, %c0_1, %c0_2] : memref<1x256x4xbf16, #tpu.memory_space<vmem>>, vector<1x256x4xbf16>
    %4 = vector.shape_cast %3 : vector<1x256x4xbf16> to vector<256x4xbf16>
    %5 = arith.extf %4 : vector<256x4xbf16> to vector<256x4xf32>
    %c0_3 = arith.constant 0 : index
    %c0_4 = arith.constant 0 : index
    %6 = vector.load %arg4[%c0_3, %c0_4] : memref<1x4xf32, #tpu.memory_space<vmem>>, vector<1x4xf32>
    %7 = vector.broadcast %6 : vector<1x4xf32> to vector<256x4xf32>
    %8 = arith.mulf %5, %7 : vector<256x4xf32>
    %c0_5 = arith.constant 0 : index
    %c0_6 = arith.constant 0 : index
    %9 = vector.load %arg5[%c0_5, %c0_6] : memref<1x4xf32, #tpu.memory_space<vmem>>, vector<1x4xf32>
    %10 = vector.broadcast %9 : vector<1x4xf32> to vector<256x4xf32>
    %11 = arith.addf %8, %10 : vector<256x4xf32>
    %cst = arith.constant 0.000000e+00 : f32
    %12 = vector.broadcast %cst : f32 to vector<256x4xf32>
    %13 = arith.maximumf %11, %12 : vector<256x4xf32>
    %14 = arith.truncf %13 : vector<256x4xf32> to vector<256x4xbf16>
    %c0_7 = arith.constant 0 : index
    %c0_8 = arith.constant 0 : index
    %15 = vector.load %arg6[%c0_7, %c0_8] : memref<4x32xbf16, #tpu.memory_space<vmem>>, vector<4x32xbf16>
    %cst_9 = arith.constant dense<0.000000e+00> : vector<256x32xf32>
    %16 = tpu.matmul %14, %15, %cst_9 {dimension_numbers = #tpu.dot_dimension_numbers<[1], [0], [0], [1], [0, 0, 1, 1], [], []>} : vector<256x4xbf16>, vector<4x32xbf16>, vector<256x32xf32> -> vector<256x32xf32>
    %c0_10 = arith.constant 0 : index
    %c0_11 = arith.constant 0 : index
    %17 = vector.load %arg7[%c0_10, %c0_11] : memref<1x32xf32, #tpu.memory_space<vmem>>, vector<1x32xf32>
    %18 = vector.broadcast %17 : vector<1x32xf32> to vector<256x32xf32>
    %19 = arith.addf %16, %18 : vector<256x32xf32>
    %20 = arith.truncf %19 : vector<256x32xf32> to vector<256x32xbf16>
    %c0_12 = arith.constant 0 : index
    %c0_13 = arith.constant 0 : index
    %c0_14 = arith.constant 0 : index
    %21 = vector.load %arg8[%c0_12, %c0_13, %c0_14] : memref<1x256x32xbf16, #tpu.memory_space<vmem>>, vector<1x256x32xbf16>
    %22 = vector.shape_cast %21 : vector<1x256x32xbf16> to vector<256x32xbf16>
    %23 = vector.shape_cast %20 : vector<256x32xbf16> to vector<1x256x32xbf16>
    tpu.vector_store %arg8[%c0_12, %c0_13, %c0_14], %23 {strides = array<i32>} : memref<1x256x32xbf16, #tpu.memory_space<vmem>>, vector<1x256x32xbf16>,
    %c256_i32 = arith.constant 256 : i32
    %24 = arith.muli %arg1, %c256_i32 : i32
    %25 = tpu.iota {dimensions = array<i32: 0>} : vector<256x1xi32>
    %26 = vector.broadcast %24 : i32 to vector<256x1xi32>
    %27 = arith.addi %26, %25 : vector<256x1xi32>
    %c256_i32_15 = arith.constant 256 : i32
    %28 = vector.broadcast %c256_i32_15 : i32 to vector<256x1xi32>
    %29 = arith.cmpi slt, %27, %28 : vector<256x1xi32>
    %cst_16 = arith.constant 0.000000e+00 : bf16
    %30 = vector.broadcast %cst_16 : bf16 to vector<256x32xbf16>
    %31 = vector.shape_cast %29 : vector<256x1xi1> to vector<256x1xi1>
    %32 = vector.broadcast %31 : vector<256x1xi1> to vector<256x32xi1>
    %33 = arith.select %32, %20, %30 : vector<256x32xi1>, vector<256x32xbf16>
    %c0_17 = arith.constant 0 : index
    %c0_18 = arith.constant 0 : index
    %c0_19 = arith.constant 0 : index
    %34 = vector.load %arg9[%c0_17, %c0_18, %c0_19] : memref<1x49x32xf32, #tpu.memory_space<vmem>>, vector<1x49x32xf32>
    %35 = vector.shape_cast %34 : vector<1x49x32xf32> to vector<49x32xf32>
    %c0_20 = arith.constant 0 : index
    %c0_21 = arith.constant 0 : index
    %36 = vector.load %arg3[%c0_20, %c0_21] : memref<49x256xbf16, #tpu.memory_space<vmem>>, vector<49x256xbf16>
    %cst_22 = arith.constant dense<0.000000e+00> : vector<49x32xf32>
    %37 = tpu.matmul %36, %33, %cst_22 {dimension_numbers = #tpu.dot_dimension_numbers<[1], [0], [0], [1], [0, 0, 1, 1], [], []>} : vector<49x256xbf16>, vector<256x32xbf16>, vector<49x32xf32> -> vector<49x32xf32>
    %38 = arith.addf %35, %37 : vector<49x32xf32>
    %c0_23 = arith.constant 0 : index
    %c0_24 = arith.constant 0 : index
    %c0_25 = arith.constant 0 : index
    %39 = vector.load %arg9[%c0_23, %c0_24, %c0_25] : memref<1x49x32xf32, #tpu.memory_space<vmem>>, vector<1x49x32xf32>
    %40 = vector.shape_cast %39 : vector<1x49x32xf32> to vector<49x32xf32>
    %41 = vector.shape_cast %38 : vector<49x32xf32> to vector<1x49x32xf32>
    tpu.vector_store %arg9[%c0_23, %c0_24, %c0_25], %41 {strides = array<i32>} : memref<1x49x32xf32, #tpu.memory_space<vmem>>, vector<1x49x32xf32>,
    return
  }
  func.func @transform_0(%arg0: i32, %arg1: i32) -> (i32, i32, i32) {
    %c0_i32 = arith.constant 0 : i32
    %c0_i32_0 = arith.constant 0 : i32
    return %arg0, %arg1, %c0_i32 : i32, i32, i32
  }
  func.func @transform_1(%arg0: i32, %arg1: i32) -> (i32, i32) {
    %c0_i32 = arith.constant 0 : i32
    %c0_i32_0 = arith.constant 0 : i32
    return %c0_i32, %arg1 : i32, i32
  }
  func.func @transform_2(%arg0: i32, %arg1: i32) -> (i32, i32) {
    %c0_i32 = arith.constant 0 : i32
    %c0_i32_0 = arith.constant 0 : i32
    %c0_i32_1 = arith.constant 0 : i32
    return %c0_i32, %c0_i32_0 : i32, i32
  }
  func.func @transform_3(%arg0: i32, %arg1: i32) -> (i32, i32) {
    %c0_i32 = arith.constant 0 : i32
    %c0_i32_0 = arith.constant 0 : i32
    %c0_i32_1 = arith.constant 0 : i32
    return %c0_i32, %c0_i32_0 : i32, i32
  }
  func.func @transform_4(%arg0: i32, %arg1: i32) -> (i32, i32) {
    %c0_i32 = arith.constant 0 : i32
    %c0_i32_0 = arith.constant 0 : i32
    %c0_i32_1 = arith.constant 0 : i32
    return %c0_i32, %c0_i32_0 : i32, i32
  }
  func.func @transform_5(%arg0: i32, %arg1: i32) -> (i32, i32) {
    %c0_i32 = arith.constant 0 : i32
    %c0_i32_0 = arith.constant 0 : i32
    %c0_i32_1 = arith.constant 0 : i32
    return %c0_i32, %c0_i32_0 : i32, i32
  }
  func.func @transform_6(%arg0: i32, %arg1: i32) -> (i32, i32, i32) {
    %c0_i32 = arith.constant 0 : i32
    %c0_i32_0 = arith.constant 0 : i32
    return %arg0, %arg1, %c0_i32 : i32, i32, i32
  }
  func.func @transform_7(%arg0: i32, %arg1: i32) -> (i32, i32, i32) {
    %c0_i32 = arith.constant 0 : i32
    %c0_i32_0 = arith.constant 0 : i32
    %c0_i32_1 = arith.constant 0 : i32
    return %arg0, %c0_i32, %c0_i32_0 : i32, i32, i32
  }
}

module attributes {stable_mosaic.version = 11 : i64} {
  func.func @kernel(%arg0: i32, %arg1: i32, %arg2: memref<1x256x32xbf16, #tpu.memory_space<vmem>>, %arg3: memref<256x49xf32, #tpu.memory_space<vmem>>, %arg4: memref<1x49x16xf32, #tpu.memory_space<vmem>>, %arg5: memref<1x32xf32, #tpu.memory_space<vmem>>, %arg6: memref<1x32xf32, #tpu.memory_space<vmem>>, %arg7: memref<32x32xbf16, #tpu.memory_space<vmem>>, %arg8: memref<48x32xbf16, #tpu.memory_space<vmem>>, %arg9: memref<1x32xf32, #tpu.memory_space<vmem>>, %arg10: memref<1x256x32xf32, #tpu.memory_space<vmem>>) attributes {dimension_semantics = [#tpu.dimension_semantics<parallel>, #tpu.dimension_semantics<parallel>], iteration_bounds = array<i64: 2, 1>, scalar_prefetch = 0 : i64, scratch_operands = 0 : i64, tpu.core_type = #tpu.core_type<tc>, window_params = [{transform_indices = @transform_0, window_bounds = array<i64: 1, 256, 32>}, {transform_indices = @transform_1, window_bounds = array<i64: 256, 49>}, {transform_indices = @transform_2, window_bounds = array<i64: 1, 49, 16>}, {pipeline_mode = #tpu.pipeline_mode<synchronous>, transform_indices = @transform_3, window_bounds = array<i64: 1, 32>}, {pipeline_mode = #tpu.pipeline_mode<synchronous>, transform_indices = @transform_4, window_bounds = array<i64: 1, 32>}, {pipeline_mode = #tpu.pipeline_mode<synchronous>, transform_indices = @transform_5, window_bounds = array<i64: 32, 32>}, {pipeline_mode = #tpu.pipeline_mode<synchronous>, transform_indices = @transform_6, window_bounds = array<i64: 48, 32>}, {pipeline_mode = #tpu.pipeline_mode<synchronous>, transform_indices = @transform_7, window_bounds = array<i64: 1, 32>}, {transform_indices = @transform_8, window_bounds = array<i64: 1, 256, 32>}]} {
    %c0 = arith.constant 0 : index
    %c0_0 = arith.constant 0 : index
    %c0_1 = arith.constant 0 : index
    %0 = vector.load %arg2[%c0, %c0_0, %c0_1] : memref<1x256x32xbf16, #tpu.memory_space<vmem>>, vector<1x256x32xbf16>
    %1 = vector.shape_cast %0 : vector<1x256x32xbf16> to vector<256x32xbf16>
    %2 = arith.extf %1 : vector<256x32xbf16> to vector<256x32xf32>
    %c0_2 = arith.constant 0 : index
    %c0_3 = arith.constant 0 : index
    %3 = vector.load %arg5[%c0_2, %c0_3] : memref<1x32xf32, #tpu.memory_space<vmem>>, vector<1x32xf32>
    %4 = vector.broadcast %3 : vector<1x32xf32> to vector<256x32xf32>
    %5 = arith.mulf %2, %4 : vector<256x32xf32>
    %c0_4 = arith.constant 0 : index
    %c0_5 = arith.constant 0 : index
    %6 = vector.load %arg6[%c0_4, %c0_5] : memref<1x32xf32, #tpu.memory_space<vmem>>, vector<1x32xf32>
    %7 = vector.broadcast %6 : vector<1x32xf32> to vector<256x32xf32>
    %8 = arith.addf %5, %7 : vector<256x32xf32>
    %cst = arith.constant 0.000000e+00 : f32
    %9 = vector.broadcast %cst : f32 to vector<256x32xf32>
    %10 = arith.maximumf %8, %9 : vector<256x32xf32>
    %11 = arith.truncf %10 : vector<256x32xf32> to vector<256x32xbf16>
    %c0_6 = arith.constant 0 : index
    %c0_7 = arith.constant 0 : index
    %12 = vector.load %arg7[%c0_6, %c0_7] : memref<32x32xbf16, #tpu.memory_space<vmem>>, vector<32x32xbf16>
    %cst_8 = arith.constant dense<0.000000e+00> : vector<256x32xf32>
    %13 = tpu.matmul %11, %12, %cst_8 {dimension_numbers = #tpu.dot_dimension_numbers<[1], [0], [0], [1], [0, 0, 1, 1], [], []>} : vector<256x32xbf16>, vector<32x32xbf16>, vector<256x32xf32> -> vector<256x32xf32>
    %c0_9 = arith.constant 0 : index
    %c0_10 = arith.constant 0 : index
    %14 = vector.load %arg3[%c0_9, %c0_10] : memref<256x49xf32, #tpu.memory_space<vmem>>, vector<256x49xf32>
    %c0_11 = arith.constant 0 : index
    %c0_12 = arith.constant 0 : index
    %c0_13 = arith.constant 0 : index
    %15 = vector.load %arg4[%c0_11, %c0_12, %c0_13] : memref<1x49x16xf32, #tpu.memory_space<vmem>>, vector<1x49x16xf32>
    %16 = vector.shape_cast %15 : vector<1x49x16xf32> to vector<49x16xf32>
    %17 = vector.extract_strided_slice %14 {offsets = [0, 0], sizes = [256, 36], strides = [1, 1]} : vector<256x49xf32> to vector<256x36xf32>
    %18 = vector.extract_strided_slice %16 {offsets = [0, 0], sizes = [36, 16], strides = [1, 1]} : vector<49x16xf32> to vector<36x16xf32>
    %cst_14 = arith.constant dense<0.000000e+00> : vector<256x16xf32>
    %19 = tpu.matmul %17, %18, %cst_14 {dimension_numbers = #tpu.dot_dimension_numbers<[1], [0], [0], [1], [0, 0, 1, 1], [], []>} : vector<256x36xf32>, vector<36x16xf32>, vector<256x16xf32> -> vector<256x16xf32>
    %cst_15 = arith.constant 0.000000e+00 : f32
    %20 = vector.broadcast %cst_15 : f32 to vector<256x16xf32>
    %21 = arith.maximumf %19, %20 : vector<256x16xf32>
    %22 = arith.truncf %21 : vector<256x16xf32> to vector<256x16xbf16>
    %23 = vector.extract_strided_slice %14 {offsets = [0, 36], sizes = [256, 9], strides = [1, 1]} : vector<256x49xf32> to vector<256x9xf32>
    %24 = vector.extract_strided_slice %16 {offsets = [36, 0], sizes = [9, 16], strides = [1, 1]} : vector<49x16xf32> to vector<9x16xf32>
    %cst_16 = arith.constant dense<0.000000e+00> : vector<256x16xf32>
    %25 = tpu.matmul %23, %24, %cst_16 {dimension_numbers = #tpu.dot_dimension_numbers<[1], [0], [0], [1], [0, 0, 1, 1], [], []>} : vector<256x9xf32>, vector<9x16xf32>, vector<256x16xf32> -> vector<256x16xf32>
    %cst_17 = arith.constant 0.000000e+00 : f32
    %26 = vector.broadcast %cst_17 : f32 to vector<256x16xf32>
    %27 = arith.maximumf %25, %26 : vector<256x16xf32>
    %28 = arith.truncf %27 : vector<256x16xf32> to vector<256x16xbf16>
    %29 = vector.extract_strided_slice %14 {offsets = [0, 45], sizes = [256, 4], strides = [1, 1]} : vector<256x49xf32> to vector<256x4xf32>
    %30 = vector.extract_strided_slice %16 {offsets = [45, 0], sizes = [4, 16], strides = [1, 1]} : vector<49x16xf32> to vector<4x16xf32>
    %cst_18 = arith.constant dense<0.000000e+00> : vector<256x16xf32>
    %31 = tpu.matmul %29, %30, %cst_18 {dimension_numbers = #tpu.dot_dimension_numbers<[1], [0], [0], [1], [0, 0, 1, 1], [], []>} : vector<256x4xf32>, vector<4x16xf32>, vector<256x16xf32> -> vector<256x16xf32>
    %cst_19 = arith.constant 0.000000e+00 : f32
    %32 = vector.broadcast %cst_19 : f32 to vector<256x16xf32>
    %33 = arith.maximumf %31, %32 : vector<256x16xf32>
    %34 = arith.truncf %33 : vector<256x16xf32> to vector<256x16xbf16>
    %35 = tpu.concatenate %22, %28, %34 in 1 : vector<256x16xbf16>, vector<256x16xbf16>, vector<256x16xbf16> -> vector<256x48xbf16>
    %c0_20 = arith.constant 0 : index
    %c0_21 = arith.constant 0 : index
    %36 = vector.load %arg8[%c0_20, %c0_21] : memref<48x32xbf16, #tpu.memory_space<vmem>>, vector<48x32xbf16>
    %cst_22 = arith.constant dense<0.000000e+00> : vector<256x32xf32>
    %37 = tpu.matmul %35, %36, %cst_22 {dimension_numbers = #tpu.dot_dimension_numbers<[1], [0], [0], [1], [0, 0, 1, 1], [], []>} : vector<256x48xbf16>, vector<48x32xbf16>, vector<256x32xf32> -> vector<256x32xf32>
    %38 = arith.addf %13, %37 : vector<256x32xf32>
    %c0_23 = arith.constant 0 : index
    %c0_24 = arith.constant 0 : index
    %39 = vector.load %arg9[%c0_23, %c0_24] : memref<1x32xf32, #tpu.memory_space<vmem>>, vector<1x32xf32>
    %40 = vector.broadcast %39 : vector<1x32xf32> to vector<256x32xf32>
    %41 = arith.addf %38, %40 : vector<256x32xf32>
    %c0_25 = arith.constant 0 : index
    %c0_26 = arith.constant 0 : index
    %c0_27 = arith.constant 0 : index
    %42 = vector.load %arg10[%c0_25, %c0_26, %c0_27] : memref<1x256x32xf32, #tpu.memory_space<vmem>>, vector<1x256x32xf32>
    %43 = vector.shape_cast %42 : vector<1x256x32xf32> to vector<256x32xf32>
    %44 = vector.shape_cast %41 : vector<256x32xf32> to vector<1x256x32xf32>
    tpu.vector_store %arg10[%c0_25, %c0_26, %c0_27], %44 {strides = array<i32>} : memref<1x256x32xf32, #tpu.memory_space<vmem>>, vector<1x256x32xf32>,
    return
  }
  func.func @transform_0(%arg0: i32, %arg1: i32) -> (i32, i32, i32) {
    %c0_i32 = arith.constant 0 : i32
    %c0_i32_0 = arith.constant 0 : i32
    return %arg0, %arg1, %c0_i32 : i32, i32, i32
  }
  func.func @transform_1(%arg0: i32, %arg1: i32) -> (i32, i32) {
    %c0_i32 = arith.constant 0 : i32
    %c0_i32_0 = arith.constant 0 : i32
    return %arg1, %c0_i32 : i32, i32
  }
  func.func @transform_2(%arg0: i32, %arg1: i32) -> (i32, i32, i32) {
    %c0_i32 = arith.constant 0 : i32
    %c0_i32_0 = arith.constant 0 : i32
    %c0_i32_1 = arith.constant 0 : i32
    return %arg0, %c0_i32, %c0_i32_0 : i32, i32, i32
  }
  func.func @transform_3(%arg0: i32, %arg1: i32) -> (i32, i32) {
    %c0_i32 = arith.constant 0 : i32
    %c0_i32_0 = arith.constant 0 : i32
    %c0_i32_1 = arith.constant 0 : i32
    return %c0_i32, %c0_i32_0 : i32, i32
  }
  func.func @transform_4(%arg0: i32, %arg1: i32) -> (i32, i32) {
    %c0_i32 = arith.constant 0 : i32
    %c0_i32_0 = arith.constant 0 : i32
    %c0_i32_1 = arith.constant 0 : i32
    return %c0_i32, %c0_i32_0 : i32, i32
  }
  func.func @transform_5(%arg0: i32, %arg1: i32) -> (i32, i32) {
    %c0_i32 = arith.constant 0 : i32
    %c0_i32_0 = arith.constant 0 : i32
    %c0_i32_1 = arith.constant 0 : i32
    return %c0_i32, %c0_i32_0 : i32, i32
  }
  func.func @transform_6(%arg0: i32, %arg1: i32) -> (i32, i32) {
    %c0_i32 = arith.constant 0 : i32
    %c0_i32_0 = arith.constant 0 : i32
    %c0_i32_1 = arith.constant 0 : i32
    return %c0_i32, %c0_i32_0 : i32, i32
  }
  func.func @transform_7(%arg0: i32, %arg1: i32) -> (i32, i32) {
    %c0_i32 = arith.constant 0 : i32
    %c0_i32_0 = arith.constant 0 : i32
    %c0_i32_1 = arith.constant 0 : i32
    return %c0_i32, %c0_i32_0 : i32, i32
  }
  func.func @transform_8(%arg0: i32, %arg1: i32) -> (i32, i32, i32) {
    %c0_i32 = arith.constant 0 : i32
    %c0_i32_0 = arith.constant 0 : i32
    return %arg0, %arg1, %c0_i32 : i32, i32, i32
  }
}

</mosaic_0001>

<bundles_post_ra>
// kernel: _forward.2
= control target key start
LH: loop header
LB: loop body
LE: loop exit
PB: predicated region body
PF: predicated region fallthrough
CT: control target
= control target key end

     0   :  { %s1582_s24 = smov 0   ;;  %s1584_s25 = smov 0   ;;  %s2078_s0 = inlined_call_operand.vmem [shape: bf16[2,256,4], index: 0, kind: input, shape index: {}]   ;;  %s2079_s1 = inlined_call_operand.vmem [shape: bf16[49,256], index: 1, kind: input, shape index: {}]   ;;  %s2080_s2 = inlined_call_operand.vmem [shape: f32[1,4], index: 2, kind: input, shape index: {}]   ;;  %s2081_s3 = inlined_call_operand.vmem [shape: f32[1,4], index: 3, kind: input, shape index: {}]   ;;  %s2082_s4 = inlined_call_operand.vmem [shape: bf16[4,32], index: 4, kind: input, shape index: {}]   ;;  %s2083_s5 = inlined_call_operand.vmem [shape: f32[1,32], index: 5, kind: input, shape index: {}]   ;;  %s2084_s6 = inlined_call_operand.vmem [shape: bf16[2,256,32], index: 6, kind: output, shape index: {0}]   ;;  %s2085_s7 = inlined_call_operand.vmem [shape: f32[2,49,32], index: 7, kind: output, shape index: {1}]  }
   0x1   :  { %s1586_s26 = smov 0  }
   0x2 LB: > { %s30_s27 = sadd.s32 1, %s1534_s25  ;;  %p1349_p0 = scmp.ge.s32.totalorder %s1538_s26, 1  ;;  %s1538_s26 = sphi %s1586_s26, %s18_s26   ;;  %s1534_s25 = sphi %s1584_s25, %s2089_s25   ;;  %s1530_s24 = sphi %s1582_s24, %s2088_s24  }
   0x3   : > { %p32_p1 = scmp.ge.s32.totalorder %s30_s27, 2  ;;  %p272_p2 = scmp.lt.s32.totalorder %s1538_s26, 3 }
   0x5   : > { %s2091_s27 = smov (%p32_p1, %s30_s27), 0  ;;  %p273_p3 = pnand %p1349_p0, %p272_p2 }
   0x6   : > { %p323_p4 = scmp.lt.s32.totalorder (!%p273_p3), %s1530_s24, 1 }
   0x7   : > { %276 = sbr.rel (%p273_p3) target bundleno = 490 (0x1ea), region = 44 }
   0xc   : > { %v551_v0 = vld [vmem:[%s2082_s4] sm:$0x3]  ;;  %vm605_vm0 = vcmask 1041408   ;;  %s2093_s24 = smov (!%p323_p4, %s1530_s24), 1  ;;  %vm556_vm1 = vcmask 31744   ;;  %vm730_vm2 = vcmask 257024  }
   0xd   : > { %v607_v1 = vsel %vm605_vm0, %v551_v0, 0  ;;  %s1397_s30 = sshll.u32 %s2093_s24, 7  ;;  %v1616_v2 = vld [vmem:[%s2080_s2] ss:$0 sm:$0xff]  ;;  %vm1540_vm3 = vmmov 1   ;;  %s1486_s8 = smul.u32 56, %s2093_s24 }
   0xe   : > { %616 = vmatpush.bf16.msra.mxu0 %v607_v1  ;;  %1485 = vmatpush.bf16.msra.mxu3 %v607_v1  ;;  %s1611_s10 = scalar_lea.vmem %s2078_s0, %s1397_s30  ;;  %v1623_v7 = vld [vmem:[%s2081_s3] ss:$0 sm:$0xff]  ;;  %s1730_s19 = scalar_lea.vmem %s2084_s6, %s1397_s30  ;;  %vm1735_vm4 = vmpackc.low %vm1540_vm3, %vm1540_vm3  ;;  %vm358_vm5 = vcmask 261120   ;;  %vm365_vm6 = vcmask 253952  }
   0xf   : > { %1484 = vmatpush.bf16.msra.mxu1 %v607_v1  ;;  %v1406_v3 = vld [vmem:[%s1611_s10] sm:$0xff]   ;;  %v1477_v4 = vld [vmem:[%s1611_s10 + $0x48] sm:$0xff]   ;;  %v1478_v15 = vld [vmem:[%s1611_s10 + $0x50] sm:$0xff]   ;;  %s2032_s11 = scalar_lea.vmem %s2085_s7, %s1486_s8 }
  0x10   : > { %v1407_v5 = vunpack.c.l.bf16 %v1406_v3  ;;  %v1408_v6 = vunpack.c.h.bf16 %v1406_v3  ;;  %v1443_v8 = vunpack.c.l.bf16 %v1477_v4  ;;  %v1444_v9 = vunpack.c.h.bf16 %v1477_v4  ;;  %v1469_v14 = vld [vmem:[%s1611_s10 + $0x8] sm:$0xff]   ;;  %v1470_v42 = vld [vmem:[%s1611_s10 + $0x10] sm:$0xff]   ;;  %v1479_v43 = vld [vmem:[%s1611_s10 + $0x58] sm:$0xff]  }
  0x11   : > { %v1411_v20 = vunpack.c.l.bf16 %v1469_v14  ;;  %v1412_v21 = vunpack.c.h.bf16 %v1469_v14  ;;  %v1447_v22 = vunpack.c.l.bf16 %v1478_v15  ;;  %v1448_v23 = vunpack.c.h.bf16 %v1478_v15  ;;  %v1471_v62 = vld [vmem:[%s1611_s10 + $0x18] sm:$0xff]   ;;  %v1480_v63 = vld [vmem:[%s1611_s10 + $0x60] sm:$0xff]  }
  0x12   : > { %v435_v10 = vmul.f32 %v1616_v2, %v1407_v5  ;;  %v436_v11 = vmul.f32 %v1616_v2, %v1408_v6  ;;  %v453_v12 = vmul.f32 %v1616_v2, %v1443_v8  ;;  %v454_v13 = vmul.f32 %v1616_v2, %v1444_v9 }
  0x13   : > { %v437_v30 = vmul.f32 %v1616_v2, %v1411_v20  ;;  %v438_v31 = vmul.f32 %v1616_v2, %v1412_v21  ;;  %v455_v32 = vmul.f32 %v1616_v2, %v1447_v22  ;;  %v456_v33 = vmul.f32 %v1616_v2, %v1448_v23  ;;  %v1472_v20 = vld [vmem:[%s1611_s10 + $0x20] sm:$0xff]   ;;  %v1481_v21 = vld [vmem:[%s1611_s10 + $0x68] sm:$0xff]  }
  0x14   : > { %v471_v16 = vadd.f32 %v1623_v7, %v435_v10  ;;  %v472_v17 = vadd.f32 %v1623_v7, %v436_v11  ;;  %v489_v18 = vadd.f32 %v1623_v7, %v453_v12  ;;  %v490_v19 = vadd.f32 %v1623_v7, %v454_v13 }
  0x15   : > { %v473_v34 = vadd.f32 %v1623_v7, %v437_v30  ;;  %v474_v35 = vadd.f32 %v1623_v7, %v438_v31  ;;  %v491_v36 = vadd.f32 %v1623_v7, %v455_v32  ;;  %v492_v37 = vadd.f32 %v1623_v7, %v456_v33  ;;  %v1475_v32 = vld [vmem:[%s1611_s10 + $0x38] sm:$0xff]  }
  0x16   : > { %v503_v24 = vmax.f32 %v471_v16, 0.0  ;;  %v504_v25 = vmax.f32 %v472_v17, 0.0  ;;  %v521_v26 = vmax.f32 %v489_v18, 0.0  ;;  %v522_v27 = vmax.f32 %v490_v19, 0.0 }
  0x17   : > { %v505_v38 = vmax.f32 %v473_v34, 0.0  ;;  %v506_v39 = vmax.f32 %v474_v35, 0.0  ;;  %v523_v40 = vmax.f32 %v491_v36, 0.0  ;;  %v524_v41 = vmax.f32 %v492_v37, 0.0 }
  0x18   : > { %v535_v28 = vpack.c.bf16 %v504_v25, %v503_v24  ;;  %v544_v29 = vpack.c.bf16 %v522_v27, %v521_v26  ;;  %v1415_v44 = vunpack.c.l.bf16 %v1470_v42  ;;  %v1416_v45 = vunpack.c.h.bf16 %v1470_v42 }
  0x19   : > { %v536_v46 = vpack.c.bf16 %v506_v39, %v505_v38  ;;  %v545_v47 = vpack.c.bf16 %v524_v41, %v523_v40  ;;  %v1451_v48 = vunpack.c.l.bf16 %v1479_v43  ;;  %v1452_v49 = vunpack.c.h.bf16 %v1479_v43 }
  0x1a   : > { %1355 = vmatmul.msk.bf16.vlgmr.msra.gmra.mxu0 %vm556_vm1, %v535_v28  ;;  %1364 = vmatmul.msk.bf16.vlgmr.msra.gmra.mxu3 %vm556_vm1, %v544_v29  ;;  %v439_v50 = vmul.f32 %v1616_v2, %v1415_v44  ;;  %v440_v51 = vmul.f32 %v1616_v2, %v1416_v45  ;;  %v1419_v0 = vunpack.c.l.bf16 %v1471_v62  ;;  %v1420_v1 = vunpack.c.h.bf16 %v1471_v62  ;;  %v1476_v62 = vld [vmem:[%s1611_s10 + $0x40] sm:$0xff]  }
  0x1b   : > { %v457_v52 = vmul.f32 %v1616_v2, %v1451_v48  ;;  %v458_v53 = vmul.f32 %v1616_v2, %v1452_v49  ;;  %v1455_v5 = vunpack.c.l.bf16 %v1480_v63  ;;  %v1456_v6 = vunpack.c.h.bf16 %v1480_v63  ;;  %v1473_v49 = vld [vmem:[%s1611_s10 + $0x28] sm:$0xff]  }
  0x1c   : > { %v475_v54 = vadd.f32 %v1623_v7, %v439_v50  ;;  %v476_v55 = vadd.f32 %v1623_v7, %v440_v51  ;;  %v441_v8 = vmul.f32 %v1616_v2, %v1419_v0  ;;  %v442_v9 = vmul.f32 %v1616_v2, %v1420_v1  ;;  %v1482_v50 = vld [vmem:[%s1611_s10 + $0x70] sm:$0xff]  }
  0x1d   : > { %v493_v56 = vadd.f32 %v1623_v7, %v457_v52  ;;  %v494_v57 = vadd.f32 %v1623_v7, %v458_v53  ;;  %v459_v10 = vmul.f32 %v1616_v2, %v1455_v5  ;;  %v460_v11 = vmul.f32 %v1616_v2, %v1456_v6 }
  0x1e   : > { %v507_v58 = vmax.f32 %v475_v54, 0.0  ;;  %v508_v59 = vmax.f32 %v476_v55, 0.0  ;;  %v477_v12 = vadd.f32 %v1623_v7, %v441_v8  ;;  %v478_v13 = vadd.f32 %v1623_v7, %v442_v9 }
  0x1f   : > { %v525_v60 = vmax.f32 %v493_v56, 0.0  ;;  %v526_v61 = vmax.f32 %v494_v57, 0.0  ;;  %v495_v14 = vadd.f32 %v1623_v7, %v459_v10  ;;  %v496_v15 = vadd.f32 %v1623_v7, %v460_v11 }
  0x20   : > { %v537_v3 = vpack.c.bf16 %v508_v59, %v507_v58  ;;  %v509_v16 = vmax.f32 %v477_v12, 0.0  ;;  %v510_v17 = vmax.f32 %v478_v13, 0.0  ;;  %v1423_v23 = vunpack.c.l.bf16 %v1472_v20 }
  0x21   : > { %v546_v4 = vpack.c.bf16 %v526_v61, %v525_v60  ;;  %v527_v18 = vmax.f32 %v495_v14, 0.0  ;;  %v528_v19 = vmax.f32 %v496_v15, 0.0  ;;  %v1424_v25 = vunpack.c.h.bf16 %v1472_v20 }
  0x22   : > { %v538_v22 = vpack.c.bf16 %v510_v17, %v509_v16  ;;  %v1459_v26 = vunpack.c.l.bf16 %v1481_v21  ;;  %v1460_v27 = vunpack.c.h.bf16 %v1481_v21  ;;  %v443_v28 = vmul.f32 %v1616_v2, %v1423_v23  ;;  %v1474_v17 = vld [vmem:[%s1611_s10 + $0x30] sm:$0xff]  }
  0x23   : > { %v547_v24 = vpack.c.bf16 %v528_v19, %v527_v18  ;;  %v444_v29 = vmul.f32 %v1616_v2, %v1424_v25  ;;  %v1435_v33 = vunpack.c.l.bf16 %v1475_v32  ;;  %v1436_v34 = vunpack.c.h.bf16 %v1475_v32  ;;  %v1483_v18 = vld [vmem:[%s1611_s10 + $0x78] sm:$0xff]  }
  0x24   : > { %v461_v30 = vmul.f32 %v1616_v2, %v1459_v26  ;;  %v462_v31 = vmul.f32 %v1616_v2, %v1460_v27  ;;  %v479_v37 = vadd.f32 %v1623_v7, %v443_v28  ;;  %v1427_v52 = vunpack.c.l.bf16 %v1473_v49 }
  0x25   : > { %v449_v35 = vmul.f32 %v1616_v2, %v1435_v33  ;;  %v450_v36 = vmul.f32 %v1616_v2, %v1436_v34  ;;  %v480_v38 = vadd.f32 %v1623_v7, %v444_v29  ;;  %v1428_v53 = vunpack.c.h.bf16 %v1473_v49 }
  0x26   : > { %v497_v39 = vadd.f32 %v1623_v7, %v461_v30  ;;  %v498_v40 = vadd.f32 %v1623_v7, %v462_v31  ;;  %v511_v45 = vmax.f32 %v479_v37, 0.0  ;;  %v1463_v56 = vunpack.c.l.bf16 %v1482_v50 }
  0x27   : > { %v485_v41 = vadd.f32 %v1623_v7, %v449_v35  ;;  %v486_v42 = vadd.f32 %v1623_v7, %v450_v36  ;;  %v1464_v57 = vunpack.c.h.bf16 %v1482_v50  ;;  %v445_v58 = vmul.f32 %v1616_v2, %v1427_v52 }
  0x28   : > { %v530_v48 = vmax.f32 %v498_v40, 0.0  ;;  %v446_v59 = vmul.f32 %v1616_v2, %v1428_v53  ;;  %v463_v60 = vmul.f32 %v1616_v2, %v1463_v56  ;;  %v1439_v63 = vunpack.c.l.bf16 %v1476_v62 }
  0x29   : > { %v517_v43 = vmax.f32 %v485_v41, 0.0  ;;  %v518_v44 = vmax.f32 %v486_v42, 0.0  ;;  %v464_v61 = vmul.f32 %v1616_v2, %v1464_v57  ;;  %v1440_v0 = vunpack.c.h.bf16 %v1476_v62 }
  0x2a   : > { %1356 = vmatmul.msk.bf16.gmra.mxu0 %vm556_vm1, %v536_v46  ;;  %1365 = vmatmul.msk.bf16.gmra.mxu3 %vm556_vm1, %v545_v47  ;;  %v512_v46 = vmax.f32 %v480_v38, 0.0  ;;  %v529_v47 = vmax.f32 %v497_v39, 0.0  ;;  %v481_v1 = vadd.f32 %v1623_v7, %v445_v58  ;;  %v499_v6 = vadd.f32 %v1623_v7, %v463_v60 }
  0x2b   : > { %v542_v51 = vpack.c.bf16 %v518_v44, %v517_v43  ;;  %v452_v5 = vmul.f32 %v1616_v2, %v1440_v0  ;;  %v500_v8 = vadd.f32 %v1623_v7, %v464_v61  ;;  %v1431_v21 = vunpack.c.l.bf16 %v1474_v17  ;;  %v1375_v44 = vld [vmem:[%s2079_s1 + $0x8] sm:$0xf0] }
  0x2c   : > { %v539_v54 = vpack.c.bf16 %v512_v46, %v511_v45  ;;  %v548_v55 = vpack.c.bf16 %v530_v48, %v529_v47  ;;  %v513_v11 = vmax.f32 %v481_v1, 0.0  ;;  %v531_v15 = vmax.f32 %v499_v6, 0.0 }
  0x2d   : > { %1362 = vmatmul.msk.bf16.vlgmr.msra.gmra.mxu1 %vm556_vm1, %v542_v51  ;;  %v488_v10 = vadd.f32 %v1623_v7, %v452_v5  ;;  %v532_v16 = vmax.f32 %v500_v8, 0.0  ;;  %v1432_v23 = vunpack.c.h.bf16 %v1474_v17  ;;  %v1468_v25 = vunpack.c.h.bf16 %v1483_v18 }
  0x2e   : > { %v447_v26 = vmul.f32 %v1616_v2, %v1431_v21 }
  0x2f   : > { %v520_v14 = vmax.f32 %v488_v10, 0.0  ;;  %v448_v27 = vmul.f32 %v1616_v2, %v1432_v23  ;;  %v466_v29 = vmul.f32 %v1616_v2, %v1468_v25 }
  0x30   : > { %v483_v30 = vadd.f32 %v1623_v7, %v447_v26 }
  0x31   : > { %v484_v31 = vadd.f32 %v1623_v7, %v448_v27  ;;  %v502_v33 = vadd.f32 %v1623_v7, %v466_v29 }
  0x32   : > { %v515_v34 = vmax.f32 %v483_v30, 0.0 }
  0x33   : > { %v516_v35 = vmax.f32 %v484_v31, 0.0  ;;  %v534_v37 = vmax.f32 %v502_v33, 0.0 }
  0x35   : > { %v541_v38 = vpack.c.bf16 %v516_v35, %v515_v34 }
  0x3a   : > { %1357 = vmatmul.msk.bf16.gmra.mxu0 %vm556_vm1, %v537_v3  ;;  %1366 = vmatmul.msk.bf16.gmra.mxu3 %vm556_vm1, %v546_v4  ;;  %v482_v3 = vadd.f32 %v1623_v7, %v446_v59  ;;  %v451_v4 = vmul.f32 %v1616_v2, %v1439_v63 }
  0x3c   : > { %v487_v9 = vadd.f32 %v1623_v7, %v451_v4  ;;  %v514_v12 = vmax.f32 %v482_v3, 0.0 }
  0x3e   : > { %v519_v13 = vmax.f32 %v487_v9, 0.0  ;;  %v540_v20 = vpack.c.bf16 %v514_v12, %v513_v11 }
  0x40   : > { %v543_v19 = vpack.c.bf16 %v520_v14, %v519_v13 }
  0x42   : > { %1363 = vmatmul.msk.bf16.gmra.mxu1 %vm556_vm1, %v543_v19 }
  0x4a   : > { %1358 = vmatmul.msk.bf16.gmra.mxu0 %vm556_vm1, %v538_v22  ;;  %1367 = vmatmul.msk.bf16.gmra.mxu3 %vm556_vm1, %v547_v24  ;;  %v549_v22 = vpack.c.bf16 %v532_v16, %v531_v15  ;;  %v1467_v24 = vunpack.c.l.bf16 %v1483_v18 }
  0x4c   : > { %v465_v28 = vmul.f32 %v1616_v2, %v1467_v24  ;;  %v1722_v2 = vld [vmem:[%s2083_s5] ss:$0 sm:$0xff] }
  0x4e   : > { %v501_v32 = vadd.f32 %v1623_v7, %v465_v28 }
  0x50   : > { %v533_v36 = vmax.f32 %v501_v32, 0.0 }
  0x52   : > { %v550_v39 = vpack.c.bf16 %v534_v37, %v533_v36 }
  0x5a   : > { %1359 = vmatmul.msk.bf16.gmra.mxu0 %vm556_vm1, %v539_v54  ;;  %1368 = vmatmul.msk.bf16.gmra.mxu3 %vm556_vm1, %v548_v55 }
  0x6a   : > { %1360 = vmatmul.msk.bf16.gmra.mxu0 %vm556_vm1, %v540_v20  ;;  %1369 = vmatmul.msk.bf16.gmra.mxu3 %vm556_vm1, %v549_v22 }
  0x7a   : > { %1361 = vmatmul.msk.bf16.gmra.mxu0 %vm556_vm1, %v541_v38  ;;  %1370 = vmatmul.msk.bf16.gmra.mxu3 %vm556_vm1, %v550_v39 }
  0x97   : > { %v618_v40 = vpop.f32.mrf.mxu0 }
  0x98   : > { %v619_v41 = vadd.f32 %v1722_v2, %v618_v40 }
  0x9a   : > { %v698_v42 = vpack.c.bf16 %v619_v41, %v619_v41 }
  0x9c   : > { %731 = vst.msk [vmem:[%s1730_s19] sm:$0xf] %vm730_vm2, %v698_v42  ;;  %v958_v46 = vsel %vm1735_vm4, %v698_v42, 0 }
  0x9d   : > { %v663_v7 = vpop.f32.mrf.mxu3  ;;  %v1744_v50 = vunpack.c.l.b16 %v958_v46 }
  0x9e   : > { %v664_v43 = vadd.f32 %v1722_v2, %v663_v7 }
  0x9f   : > { %v620_v45 = vpop.f32.mrf.mxu0 }
  0xa0   : > { %v716_v47 = vpack.c.bf16 %v664_v43, %v664_v43  ;;  %v621_v48 = vadd.f32 %v1722_v2, %v620_v45 }
  0xa2   : > { %749 = vst.msk [vmem:[%s1730_s19 + $0x48] sm:$0xf] %vm730_vm2, %v716_v47  ;;  %v699_v49 = vpack.c.bf16 %v621_v48, %v621_v48  ;;  %v976_v57 = vsel %vm1735_vm4, %v716_v47, 0 }
  0xa3   : > { %v1762_v62 = vunpack.c.l.b16 %v976_v57 }
  0xa4   : > { %732 = vst.msk [vmem:[%s1730_s19 + $0x4] sm:$0xf] %vm730_vm2, %v699_v49  ;;  %v959_v51 = vsel %vm1735_vm4, %v699_v49, 0 }
  0xa5   : > { %v1750_v52 = vunpack.c.l.b16 %v959_v51  ;;  %v665_v53 = vpop.f32.mrf.mxu3 }
  0xa6   : > { %v666_v54 = vadd.f32 %v1722_v2, %v665_v53 }
  0xa7   : > { %v623_v55 = vpop.f32.mrf.mxu0  ;;  %v1105_v56 = vpack.c.b16 %v1750_v52, %v1744_v50  ;;  %v1399_v50 = vld [vmem:[%s2079_s1 + $0x4] sm:$0xf] }
  0xa8   : > { %v717_v58 = vpack.c.bf16 %v666_v54, %v666_v54  ;;  %v624_v59 = vadd.f32 %v1722_v2, %v623_v55 }
  0xaa   : > { %750 = vst.msk [vmem:[%s1730_s19 + $0x4c] sm:$0xf] %vm730_vm2, %v717_v58  ;;  %v977_v60 = vsel %vm1735_vm4, %v717_v58, 0  ;;  %v700_v61 = vpack.c.bf16 %v624_v59, %v624_v59  ;;  %v653_v55 = vpop.f32.mrf.mxu1 }
  0xab   : > { %v1764_v63 = vunpack.c.l.b16 %v977_v60  ;;  %v654_v58 = vadd.f32 %v1722_v2, %v653_v55 }
  0xac   : > { %733 = vst.msk [vmem:[%s1730_s19 + $0x8] sm:$0xf] %vm730_vm2, %v700_v61  ;;  %v960_v5 = vsel %vm1735_vm4, %v700_v61, 0 }
  0xad   : > { %v668_v0 = vpop.f32.mrf.mxu3  ;;  %v1114_v1 = vpack.c.b16 %v1764_v63, %v1762_v62  ;;  %v1776_v10 = vunpack.c.l.b16 %v960_v5  ;;  %v712_v61 = vpack.c.bf16 %v654_v58, %v654_v58  ;;  %v1402_v62 = vld [vmem:[%s2079_s1 + $0x14] sm:$0xf0] }
  0xae   : > { %v669_v3 = vadd.f32 %v1722_v2, %v668_v0 }
  0xaf   : > { %v625_v4 = vpop.f32.mrf.mxu0  ;;  %745 = vst.msk [vmem:[%s1730_s19 + $0x38] sm:$0xf] %vm730_vm2, %v712_v61 }
  0xb0   : > { %v718_v6 = vpack.c.bf16 %v669_v3, %v669_v3  ;;  %v626_v8 = vadd.f32 %v1722_v2, %v625_v4 }
  0xb2   : > { %751 = vst.msk [vmem:[%s1730_s19 + $0x50] sm:$0xf] %vm730_vm2, %v718_v6  ;;  %v701_v9 = vpack.c.bf16 %v626_v8, %v626_v8  ;;  %v978_v17 = vsel %vm1735_vm4, %v718_v6, 0  ;;  %v655_v5 = vpop.f32.mrf.mxu1  ;;  %v972_v6 = vsel %vm1735_vm4, %v712_v61, 0 }
  0xb3   : > { %v1794_v22 = vunpack.c.l.b16 %v978_v17  ;;  %v656_v8 = vadd.f32 %v1722_v2, %v655_v5 }
  0xb4   : > { %734 = vst.msk [vmem:[%s1730_s19 + $0xc] sm:$0xf] %vm730_vm2, %v701_v9  ;;  %v961_v11 = vsel %vm1735_vm4, %v701_v9, 0 }
  0xb5   : > { %v1782_v12 = vunpack.c.l.b16 %v961_v11  ;;  %v670_v13 = vpop.f32.mrf.mxu3 }
  0xb6   : > { %v671_v14 = vadd.f32 %v1722_v2, %v670_v13  ;;  %v713_v13 = vpack.c.bf16 %v656_v8, %v656_v8 }
  0xb7   : > { %v628_v15 = vpop.f32.mrf.mxu0  ;;  %v1106_v16 = vpack.c.b16 %v1782_v12, %v1776_v10 }
  0xb8   : > { %v719_v18 = vpack.c.bf16 %v671_v14, %v671_v14  ;;  %v629_v19 = vadd.f32 %v1722_v2, %v628_v15  ;;  %v1087_v15 = vunpack.c.l.b16 %v972_v6  ;;  %746 = vst.msk [vmem:[%s1730_s19 + $0x3c] sm:$0xf] %vm730_vm2, %v713_v13 }
  0xba   : > { %752 = vst.msk [vmem:[%s1730_s19 + $0x54] sm:$0xf] %vm730_vm2, %v719_v18  ;;  %v979_v20 = vsel %vm1735_vm4, %v719_v18, 0  ;;  %v702_v21 = vpack.c.bf16 %v629_v19, %v629_v19  ;;  %v973_v19 = vsel %vm1735_vm4, %v713_v13, 0 }
  0xbb   : > { %v1796_v23 = vunpack.c.l.b16 %v979_v20  ;;  %v1088_v20 = vunpack.c.l.b16 %v973_v19 }
  0xbc   : > { %735 = vst.msk [vmem:[%s1730_s19 + $0x10] sm:$0xf] %vm730_vm2, %v702_v21  ;;  %v962_v28 = vsel %vm1735_vm4, %v702_v21, 0 }
  0xbd   : > { %v673_v24 = vpop.f32.mrf.mxu3  ;;  %v1115_v25 = vpack.c.b16 %v1796_v23, %v1794_v22  ;;  %v1808_v32 = vunpack.c.l.b16 %v962_v28  ;;  %v1381_v22 = vld [vmem:[%s2079_s1 + $0x10] sm:$0xf]  ;;  %v1383_v23 = vld [vmem:[%s2079_s1 + $0x18] sm:$0xf0] }
  0xbe   : > { %v674_v26 = vadd.f32 %v1722_v2, %v673_v24  ;;  %v1112_v24 = vpack.c.b16 %v1088_v20, %v1087_v15  ;;  %v1382_v63 = vor.u32 %v1402_v62, %v1381_v22 }
  0xbf   : > { %v630_v27 = vpop.f32.mrf.mxu0 }
  0xc0   : > { %v720_v29 = vpack.c.bf16 %v674_v26, %v674_v26  ;;  %v631_v30 = vadd.f32 %v1722_v2, %v630_v27  ;;  %1137 = vmatpush.bf16.msrb.mxu1 %v1112_v24 }
  0xc2   : > { %753 = vst.msk [vmem:[%s1730_s19 + $0x58] sm:$0xf] %vm730_vm2, %v720_v29  ;;  %v703_v31 = vpack.c.bf16 %v631_v30, %v631_v30  ;;  %v980_v39 = vsel %vm1735_vm4, %v720_v29, 0 }
  0xc3   : > { %v1828_v43 = vunpack.c.l.b16 %v980_v39 }
  0xc4   : > { %736 = vst.msk [vmem:[%s1730_s19 + $0x14] sm:$0xf] %vm730_vm2, %v703_v31  ;;  %v963_v33 = vsel %vm1735_vm4, %v703_v31, 0 }
  0xc5   : > { %v1814_v34 = vunpack.c.l.b16 %v963_v33  ;;  %v675_v35 = vpop.f32.mrf.mxu3 }
  0xc6   : > { %v676_v36 = vadd.f32 %v1722_v2, %v675_v35 }
  0xc7   : > { %v633_v37 = vpop.f32.mrf.mxu0  ;;  %v1107_v38 = vpack.c.b16 %v1814_v34, %v1808_v32 }
  0xc8   : > { %v721_v40 = vpack.c.bf16 %v676_v36, %v676_v36  ;;  %v634_v41 = vadd.f32 %v1722_v2, %v633_v37  ;;  %v658_v37 = vpop.f32.mrf.mxu1 }
  0xca   : > { %754 = vst.msk [vmem:[%s1730_s19 + $0x5c] sm:$0xf] %vm730_vm2, %v721_v40  ;;  %v981_v42 = vsel %vm1735_vm4, %v721_v40, 0  ;;  %v1826_v7 = vpack.c.bf16 %v634_v41, %v634_v41  ;;  %v659_v41 = vadd.f32 %v1722_v2, %v658_v37 }
  0xcb   : > { %v1830_v45 = vunpack.c.l.b16 %v981_v42 }
  0xcc   : > { %737 = vst.msk [vmem:[%s1730_s19 + $0x18] sm:$0xf] %vm730_vm2, %v1826_v7 }
  0xcd   : > { %v678_v46 = vpop.f32.mrf.mxu3  ;;  %v1116_v47 = vpack.c.b16 %v1830_v45, %v1828_v43  ;;  %v1404_v43 = vld [vmem:[%s2079_s1 + $0x24] sm:$0xf0] }
  0xce   : > { %v679_v48 = vadd.f32 %v1722_v2, %v678_v46  ;;  %v1897_v46 = vpack.c.bf16 %v659_v41, %v659_v41 }
  0xcf   : > { %v635_v49 = vpop.f32.mrf.mxu0 }
  0xd0   : > { %v1838_v51 = vpack.c.bf16 %v679_v48, %v679_v48  ;;  %v636_v53 = vadd.f32 %v1722_v2, %v635_v49  ;;  %747 = vst.msk [vmem:[%s1730_s19 + $0x40] sm:$0xf] %vm730_vm2, %v1897_v46  ;;  %v660_v55 = vpop.f32.mrf.mxu1  ;;  %v974_v10 = vsel %vm1735_vm4, %v1897_v46, 0  ;;  %v1391_v46 = vld [vmem:[%s2079_s1 + $0x28] sm:$0xf0] }
  0xd2   : > { %755 = vst.msk [vmem:[%s1730_s19 + $0x60] sm:$0xf] %vm730_vm2, %v1838_v51  ;;  %v1844_v54 = vpack.c.bf16 %v636_v53, %v636_v53 }
  0xd4   : > { %738 = vst.msk [vmem:[%s1730_s19 + $0x1c] sm:$0xf] %vm730_vm2, %v1844_v54 }
  0xd5   : > { %v680_v57 = vpop.f32.mrf.mxu3 }
  0xd6   : > { %v681_v59 = vadd.f32 %v1722_v2, %v680_v57 }
  0xd7   : > { %v638_v60 = vpop.f32.mrf.mxu0 }
  0xd8   : > { %v1851_v0 = vpack.c.bf16 %v681_v59, %v681_v59  ;;  %v639_v3 = vadd.f32 %v1722_v2, %v638_v60  ;;  %v661_v59 = vadd.f32 %v1722_v2, %v660_v55 }
  0xda   : > { %756 = vst.msk [vmem:[%s1730_s19 + $0x64] sm:$0xf] %vm730_vm2, %v1851_v0  ;;  %v1859_v4 = vpack.c.bf16 %v639_v3, %v639_v3  ;;  %v1909_v61 = vpack.c.bf16 %v661_v59, %v661_v59 }
  0xdc   : > { %739 = vst.msk [vmem:[%s1730_s19 + $0x20] sm:$0xf] %vm730_vm2, %v1859_v4  ;;  %v975_v12 = vsel %vm1735_vm4, %v1909_v61, 0 }
  0xdd   : > { %v683_v9 = vpop.f32.mrf.mxu3  ;;  %748 = vst.msk [vmem:[%s1730_s19 + $0x44] sm:$0xf] %vm730_vm2, %v1909_v61  ;;  %v1090_v34 = vunpack.c.l.b16 %v975_v12  ;;  %v1003_v61 = vld [vmem:[%s2079_s1 + $0x30] sm:$0x11] }
  0xde   : > { %v684_v11 = vadd.f32 %v1722_v2, %v683_v9 }
  0xdf   : > { %v640_v14 = vpop.f32.mrf.mxu0 }
  0xe0   : > { %v1868_v17 = vpack.c.bf16 %v684_v11, %v684_v11  ;;  %v641_v18 = vadd.f32 %v1722_v2, %v640_v14 }
  0xe2   : > { %757 = vst.msk [vmem:[%s1730_s19 + $0x68] sm:$0xf] %vm730_vm2, %v1868_v17  ;;  %v1878_v21 = vpack.c.bf16 %v641_v18, %v641_v18 }
  0xe4   : > { %740 = vst.msk [vmem:[%s1730_s19 + $0x24] sm:$0xf] %vm730_vm2, %v1878_v21 }
  0xe5   : > { %v685_v26 = vpop.f32.mrf.mxu3 }
  0xe6   : > { %v686_v27 = vadd.f32 %v1722_v2, %v685_v26 }
  0xe7   : > { %v643_v28 = vpop.f32.mrf.mxu0 }
  0xe8   : > { %v1884_v29 = vpack.c.bf16 %v686_v27, %v686_v27  ;;  %v644_v30 = vadd.f32 %v1722_v2, %v643_v28  ;;  %v966_v27 = vsel %vm1735_vm4, %v1859_v4, 0 }
  0xe9   : > { %v1081_v37 = vunpack.c.l.b16 %v966_v27 }
  0xea   : > { %758 = vst.msk [vmem:[%s1730_s19 + $0x6c] sm:$0xf] %vm730_vm2, %v1884_v29  ;;  %v708_v31 = vpack.c.bf16 %v644_v30, %v644_v30 }
  0xec   : > { %741 = vst.msk [vmem:[%s1730_s19 + $0x28] sm:$0xf] %vm730_vm2, %v708_v31  ;;  %v968_v15 = vsel %vm1735_vm4, %v708_v31, 0 }
  0xed   : > { %v688_v33 = vpop.f32.mrf.mxu3  ;;  %v1083_v28 = vunpack.c.l.b16 %v968_v15 }
  0xee   : > { %v689_v35 = vadd.f32 %v1722_v2, %v688_v33  ;;  %v967_v33 = vsel %vm1735_vm4, %v1878_v21, 0  ;;  %v964_v21 = vsel %vm1735_vm4, %v1826_v7, 0  ;;  %v984_v7 = vsel %vm1735_vm4, %v1868_v17, 0 }
  0xef   : > { %v645_v36 = vpop.f32.mrf.mxu0  ;;  %v1079_v59 = vunpack.c.l.b16 %v964_v21 }
  0xf0   : > { %v726_v39 = vpack.c.bf16 %v689_v35, %v689_v35  ;;  %v646_v40 = vadd.f32 %v1722_v2, %v645_v36 }
  0xf2   : > { %759 = vst.msk [vmem:[%s1730_s19 + $0x70] sm:$0xf] %vm730_vm2, %v726_v39  ;;  %v709_v42 = vpack.c.bf16 %v646_v40, %v646_v40  ;;  %v1082_v40 = vunpack.c.l.b16 %v967_v33 }
  0xf4   : > { %742 = vst.msk [vmem:[%s1730_s19 + $0x2c] sm:$0xf] %vm730_vm2, %v709_v42  ;;  %v969_v18 = vsel %vm1735_vm4, %v709_v42, 0 }
  0xf5   : > { %v690_v48 = vpop.f32.mrf.mxu3  ;;  %v1084_v30 = vunpack.c.l.b16 %v969_v18  ;;  %v1023_v18 = vunpack.c.l.b16 %v1003_v61 }
  0xf6   : > { %v691_v49 = vadd.f32 %v1722_v2, %v690_v48 }
  0xf7   : > { %v648_v53 = vpop.f32.mrf.mxu0  ;;  %v1110_v41 = vpack.c.b16 %v1084_v30, %v1083_v28 }
  0xf8   : > { %v727_v57 = vpack.c.bf16 %v691_v49, %v691_v49  ;;  %v649_v58 = vadd.f32 %v1722_v2, %v648_v53  ;;  %v965_v49 = vsel %vm1735_vm4, %v1844_v54, 0  ;;  %v986_v53 = vsel %vm1735_vm4, %v726_v39, 0 }
  0xf9   : > { %v983_v39 = vsel %vm1735_vm4, %v1851_v0, 0  ;;  %v1373_v0 = vld [vmem:[%s2079_s1] sm:$0xf] }
  0xfa   : > { %760 = vst.msk [vmem:[%s1730_s19 + $0x74] sm:$0xf] %vm730_vm2, %v727_v57  ;;  %v710_v60 = vpack.c.bf16 %v649_v58, %v649_v58  ;;  %v985_v58 = vsel %vm1735_vm4, %v1884_v29, 0  ;;  %v982_v29 = vsel %vm1735_vm4, %v1838_v51, 0  ;;  %v1400_v51 = vld [vmem:[%s2079_s1 + $0x4] sm:$0xf0] }
  0xfb   : > { %v1100_v54 = vunpack.c.l.b16 %v985_v58  ;;  %v1374_v32 = vor.u32 %v1400_v51, %v1373_v0 }
  0xfc   : > { %743 = vst.msk [vmem:[%s1730_s19 + $0x30] sm:$0xf] %vm730_vm2, %v710_v60  ;;  %v970_v8 = vsel %vm1735_vm4, %v710_v60, 0  ;;  %v1080_v60 = vunpack.c.l.b16 %v965_v49 }
  0xfd   : > { %v693_v3 = vpop.f32.mrf.mxu3  ;;  %v1085_v14 = vunpack.c.l.b16 %v970_v8  ;;  %v1099_v8 = vunpack.c.l.b16 %v984_v7 }
  0xfe   : > { %v694_v5 = vadd.f32 %v1722_v2, %v693_v3  ;;  %v1101_v3 = vunpack.c.l.b16 %v986_v53 }
  0xff   : > { %v650_v6 = vpop.f32.mrf.mxu0 }
 0x100   : > { %v728_v9 = vpack.c.bf16 %v694_v5, %v694_v5  ;;  %v651_v11 = vadd.f32 %v1722_v2, %v650_v6  ;;  %v1109_v5 = vpack.c.b16 %v1082_v40, %v1081_v37 }
 0x102   : > { %761 = vst.msk [vmem:[%s1730_s19 + $0x78] sm:$0xf] %vm730_vm2, %v728_v9  ;;  %v711_v13 = vpack.c.bf16 %v651_v11, %v651_v11  ;;  %v988_v36 = vsel %vm1735_vm4, %v728_v9, 0  ;;  %v1108_v9 = vpack.c.b16 %v1080_v60, %v1079_v59  ;;  %v1098_v11 = vunpack.c.l.b16 %v983_v39 }
 0x103   : > { %v1103_v42 = vunpack.c.l.b16 %v988_v36 }
 0x104   : > { %744 = vst.msk [vmem:[%s1730_s19 + $0x34] sm:$0xf] %vm730_vm2, %v711_v13  ;;  %v971_v19 = vsel %vm1735_vm4, %v711_v13, 0  ;;  %v1118_v13 = vpack.c.b16 %v1100_v54, %v1099_v8 }
 0x105   : > { %v1086_v20 = vunpack.c.l.b16 %v971_v19  ;;  %v695_v24 = vpop.f32.mrf.mxu3  ;;  %v1031_v19 = vpack.c.b16 %v1023_v18, %v1023_v18 }
 0x106   : > { %v696_v26 = vadd.f32 %v1722_v2, %v695_v24  ;;  %v987_v2 = vsel %vm1735_vm4, %v727_v57, 0 }
 0x107   : > { %v1111_v31 = vpack.c.b16 %v1086_v20, %v1085_v14  ;;  %v1102_v55 = vunpack.c.l.b16 %v987_v2  ;;  %v1097_v14 = vunpack.c.l.b16 %v982_v29  ;;  %v1024_v20 = vunpack.c.h.b16 %v1003_v61 }
 0x108   : > { %v729_v35 = vpack.c.bf16 %v696_v26, %v696_v26  ;;  %v1541_v26 = vmov 0.0  }
 0x109   : > { %1138 = vmatpush.bf16.msrb.mxu1 %v1111_v31  ;;  %v1119_v6 = vpack.c.b16 %v1102_v55, %v1101_v3  ;;  %v1117_v17 = vpack.c.b16 %v1098_v11, %v1097_v14  ;;  %v1032_v24 = vpack.c.b16 %v1024_v20, %v1024_v20  ;;  %359 = vst.msk [vmem:[%s2032_s11] sm:$0xff] %vm358_vm5, %v1541_v26 }
 0x10a   : > { %762 = vst.msk [vmem:[%s1730_s19 + $0x7c] sm:$0xf] %vm730_vm2, %v729_v35  ;;  %v989_v4 = vsel %vm1735_vm4, %v729_v35, 0 }
 0x10b   : > { %v1104_v48 = vunpack.c.l.b16 %v989_v4  ;;  %360 = vst.msk [vmem:[%s2032_s11 + $0x8] sm:$0xff] %vm358_vm5, %v1541_v26 }
 0x10c   : > { %361 = vst.msk [vmem:[%s2032_s11 + $0x10] sm:$0xff] %vm358_vm5, %v1541_v26 }
 0x10d   : > { %1139 = vmatpush.bf16.msrb.mxu1 %v1110_v41  ;;  %v1120_v57 = vpack.c.b16 %v1104_v48, %v1103_v42  ;;  %362 = vst.msk [vmem:[%s2032_s11 + $0x18] sm:$0xff] %vm358_vm5, %v1541_v26 }
 0x10e   : > { %363 = vst.msk [vmem:[%s2032_s11 + $0x20] sm:$0xff] %vm358_vm5, %v1541_v26 }
 0x10f   : > { %1165 = vmatpush.bf16.msra.mxu2 %v1120_v57  ;;  %364 = vst.msk [vmem:[%s2032_s11 + $0x28] sm:$0xff] %vm358_vm5, %v1541_v26 }
 0x110   : > { %v990_v30 = vld [vmem:[%s2032_s11] sm:$0xff]  ;;  %366 = vst.msk [vmem:[%s2032_s11 + $0x30] sm:$0x1] %vm365_vm6, %v1541_v26 }
 0x111   : > { %1140 = vmatpush.bf16.msrb.mxu1 %v1109_v5 }
 0x112   : > { %v991_v37 = vld [vmem:[%s2032_s11 + $0x8] sm:$0xff] }
 0x113   : > { %1166 = vmatpush.bf16.msra.mxu2 %v1119_v6  ;;  %v992_v42 = vld [vmem:[%s2032_s11 + $0x10] sm:$0xff] }
 0x114   : > { %v993_v55 = vld [vmem:[%s2032_s11 + $0x18] sm:$0xff] }
 0x115   : > { %1141 = vmatpush.bf16.msrb.mxu1 %v1108_v9  ;;  %v994_v3 = vld [vmem:[%s2032_s11 + $0x20] sm:$0xff] }
 0x116   : > { %v995_v39 = vld [vmem:[%s2032_s11 + $0x28] sm:$0xff] }
 0x117   : > { %1167 = vmatpush.bf16.msra.mxu2 %v1118_v13  ;;  %v996_v13 = vld [vmem:[%s2032_s11 + $0x30] sm:$0x1] }
 0x119   : > { %1142 = vmatpush.bf16.msrb.mxu1 %v1107_v38  ;;  %v1389_v38 = vld [vmem:[%s2079_s1 + $0x20] sm:$0xf] }
 0x11a   : > { %v1390_v45 = vor.u32 %v1404_v43, %v1389_v38 }
 0x11b   : > { %1168 = vmatpush.bf16.msra.mxu2 %v1117_v17 }
 0x11d   : > { %1143 = vmatpush.bf16.msrb.mxu1 %v1106_v16  ;;  %v1089_v16 = vunpack.c.l.b16 %v974_v10 }
 0x11f   : > { %1169 = vmatpush.bf16.msra.mxu2 %v1116_v47  ;;  %v1113_v52 = vpack.c.b16 %v1090_v34, %v1089_v16  ;;  %v1403_v47 = vld [vmem:[%s2079_s1 + $0x24] sm:$0xf] }
 0x120   : > { %v1394_v15 = vor.u32 %v1403_v47, %v1391_v46 }
 0x121   : > { %1144 = vmatpush.bf16.msrb.mxu1 %v1105_v56  ;;  %v1378_v56 = vor.u32 %v1399_v50, %v1375_v44 }
 0x123   : > { %1170 = vmatpush.bf16.msra.mxu2 %v1115_v25 }
 0x124   : > { %1145 = vmatmul.bf16.vlgmr.msrb.gmra.mxu1 %v1374_v32 }
 0x127   : > { %1171 = vmatpush.bf16.msra.mxu2 %v1114_v1  ;;  %v1401_v1 = vld [vmem:[%s2079_s1 + $0x14] sm:$0xf] }
 0x128   : > { %v1386_v25 = vor.u32 %v1401_v1, %v1383_v23 }
 0x12b   : > { %1172 = vmatpush.bf16.msra.mxu2 %v1113_v52 }
 0x12e   : > { %1173 = vmatmul.bf16.vlgmr.msra.gmra.mxu2 %v1378_v56 }
 0x134   : > { %1150 = vmatmul.bf16.gmra.mxu1 %v1382_v63 }
 0x13e   : > { %1178 = vmatmul.bf16.gmra.mxu2 %v1386_v25 }
 0x144   : > { %1155 = vmatmul.bf16.gmra.mxu1 %v1390_v45 }
 0x14e   : > { %1183 = vmatmul.bf16.gmra.mxu2 %v1394_v15 }
 0x154   : > { %1160 = vmatmul.bf16.gmra.mxu1 %v1031_v19 }
 0x15e   : > { %1188 = vmatmul.bf16.gmra.mxu2 %v1032_v24 }
 0x1a1   : > { %v1146_v27 = vpop.f32.mrf.mxu1 }
 0x1a9   : > { %v1148_v28 = vpop.f32.mrf.mxu1 }
 0x1b1   : > { %v1174_v31 = vpop.f32.mrf.mxu2  ;;  %v1151_v33 = vpop.f32.mrf.mxu1 }
 0x1b2   : > { %v1175_v35 = vadd.f32 %v1174_v31, %v1146_v27 }
 0x1b4   : > { %v1193_v36 = vadd.f32 %v1175_v35, %v990_v30 }
 0x1b6   : > { %1201 = vst.msk [vmem:[%s2032_s11] sm:$0xff] %vm358_vm5, %v1193_v36 }
 0x1b9   : > { %v1176_v2 = vpop.f32.mrf.mxu2  ;;  %v1153_v4 = vpop.f32.mrf.mxu1 }
 0x1ba   : > { %v1177_v40 = vadd.f32 %v1176_v2, %v1148_v28 }
 0x1bc   : > { %v1194_v41 = vadd.f32 %v1177_v40, %v991_v37 }
 0x1be   : > { %1202 = vst.msk [vmem:[%s2032_s11 + $0x8] sm:$0xff] %vm358_vm5, %v1194_v41 }
 0x1c1   : > { %v1179_v48 = vpop.f32.mrf.mxu2  ;;  %v1156_v21 = vpop.f32.mrf.mxu1 }
 0x1c2   : > { %v1180_v49 = vadd.f32 %v1179_v48, %v1151_v33 }
 0x1c4   : > { %v1195_v53 = vadd.f32 %v1180_v49, %v992_v42 }
 0x1c6   : > { %1203 = vst.msk [vmem:[%s2032_s11 + $0x10] sm:$0xff] %vm358_vm5, %v1195_v53 }
 0x1c9   : > { %v1181_v57 = vpop.f32.mrf.mxu2  ;;  %v1158_v58 = vpop.f32.mrf.mxu1 }
 0x1ca   : > { %v1182_v59 = vadd.f32 %v1181_v57, %v1153_v4 }
 0x1cc   : > { %v1196_v60 = vadd.f32 %v1182_v59, %v993_v55 }
 0x1ce   : > { %1204 = vst.msk [vmem:[%s2032_s11 + $0x18] sm:$0xff] %vm358_vm5, %v1196_v60 }
 0x1d1   : > { %v1184_v5 = vpop.f32.mrf.mxu2  ;;  %v1161_v7 = vpop.f32.mrf.mxu1 }
 0x1d2   : > { %v1185_v54 = vadd.f32 %v1184_v5, %v1156_v21 }
 0x1d4   : > { %v1197_v6 = vadd.f32 %v1185_v54, %v994_v3 }
 0x1d6   : > { %1205 = vst.msk [vmem:[%s2032_s11 + $0x20] sm:$0xff] %vm358_vm5, %v1197_v6 }
 0x1d9   : > { %v1186_v8 = vpop.f32.mrf.mxu2  ;;  %v1163_v9 = vpop.f32.mrf.mxu1 }
 0x1da   : > { %v1187_v29 = vadd.f32 %v1186_v8, %v1158_v58 }
 0x1dc   : > { %v1198_v11 = vadd.f32 %v1187_v29, %v995_v39 }
 0x1de   : > { %1206 = vst.msk [vmem:[%s2032_s11 + $0x28] sm:$0xff] %vm358_vm5, %v1198_v11 }
 0x1e1   : > { %v1189_v14 = vpop.f32.mrf.mxu2 }
 0x1e2   : > { %v1190_v17 = vadd.f32 %v1189_v14, %v1161_v7 }
 0x1e4   : > { %v1199_v0 = vadd.f32 %v1190_v17, %v996_v13 }
 0x1e6   : > { %1208 = vst.msk [vmem:[%s2032_s11 + $0x30] sm:$0x1] %vm365_vm6, %v1199_v0 }
 0x1e9   : > { %v1191_v51 = vpop.f32.mrf.mxu2 }
 0x1ea PF: > { %s18_s26 = sadd.s32 1, %s1538_s26   ;;  %s2088_s24 = smov %s1534_s25 }
 0x1eb   : > { %p15_p5 = scmp.ge.s32.totalorder %s18_s26, 4   ;;  %s2089_s25 = smov %s2091_s27 }
 0x1ed   :  { %17 = sbr.rel (!%p15_p5) target bundleno = 2 (0x2), region = 93 }

// kernel: _forward.3
= control target key start
LH: loop header
LB: loop body
LE: loop exit
PB: predicated region body
PF: predicated region fallthrough
CT: control target
= control target key end

     0   :  { %13 = vsyncpa [#allocation3], 0  ;;  %s3793_s0 = inlined_call_operand.vmem [shape: bf16[2,256,32], index: 0, kind: input, shape index: {}]   ;;  %s3794_s1 = inlined_call_operand.vmem [shape: f32[256,49], index: 1, kind: input, shape index: {}]   ;;  %s3795_s2 = inlined_call_operand.vmem [shape: f32[2,49,16], index: 2, kind: input, shape index: {}]   ;;  %s3796_s3 = inlined_call_operand.vmem [shape: f32[1,32], index: 3, kind: input, shape index: {}]   ;;  %s3797_s4 = inlined_call_operand.vmem [shape: f32[1,32], index: 4, kind: input, shape index: {}]   ;;  %s3798_s5 = inlined_call_operand.vmem [shape: bf16[32,32], index: 5, kind: input, shape index: {}]   ;;  %s3799_s6 = inlined_call_operand.vmem [shape: bf16[48,32], index: 6, kind: input, shape index: {}]   ;;  %s3800_s7 = inlined_call_operand.vmem [shape: f32[1,32], index: 7, kind: input, shape index: {}]   ;;  %s3801_s8 = inlined_call_operand.hbm [shape: f32[2,256,32], index: 8, kind: output, shape index: {}]  }
   0x1   :  { %15 = vsyncpa [#allocation3 + $0x1], 0  ;;  %s2845_s27 = smov 0   ;;  %s2847_s28 = smov 0  }
   0x2   :  { %s2849_s29 = smov 0   ;;  %s2851_s30 = smov 0  }
   0x3   :  { %s2853_s9 = smov 0   ;;  %s2855_s10 = smov 0  }
   0x4 LB: > { %s2383_s11 = sadd.s32 4294967295, %s2792_s10   ;;  %s2384_s12 = sadd.s32 4294967294, %s2792_s10   ;;  %s2792_s10 = sphi %s2855_s10, %s21_s10   ;;  %s2788_s9 = sphi %s2853_s9, %s3808_s9   ;;  %s2784_s30 = sphi %s2851_s30, %s3807_s30   ;;  %s2780_s29 = sphi %s2849_s29, %s3806_s29   ;;  %s2776_s28 = sphi %s2847_s28, %s3805_s28   ;;  %s2772_s27 = sphi %s2845_s27, %s3804_s27  }
   0x5   : > { %s33_s13 = sadd.s32 1, %s2788_s9  ;;  %s227_s14 = sadd.s32 1, %s2780_s29 }
   0x6   : > { %p35_p0 = scmp.ge.s32.totalorder %s33_s13, 2  ;;  %p237_p1 = scmp.ne.s32.totalorder %s2780_s29, %s2776_s28 }
   0x7   : > { %p238_p2 = scmp.eq.s32.totalorder %s2383_s11, 1  ;;  %p243_p3 = scmp.ne.s32.totalorder %s2776_s28, %s2772_s27 }
   0x8   : > { %s3810_s13 = smov (%p35_p0, %s33_s13), 0  ;;  %p244_p5 = scmp.eq.s32.totalorder %s2384_s12, 1 }
   0x9   : > { %p2885_p4 = por %p238_p2, %p237_p1  ;;  %s222_s16 = ssub.s32 %s2788_s9, %s3810_s13 }
   0xa   : > { %p2388_p6 = scmp.ge.s32.totalorder %s2792_s10, 1  ;;  %p225_p7 = scmp.eq.s32.totalorder %s222_s16, 0 }
   0xb   : > { %p2892_p8 = por %p244_p5, %p243_p3  ;;  %p307_p9 = scmp.lt.s32.totalorder %s2792_s10, 3 }
   0xc   : > { %s2898_s18 = scalar_select %p225_p7, %s2780_s29, %s227_s14  }
   0xd   : > { %p308_p10 = pnand %p2388_p6, %p307_p9 }
   0xe   : > { %s2794_s23 = smov (!%p308_p10), 83   ;;  %s2795_s26 = smov (!%p308_p10), 92  }
   0xf   : > { %311 = sbr.rel (%p308_p10) target bundleno = 869 (0x365), region = 52  ;;  %p356_p11 = scmp.lt.s32.totalorder (!%p308_p10), %s2784_s30, 1 }
  0x10   : > { %s2796_s11 = smov (!%p308_p10), 32   ;;  %s2797_s12 = smov (!%p308_p10), 16  }
  0x11   : > { %s352_s14 = sand.u32 (!%p308_p10), 1, %s2776_s28  }
  0x14   : > { %v2903_v0 = vld [vmem:[%s3794_s1] sm:$0xff]  ;;  %v2908_v1 = vld [vmem:[%s3794_s1 + $0x8] sm:$0xff]  ;;  %v2917_v2 = vld [vmem:[%s3794_s1 + $0x10] sm:$0xff]  ;;  %s2992_s19 = scalar_select %p356_p11, %s2784_s30, 1  ;;  %vm1262_vm0 = vcmask 1042432   ;;  %vm702_vm1 = vcmask 1043456  }
  0x15   : > { %1197 = vrot.lane.b32.xlu0 %v2903_v0, %s2794_s23  ;;  %1199 = vrot.lane.b32.xlu1 %v2908_v1, %s2794_s23  ;;  %v2930_v3 = vld [vmem:[%s3794_s1 + $0x18] sm:$0xff]  ;;  %v2939_v4 = vld [vmem:[%s3794_s1 + $0x20] sm:$0xff]  ;;  %vm1017_vm2 = vcmask 1040384   ;;  %vm1266_vm3 = vcmask 31744   ;;  %vm952_vm4 = vcmask 72704   ;;  %vm605_vm5 = vcmask 293888  }
  0x16   : > { %1201 = vrot.lane.b32.xlu2 %v2917_v2, %s2794_s23  ;;  %v2946_v5 = vld [vmem:[%s3794_s1 + $0x28] sm:$0xff]  ;;  %v2957_v6 = vld [vmem:[%s3794_s1 + $0x30] sm:$0xff]  ;;  %v2966_v7 = vld [vmem:[%s3794_s1 + $0x38] sm:$0xff]  ;;  %s2647_s20 = smul.u32 56, %s2992_s19  ;;  %vm1863_vm6 = vcmask 261120   ;;  %vm1814_vm7 = vcmask 130048  }
  0x17   : > { %v2973_v8 = vld [vmem:[%s3794_s1 + $0x40] sm:$0xff]  ;;  %v2984_v9 = vld [vmem:[%s3794_s1 + $0x48] sm:$0xff]  ;;  %v3014_v19 = vld [vmem:[%s3794_s1 + $0x50] sm:$0xff]  ;;  %vm1920_vm8 = vcmask 392192  }
  0x18   : > { %s2998_s24 = scalar_lea.vmem %s3795_s2, %s2647_s20  ;;  %v3019_v20 = vld [vmem:[%s3794_s1 + $0x58] sm:$0xff]  ;;  %v3030_v21 = vld [vmem:[%s3794_s1 + $0x60] sm:$0xff]  ;;  %v3042_v23 = vld [vmem:[%s3794_s1 + $0x68] sm:$0xff] }
  0x19   : > { %v603_v10 = vld [vmem:[%s2998_s24 + $0x28] sm:$0xff]  ;;  %v604_v11 = vld [vmem:[%s2998_s24 + $0x30] sm:$0x1]  ;;  %v602_v16 = vld [vmem:[%s2998_s24 + $0x20] sm:$0xff] }
  0x1a   : > { %v1263_v12 = vrot.slane %v603_v10, 5  ;;  %v1264_v13 = vrot.slane %v604_v11, 5  ;;  %v949_v15 = vrot.slane %v603_v10, 4  ;;  %v948_v17 = vrot.slane %v602_v16, 4  ;;  %2393 = vmatpush.msk.msra.mxu0 %vm702_vm1, %v602_v16  ;;  %2635 = vmatpush.msk.msra.mxu3 %vm702_vm1, %v602_v16  ;;  %v3047_v24 = vld [vmem:[%s3794_s1 + $0x70] sm:$0xff]  ;;  %v601_v27 = vld [vmem:[%s2998_s24 + $0x18] sm:$0xff] }
  0x1b   : > { %v600_v28 = vld [vmem:[%s2998_s24 + $0x10] sm:$0xff]  ;;  %v3062_v29 = vld [vmem:[%s3794_s1 + $0x78] sm:$0xff]  ;;  %v599_v31 = vld [vmem:[%s2998_s24 + $0x8] sm:$0xff] }
  0x1c   : > { %v3002_v14 = vsel %vm1262_vm0, %v1263_v12, %v1264_v13  ;;  %2426 = vmatpush.msk.msra.mxu1 %vm1017_vm2, %v949_v15  ;;  %v950_v18 = vsel %vm702_vm1, %v948_v17, %v949_v15  ;;  %718 = vmatpush.msra.mxu0 %v601_v27  ;;  %v598_v32 = vld [vmem:[%s2998_s24] sm:$0xff]  ;;  %v3087_v37 = vld [vmem:[%s3794_s1 + $0x88] sm:$0xff]  ;;  %v3102_v40 = vld [vmem:[%s3794_s1 + $0x90] sm:$0xff]  ;;  %s2549_s24 = sshll.u32 %s2992_s19, 7 }
  0x1d   : > { %883 = vrot.lane.b32.xlu0 %v2903_v0, %s2795_s26  ;;  %885 = vrot.lane.b32.xlu1 %v2908_v1, %s2795_s26  ;;  %v3082_v36 = vld [vmem:[%s3794_s1 + $0x80] sm:$0xff]  ;;  %v3115_v43 = vld [vmem:[%s3794_s1 + $0x98] sm:$0xff]  ;;  %s3360_s19 = scalar_lea.vmem %s3793_s0, %s2549_s24 }
  0x1e   : > { %887 = vrot.lane.b32.xlu2 %v2917_v2, %s2795_s26  ;;  %2459 = vmatpush.msk.msra.mxu2 %vm702_vm1, %v3002_v14  ;;  %v3120_v44 = vld [vmem:[%s3794_s1 + $0xa0] sm:$0xff]  ;;  %v3135_v47 = vld [vmem:[%s3794_s1 + $0xa8] sm:$0xff]  ;;  %v3148_v50 = vld [vmem:[%s3794_s1 + $0xb0] sm:$0xff] }
  0x1f   : > { %1035 = vmatpush.msra.mxu1 %v950_v18  ;;  %719 = vmatpush.msra.mxu0 %v600_v28  ;;  %v3161_v53 = vld [vmem:[%s3794_s1 + $0xb8] sm:$0xff]  ;;  %v3201_v63 = vld [vmem:[%s3794_s1 + $0xc8] sm:$0xff] }
  0x20   : > { %2636 = vmatpush.msra.mxu3 %v601_v27  ;;  %v3190_v61 = vld [vmem:[%s3794_s1 + $0xf8] sm:$0xff] }
  0x21   : > { %720 = vmatpush.msra.mxu0 %v599_v31 }
  0x22   : > { %2637 = vmatpush.msra.mxu3 %v600_v28 }
  0x23   : > { %721 = vmatpush.msra.mxu0 %v598_v32 }
  0x24   : > { %2638 = vmatpush.msra.mxu3 %v599_v31  ;;  %2394 = vmatmul.msk.f32.vlgmr.msra.gmra.mxu0 %vm605_vm5, %v2903_v0 }
  0x25   : > { %1203 = vrot.lane.b32.xlu0 %v2930_v3, %s2794_s23  ;;  %889 = vrot.lane.b32.xlu1 %v2930_v3, %s2795_s26 }
  0x26   : > { %1205 = vrot.lane.b32.xlu2 %v2939_v4, %s2794_s23  ;;  %2639 = vmatpush.msra.mxu3 %v598_v32 }
  0x28   : > { %2640 = vmatpush.msk.msrb.mxu3 %vm1017_vm2, %v949_v15  ;;  %v3237_v15 = vld [vmem:[%s3794_s1 + $0xe8] sm:$0xff] }
  0x2a   : > { %2641 = vmatpush.msrb.mxu3 %v950_v18 }
  0x2c   : > { %2395 = vmatmul.msk.f32.gmra.mxu0 %vm605_vm5, %v2908_v1 }
  0x2d   : > { %1207 = vrot.lane.b32.xlu1 %v2946_v5, %s2794_s23  ;;  %891 = vrot.lane.b32.xlu0 %v2939_v4, %s2795_s26 }
  0x2e   : > { %893 = vrot.lane.b32.xlu2 %v2946_v5, %s2795_s26 }
  0x34   : > { %2396 = vmatmul.msk.f32.gmra.mxu0 %vm605_vm5, %v2917_v2 }
  0x35   : > { %1209 = vrot.lane.b32.xlu0 %v2957_v6, %s2794_s23  ;;  %895 = vrot.lane.b32.xlu1 %v2957_v6, %s2795_s26 }
  0x36   : > { %1211 = vrot.lane.b32.xlu2 %v2966_v7, %s2794_s23 }
  0x3c   : > { %2397 = vmatmul.msk.f32.gmra.mxu0 %vm605_vm5, %v2930_v3 }
  0x3d   : > { %897 = vrot.lane.b32.xlu0 %v2966_v7, %s2795_s26  ;;  %1213 = vrot.lane.b32.xlu1 %v2973_v8, %s2794_s23 }
  0x3e   : > { %899 = vrot.lane.b32.xlu2 %v2973_v8, %s2795_s26 }
  0x44   : > { %2398 = vmatmul.msk.f32.gmra.mxu0 %vm605_vm5, %v2939_v4  ;;  %v3220_v4 = vld [vmem:[%s3794_s1 + $0xd8] sm:$0xff] }
  0x45   : > { %1215 = vrot.lane.b32.xlu0 %v2984_v9, %s2794_s23  ;;  %901 = vrot.lane.b32.xlu1 %v2984_v9, %s2795_s26 }
  0x46   : > { %1217 = vrot.lane.b32.xlu2 %v3014_v19, %s2794_s23 }
  0x4c   : > { %2399 = vmatmul.msk.f32.gmra.mxu0 %vm605_vm5, %v2946_v5 }
  0x4d   : > { %903 = vrot.lane.b32.xlu0 %v3014_v19, %s2795_s26  ;;  %1219 = vrot.lane.b32.xlu1 %v3019_v20, %s2794_s23 }
  0x4e   : > { %905 = vrot.lane.b32.xlu2 %v3019_v20, %s2795_s26 }
  0x54   : > { %2400 = vmatmul.msk.f32.gmra.mxu0 %vm605_vm5, %v2957_v6 }
  0x55   : > { %1221 = vrot.lane.b32.xlu0 %v3030_v21, %s2794_s23  ;;  %907 = vrot.lane.b32.xlu1 %v3030_v21, %s2795_s26 }
  0x56   : > { %1223 = vrot.lane.b32.xlu2 %v3042_v23, %s2794_s23 }
  0x5c   : > { %2401 = vmatmul.msk.f32.gmra.mxu0 %vm605_vm5, %v2966_v7 }
  0x5d   : > { %909 = vrot.lane.b32.xlu0 %v3042_v23, %s2795_s26  ;;  %1225 = vrot.lane.b32.xlu1 %v3047_v24, %s2794_s23 }
  0x5e   : > { %911 = vrot.lane.b32.xlu2 %v3047_v24, %s2795_s26 }
  0x64   : > { %2402 = vmatmul.msk.f32.gmra.mxu0 %vm605_vm5, %v2973_v8 }
  0x65   : > { %1227 = vrot.lane.b32.xlu0 %v3062_v29, %s2794_s23  ;;  %913 = vrot.lane.b32.xlu1 %v3062_v29, %s2795_s26 }
  0x66   : > { %1229 = vrot.lane.b32.xlu2 %v3082_v36, %s2794_s23 }
  0x6c   : > { %2403 = vmatmul.msk.f32.gmra.mxu0 %vm605_vm5, %v2984_v9 }
  0x6d   : > { %915 = vrot.lane.b32.xlu0 %v3082_v36, %s2795_s26  ;;  %1231 = vrot.lane.b32.xlu1 %v3087_v37, %s2794_s23 }
  0x6e   : > { %917 = vrot.lane.b32.xlu2 %v3087_v37, %s2795_s26 }
  0x70   : > { %v1202_v30 = vpop.permute.xlu2 %1201 }
  0x74   : > { %2404 = vmatmul.msk.f32.gmra.mxu0 %vm605_vm5, %v3014_v19 }
  0x75   : > { %1233 = vrot.lane.b32.xlu0 %v3102_v40, %s2794_s23  ;;  %919 = vrot.lane.b32.xlu1 %v3102_v40, %s2795_s26 }
  0x76   : > { %1235 = vrot.lane.b32.xlu2 %v3115_v43, %s2794_s23 }
  0x78   : > { %v888_v34 = vpop.permute.xlu2 %887 }
  0x7c   : > { %2405 = vmatmul.msk.f32.gmra.mxu0 %vm605_vm5, %v3019_v20 }
  0x7d   : > { %921 = vrot.lane.b32.xlu0 %v3115_v43, %s2795_s26  ;;  %1237 = vrot.lane.b32.xlu1 %v3120_v44, %s2794_s23 }
  0x7e   : > { %923 = vrot.lane.b32.xlu2 %v3120_v44, %s2795_s26 }
  0x80   : > { %v1206_v39 = vpop.permute.xlu2 %1205 }
  0x84   : > { %2406 = vmatmul.msk.f32.gmra.mxu0 %vm605_vm5, %v3030_v21 }
  0x85   : > { %1239 = vrot.lane.b32.xlu0 %v3135_v47, %s2794_s23  ;;  %945 = vrot.lane.b32.xlu1 %v3190_v61, %s2795_s26 }
  0x86   : > { %925 = vrot.lane.b32.xlu2 %v3135_v47, %s2795_s26 }
  0x87   : > { %v1198_v22 = vpop.permute.xlu0 %1197  ;;  %v1200_v25 = vpop.permute.xlu1 %1199 }
  0x88   : > { %2460 = vmatmul.msk.f32.vlgmr.msra.gmra.mxu2 %vm1266_vm3, %v1198_v22  ;;  %v894_v45 = vpop.permute.xlu2 %893 }
  0x8c   : > { %2407 = vmatmul.msk.f32.gmra.mxu0 %vm605_vm5, %v3042_v23 }
  0x8d   : > { %1241 = vrot.lane.b32.xlu0 %v3148_v50, %s2794_s23  ;;  %1259 = vrot.lane.b32.xlu1 %v3190_v61, %s2794_s23 }
  0x8e   : > { %927 = vrot.lane.b32.xlu2 %v3148_v50, %s2795_s26 }
  0x8f   : > { %v884_v26 = vpop.permute.xlu0 %883  ;;  %v886_v33 = vpop.permute.xlu1 %885 }
  0x90   : > { %2427 = vmatmul.msk.f32.vlgmr.msra.gmra.mxu1 %vm952_vm4, %v884_v26  ;;  %2461 = vmatmul.msk.f32.gmra.mxu2 %vm1266_vm3, %v1200_v25  ;;  %v1212_v49 = vpop.permute.xlu2 %1211 }
  0x94   : > { %2408 = vmatmul.msk.f32.gmra.mxu0 %vm605_vm5, %v3047_v24 }
  0x95   : > { %1243 = vrot.lane.b32.xlu0 %v3161_v53, %s2794_s23 }
  0x97   : > { %v1204_v35 = vpop.permute.xlu0 %1203  ;;  %v890_v38 = vpop.permute.xlu1 %889 }
  0x98   : > { %2428 = vmatmul.msk.f32.gmra.mxu1 %vm952_vm4, %v886_v33  ;;  %2462 = vmatmul.msk.f32.gmra.mxu2 %vm1266_vm3, %v1202_v30  ;;  %v900_v54 = vpop.permute.xlu2 %899 }
  0x9c   : > { %2409 = vmatmul.msk.f32.gmra.mxu0 %vm605_vm5, %v3062_v29 }
  0x9d   : > { %929 = vrot.lane.b32.xlu0 %v3161_v53, %s2795_s26 }
  0x9f   : > { %v1208_v41 = vpop.permute.xlu1 %1207  ;;  %v892_v42 = vpop.permute.xlu0 %891 }
  0xa0   : > { %2429 = vmatmul.msk.f32.gmra.mxu1 %vm952_vm4, %v888_v34  ;;  %2463 = vmatmul.msk.f32.gmra.mxu2 %vm1266_vm3, %v1204_v35  ;;  %v1218_v57 = vpop.permute.xlu2 %1217 }
  0xa1   : > { %v723_v23 = vpop.f32.mrf.mxu0 }
  0xa2   : > { %v819_v33 = vmax.f32 %v723_v23, 0.0 }
  0xa4   : > { %2410 = vmatmul.msk.f32.gmra.mxu0 %vm605_vm5, %v3082_v36 }
  0xa5   : > { %1247 = vrot.lane.b32.xlu0 %v3201_v63, %s2794_s23 }
  0xa7   : > { %v1210_v46 = vpop.permute.xlu0 %1209  ;;  %v896_v48 = vpop.permute.xlu1 %895 }
  0xa8   : > { %2430 = vmatmul.msk.f32.gmra.mxu1 %vm952_vm4, %v890_v38  ;;  %2464 = vmatmul.msk.f32.gmra.mxu2 %vm1266_vm3, %v1206_v39  ;;  %v906_v60 = vpop.permute.xlu2 %905  ;;  %v851_v39 = vpack.c.bf16 %v819_v33, %v819_v33 }
  0xa9   : > { %v726_v36 = vpop.f32.mrf.mxu0 }
  0xac   : > { %2411 = vmatmul.msk.f32.gmra.mxu0 %vm605_vm5, %v3087_v37 }
  0xad   : > { %933 = vrot.lane.b32.xlu0 %v3201_v63, %s2795_s26 }
  0xaf   : > { %v898_v51 = vpop.permute.xlu0 %897  ;;  %v1214_v52 = vpop.permute.xlu1 %1213 }
  0xb0   : > { %2431 = vmatmul.msk.f32.gmra.mxu1 %vm952_vm4, %v892_v42  ;;  %2465 = vmatmul.msk.f32.gmra.mxu2 %vm1266_vm3, %v1208_v41  ;;  %v1224_v1 = vpop.permute.xlu2 %1223  ;;  %v3253_v42 = vld [vmem:[%s3794_s1 + $0xc0] sm:$0xff] }
  0xb4   : > { %2412 = vmatmul.msk.f32.gmra.mxu0 %vm605_vm5, %v3102_v40  ;;  %v3289_v40 = vld [vmem:[%s3794_s1 + $0xd0] sm:$0xff] }
  0xb5   : > { %1251 = vrot.lane.b32.xlu0 %v3220_v4, %s2794_s23 }
  0xb7   : > { %v1216_v55 = vpop.permute.xlu0 %1215  ;;  %v902_v56 = vpop.permute.xlu1 %901 }
  0xb8   : > { %2432 = vmatmul.msk.f32.gmra.mxu1 %vm952_vm4, %v894_v45  ;;  %2466 = vmatmul.msk.f32.gmra.mxu2 %vm1266_vm3, %v1210_v46  ;;  %v912_v5 = vpop.permute.xlu2 %911  ;;  %v820_v46 = vmax.f32 %v726_v36, 0.0 }
  0xbc   : > { %2413 = vmatmul.msk.f32.gmra.mxu0 %vm605_vm5, %v3115_v43  ;;  %v3302_v43 = vld [vmem:[%s3794_s1 + $0xf0] sm:$0xff] }
  0xbd   : > { %937 = vrot.lane.b32.xlu0 %v3220_v4, %s2795_s26 }
  0xbf   : > { %v904_v58 = vpop.permute.xlu0 %903  ;;  %v1220_v59 = vpop.permute.xlu1 %1219 }
  0xc0   : > { %2433 = vmatmul.msk.f32.gmra.mxu1 %vm952_vm4, %v896_v48  ;;  %2467 = vmatmul.msk.f32.gmra.mxu2 %vm1266_vm3, %v1212_v49  ;;  %v1230_v11 = vpop.permute.xlu2 %1229 }
  0xc4   : > { %2414 = vmatmul.msk.f32.gmra.mxu0 %vm605_vm5, %v3120_v44 }
  0xc5   : > { %1255 = vrot.lane.b32.xlu0 %v3237_v15, %s2794_s23 }
  0xc7   : > { %v1222_v62 = vpop.permute.xlu0 %1221  ;;  %v908_v0 = vpop.permute.xlu1 %907 }
  0xc8   : > { %2434 = vmatmul.msk.f32.gmra.mxu1 %vm952_vm4, %v898_v51  ;;  %2468 = vmatmul.msk.f32.gmra.mxu2 %vm1266_vm3, %v1214_v52  ;;  %v918_v34 = vpop.permute.xlu2 %917 }
  0xcc   : > { %2415 = vmatmul.msk.f32.gmra.mxu0 %vm605_vm5, %v3135_v47 }
  0xcd   : > { %941 = vrot.lane.b32.xlu0 %v3237_v15, %s2795_s26 }
  0xcf   : > { %v910_v2 = vpop.permute.xlu0 %909  ;;  %v1226_v3 = vpop.permute.xlu1 %1225 }
  0xd0   : > { %2435 = vmatmul.msk.f32.gmra.mxu1 %vm952_vm4, %v900_v54  ;;  %2469 = vmatmul.msk.f32.gmra.mxu2 %vm1266_vm3, %v1216_v55  ;;  %v1542_v54 = vunpack.c.l.b16 %v851_v39  ;;  %v852_v55 = vpack.c.bf16 %v820_v46, %v820_v46 }
  0xd2   : > { %v1543_v37 = vunpack.c.l.b16 %v852_v55 }
  0xd4   : > { %2416 = vmatmul.msk.f32.gmra.mxu0 %vm605_vm5, %v3148_v50 }
  0xd7   : > { %v1228_v6 = vpop.permute.xlu0 %1227  ;;  %v914_v9 = vpop.permute.xlu1 %913 }
  0xd8   : > { %2436 = vmatmul.msk.f32.gmra.mxu1 %vm952_vm4, %v902_v56  ;;  %2470 = vmatmul.msk.f32.gmra.mxu2 %vm1266_vm3, %v1218_v57 }
  0xdc   : > { %2417 = vmatmul.msk.f32.gmra.mxu0 %vm605_vm5, %v3161_v53 }
  0xdf   : > { %v916_v19 = vpop.permute.xlu0 %915  ;;  %v1232_v27 = vpop.permute.xlu1 %1231 }
  0xe0   : > { %2437 = vmatmul.msk.f32.gmra.mxu1 %vm952_vm4, %v904_v58  ;;  %2471 = vmatmul.msk.f32.gmra.mxu2 %vm1266_vm3, %v1220_v59 }
  0xe4   : > { %2418 = vmatmul.msk.f32.gmra.mxu0 %vm605_vm5, %v3253_v42 }
  0xe7   : > { %v1234_v41 = vpop.permute.xlu0 %1233  ;;  %v920_v49 = vpop.permute.xlu1 %919 }
  0xe8   : > { %2438 = vmatmul.msk.f32.gmra.mxu1 %vm952_vm4, %v906_v60  ;;  %2472 = vmatmul.msk.f32.gmra.mxu2 %vm1266_vm3, %v1222_v62  ;;  %v3266_v60 = vld [vmem:[%s3794_s1 + $0xe0] sm:$0xff]  ;;  %v3268_v62 = vpop.f32.mrf.mxu0 }
  0xe9   : > { %2422 = vmatmul.msk.f32.vlgmr.msra.gmra.mxu3 %vm605_vm5, %v3266_v60 }
  0xea   : > { %2642 = vmatpush.msk.msra.mxu3 %vm702_vm1, %v3002_v14 }
  0xec   : > { %2419 = vmatmul.msk.f32.gmra.mxu0 %vm605_vm5, %v3201_v63  ;;  %v2553_v63 = vld [vmem:[%s3799_s6 + $0x8] sm:$0xff] }
  0xf0   : > { %2439 = vmatmul.msk.f32.gmra.mxu1 %vm952_vm4, %v908_v0  ;;  %2473 = vmatmul.msk.f32.gmra.mxu2 %vm1266_vm3, %v1224_v1  ;;  %v3282_v14 = vpop.f32.mrf.mxu0 }
  0xf1   : > { %2423 = vmatmul.msk.f32.gmra.mxu3 %vm605_vm5, %v3237_v15 }
  0xf4   : > { %2420 = vmatmul.msk.f32.gmra.mxu0 %vm605_vm5, %v3289_v40 }
  0xf8   : > { %2440 = vmatmul.msk.f32.gmra.mxu1 %vm952_vm4, %v910_v2  ;;  %2474 = vmatmul.msk.f32.gmra.mxu2 %vm1266_vm3, %v1226_v3  ;;  %v3272_v3 = vpack.c.b16 %v1543_v37, %v1542_v54 }
  0xf9   : > { %2424 = vmatmul.msk.f32.gmra.mxu3 %vm605_vm5, %v3302_v43 }
  0xfc   : > { %2421 = vmatmul.msk.f32.gmra.mxu0 %vm605_vm5, %v3220_v4 }
 0x100   : > { %2441 = vmatmul.msk.f32.gmra.mxu1 %vm952_vm4, %v912_v5  ;;  %2475 = vmatmul.msk.f32.gmra.mxu2 %vm1266_vm3, %v1228_v6  ;;  %v1236_v5 = vpop.permute.xlu2 %1235 }
 0x101   : > { %2425 = vmatmul.msk.f32.gmra.mxu3 %vm605_vm5, %v3190_v61 }
 0x108   : > { %2442 = vmatmul.msk.f32.gmra.mxu1 %vm952_vm4, %v914_v9  ;;  %2476 = vmatmul.msk.f32.gmra.mxu2 %vm1266_vm3, %v1230_v11  ;;  %v922_v11 = vpop.permute.xlu0 %921 }
 0x10b   : > { %v1350_v7 = vpop.f32.mrf.mxu2 }
 0x10c   : > { %v1446_v10 = vmax.f32 %v1350_v7, 0.0 }
 0x10d   : > { %v1037_v8 = vpop.f32.mrf.mxu1 }
 0x10e   : > { %v1133_v12 = vmax.f32 %v1037_v8, 0.0  ;;  %v1478_v16 = vpack.c.bf16 %v1446_v10, %v1446_v10 }
 0x110   : > { %v1165_v20 = vpack.c.bf16 %v1133_v12, %v1133_v12  ;;  %2443 = vmatmul.msk.f32.gmra.mxu1 %vm952_vm4, %v916_v19  ;;  %v1734_v24 = vunpack.c.l.b16 %v1478_v16  ;;  %2477 = vmatmul.msk.f32.gmra.mxu2 %vm1266_vm3, %v1232_v27  ;;  %v1238_v16 = vpop.permute.xlu1 %1237  ;;  %v1240_v27 = vpop.permute.xlu0 %1239 }
 0x112   : > { %v1622_v28 = vunpack.c.l.b16 %v1165_v20 }
 0x113   : > { %v1353_v13 = vpop.f32.mrf.mxu2 }
 0x114   : > { %v1447_v17 = vmax.f32 %v1353_v13, 0.0 }
 0x115   : > { %v1040_v18 = vpop.f32.mrf.mxu1 }
 0x116   : > { %v1479_v21 = vpack.c.bf16 %v1447_v17, %v1447_v17  ;;  %v1134_v22 = vmax.f32 %v1040_v18, 0.0  ;;  %v924_v17 = vpop.permute.xlu2 %923 }
 0x118   : > { %v1735_v25 = vunpack.c.l.b16 %v1479_v21  ;;  %v1166_v26 = vpack.c.bf16 %v1134_v22, %v1134_v22  ;;  %2444 = vmatmul.msk.f32.gmra.mxu1 %vm952_vm4, %v918_v34  ;;  %2478 = vmatmul.msk.f32.gmra.mxu2 %vm1266_vm3, %v1234_v41  ;;  %v1242_v46 = vpop.permute.xlu0 %1241 }
 0x11a   : > { %v1623_v29 = vunpack.c.l.b16 %v1166_v26  ;;  %v1766_v30 = vpack.c.b16 %v1735_v25, %v1734_v24  ;;  %v735_v26 = vpop.f32.mrf.mxu0 }
 0x11b   : > { %v1356_v31 = vpop.f32.mrf.mxu2 }
 0x11c   : > { %1782 = vrot.lane.b32.xlu2 %v1766_v30, %s2796_s11  ;;  %v1654_v32 = vpack.c.b16 %v1623_v29, %v1622_v28  ;;  %v1448_v38 = vmax.f32 %v1356_v31, 0.0  ;;  %v823_v30 = vmax.f32 %v735_v26, 0.0 }
 0x11d   : > { %v1043_v35 = vpop.f32.mrf.mxu1 }
 0x11e   : > { %1670 = vrot.lane.b32.xlu1 %v1654_v32, %s2797_s12  ;;  %v1135_v45 = vmax.f32 %v1043_v35, 0.0  ;;  %v1480_v51 = vpack.c.bf16 %v1448_v38, %v1448_v38  ;;  %v926_v35 = vpop.permute.xlu2 %925  ;;  %v855_v39 = vpack.c.bf16 %v823_v30, %v823_v30 }
 0x120   : > { %v1167_v57 = vpack.c.bf16 %v1135_v45, %v1135_v45  ;;  %2445 = vmatmul.msk.f32.gmra.mxu1 %vm952_vm4, %v920_v49  ;;  %v1736_v0 = vunpack.c.l.b16 %v1480_v51  ;;  %2479 = vmatmul.msk.f32.gmra.mxu2 %vm1266_vm3, %v1236_v5 }
 0x122   : > { %v1624_v6 = vunpack.c.l.b16 %v1167_v57  ;;  %v738_v45 = vpop.f32.mrf.mxu0 }
 0x123   : > { %v1359_v48 = vpop.f32.mrf.mxu2  ;;  %v824_v44 = vmax.f32 %v738_v45, 0.0 }
 0x124   : > { %v1449_v52 = vmax.f32 %v1359_v48, 0.0  ;;  %931 = vrot.lane.b32.xlu2 %v3253_v42, %s2795_s26  ;;  %v1546_v48 = vunpack.c.l.b16 %v855_v39 }
 0x125   : > { %v1046_v56 = vpop.f32.mrf.mxu1  ;;  %v856_v49 = vpack.c.bf16 %v824_v44, %v824_v44  ;;  %v946_v44 = vpop.permute.xlu1 %945 }
 0x126   : > { %v1481_v58 = vpack.c.bf16 %v1449_v52, %v1449_v52  ;;  %v1136_v59 = vmax.f32 %v1046_v56, 0.0  ;;  %1245 = vrot.lane.b32.xlu1 %v3253_v42, %s2794_s23  ;;  %2458 = vmatmul.msk.f32.vlgmr.msrb.gmra.mxu3 %vm952_vm4, %v946_v44 }
 0x127   : > { %v1547_v55 = vunpack.c.l.b16 %v856_v49 }
 0x128   : > { %v1737_v1 = vunpack.c.l.b16 %v1481_v58  ;;  %v1168_v2 = vpack.c.bf16 %v1136_v59, %v1136_v59  ;;  %2446 = vmatmul.msk.f32.gmra.mxu1 %vm952_vm4, %v922_v11  ;;  %2480 = vmatmul.msk.f32.gmra.mxu2 %vm1266_vm3, %v1238_v16  ;;  %v928_v59 = vpop.permute.xlu2 %927 }
 0x129   : > { %v3319_v58 = vpack.c.b16 %v1547_v55, %v1546_v48 }
 0x12a   : > { %v1625_v7 = vunpack.c.l.b16 %v1168_v2  ;;  %v1767_v8 = vpack.c.b16 %v1737_v1, %v1736_v0  ;;  %v741_v1 = vpop.f32.mrf.mxu0  ;;  %v1244_v2 = vpop.permute.xlu0 %1243 }
 0x12b   : > { %v1362_v9 = vpop.f32.mrf.mxu2 }
 0x12c   : > { %1784 = vrot.lane.b32.xlu2 %v1767_v8, %s2796_s11  ;;  %v1655_v10 = vpack.c.b16 %v1625_v7, %v1624_v6  ;;  %v1450_v13 = vmax.f32 %v1362_v9, 0.0  ;;  %v825_v7 = vmax.f32 %v741_v1, 0.0 }
 0x12d   : > { %v1049_v12 = vpop.f32.mrf.mxu1 }
 0x12e   : > { %1672 = vrot.lane.b32.xlu1 %v1655_v10, %s2797_s12  ;;  %v1482_v18 = vpack.c.bf16 %v1450_v13, %v1450_v13  ;;  %v1137_v19 = vmax.f32 %v1049_v12, 0.0 }
 0x130   : > { %v1738_v15 = vunpack.c.l.b16 %v1482_v18  ;;  %v1169_v23 = vpack.c.bf16 %v1137_v19, %v1137_v19  ;;  %2447 = vmatmul.msk.f32.gmra.mxu1 %vm952_vm4, %v924_v17  ;;  %2481 = vmatmul.msk.f32.gmra.mxu2 %vm1266_vm3, %v1240_v27 }
 0x132   : > { %v1626_v31 = vunpack.c.l.b16 %v1169_v23  ;;  %v744_v16 = vpop.f32.mrf.mxu0 }
 0x133   : > { %v1365_v20 = vpop.f32.mrf.mxu2  ;;  %v826_v17 = vmax.f32 %v744_v16, 0.0 }
 0x134   : > { %v1451_v21 = vmax.f32 %v1365_v20, 0.0  ;;  %935 = vrot.lane.b32.xlu2 %v3289_v40, %s2795_s26 }
 0x135   : > { %v1052_v22 = vpop.f32.mrf.mxu1  ;;  %v858_v19 = vpack.c.bf16 %v826_v17, %v826_v17 }
 0x136   : > { %v1483_v24 = vpack.c.bf16 %v1451_v21, %v1451_v21  ;;  %v1138_v25 = vmax.f32 %v1052_v22, 0.0  ;;  %1249 = vrot.lane.b32.xlu1 %v3289_v40, %s2794_s23 }
 0x137   : > { %v1549_v21 = vunpack.c.l.b16 %v858_v19 }
 0x138   : > { %v1739_v28 = vunpack.c.l.b16 %v1483_v24  ;;  %v1170_v29 = vpack.c.bf16 %v1138_v25, %v1138_v25  ;;  %2448 = vmatmul.msk.f32.gmra.mxu1 %vm952_vm4, %v926_v35  ;;  %2482 = vmatmul.msk.f32.gmra.mxu2 %vm1266_vm3, %v1242_v46 }
 0x13a   : > { %v1627_v32 = vunpack.c.l.b16 %v1170_v29  ;;  %v1768_v33 = vpack.c.b16 %v1739_v28, %v1738_v15  ;;  %v747_v24 = vpop.f32.mrf.mxu0  ;;  %v930_v28 = vpop.permute.xlu0 %929 }
 0x13b   : > { %v1368_v34 = vpop.f32.mrf.mxu2  ;;  %v827_v53 = vmax.f32 %v747_v24, 0.0  ;;  %v3382_v24 = vld [vmem:[%s3797_s4] ss:$0 sm:$0xff] }
 0x13c   : > { %1786 = vrot.lane.b32.xlu2 %v1768_v33, %s2796_s11  ;;  %v1656_v36 = vpack.c.b16 %v1627_v32, %v1626_v31  ;;  %v1452_v41 = vmax.f32 %v1368_v34, 0.0 }
 0x13d   : > { %v1055_v38 = vpop.f32.mrf.mxu1 }
 0x13e   : > { %1674 = vrot.lane.b32.xlu1 %v1656_v36, %s2797_s12  ;;  %v1139_v51 = vmax.f32 %v1055_v38, 0.0  ;;  %v1484_v52 = vpack.c.bf16 %v1452_v41, %v1452_v41  ;;  %v859_v36 = vpack.c.bf16 %v827_v53, %v827_v53  ;;  %v2550_v53 = vld [vmem:[%s3798_s5] sm:$0xff] }
 0x140   : > { %v1171_v61 = vpack.c.bf16 %v1139_v51, %v1139_v51  ;;  %v1740_v37 = vunpack.c.l.b16 %v1484_v52  ;;  %2449 = vmatmul.msk.f32.gmra.mxu1 %vm952_vm4, %v928_v59  ;;  %2483 = vmatmul.msk.f32.gmra.mxu2 %vm1266_vm3, %v1244_v2  ;;  %v1550_v42 = vunpack.c.l.b16 %v859_v36 }
 0x142   : > { %v1628_v8 = vunpack.c.l.b16 %v1171_v61  ;;  %v750_v41 = vpop.f32.mrf.mxu0  ;;  %v1260_v61 = vpop.permute.xlu1 %1259 }
 0x143   : > { %v1371_v54 = vpop.f32.mrf.mxu2  ;;  %v828_v45 = vmax.f32 %v750_v41, 0.0  ;;  %2491 = vmatmul.msk.f32.vlgmr.msra.gmra.mxu3 %vm1266_vm3, %v1260_v61 }
 0x144   : > { %v1453_v56 = vmax.f32 %v1371_v54, 0.0  ;;  %939 = vrot.lane.b32.xlu2 %v3266_v60, %s2795_s26 }
 0x145   : > { %v1058_v57 = vpop.f32.mrf.mxu1  ;;  %v860_v48 = vpack.c.bf16 %v828_v45, %v828_v45 }
 0x146   : > { %v1140_v0 = vmax.f32 %v1058_v57, 0.0  ;;  %1253 = vrot.lane.b32.xlu1 %v3266_v60, %s2794_s23  ;;  %v1485_v47 = vpack.c.bf16 %v1453_v56, %v1453_v56  ;;  %v857_v60 = vpack.c.bf16 %v825_v7, %v825_v7  ;;  %v2554_v57 = vld [vmem:[%s3799_s6 + $0x10] sm:$0xff] }
 0x147   : > { %1958 = vmatpush.bf16.msrb.mxu3 %v2554_v57 }
 0x148   : > { %v1172_v5 = vpack.c.bf16 %v1140_v0, %v1140_v0  ;;  %v1741_v6 = vunpack.c.l.b16 %v1485_v47  ;;  %v1548_v18 = vunpack.c.l.b16 %v857_v60  ;;  %2450 = vmatmul.msk.f32.gmra.mxu1 %vm952_vm4, %v930_v28  ;;  %v2552_v60 = vld [vmem:[%s3799_s6] sm:$0xff] }
 0x14a   : > { %v1629_v9 = vunpack.c.l.b16 %v1172_v5  ;;  %v1769_v10 = vpack.c.b16 %v1741_v6, %v1740_v37  ;;  %v3331_v22 = vpack.c.b16 %v1549_v21, %v1548_v18  ;;  %v753_v56 = vpop.f32.mrf.mxu0  ;;  %v3369_v18 = vld [vmem:[%s3796_s3] ss:$0 sm:$0xff] }
 0x14b   : > { %v1374_v13 = vpop.f32.mrf.mxu2  ;;  %v829_v0 = vmax.f32 %v753_v56, 0.0  ;;  %1959 = vmatpush.bf16.msrb.mxu3 %v2553_v63 }
 0x14c   : > { %v1657_v11 = vpack.c.b16 %v1629_v9, %v1628_v8  ;;  %1788 = vrot.lane.b32.xlu2 %v1769_v10, %s2796_s11  ;;  %v1454_v20 = vmax.f32 %v1374_v13, 0.0 }
 0x14d   : > { %v1061_v12 = vpop.f32.mrf.mxu1  ;;  %v861_v8 = vpack.c.bf16 %v829_v0, %v829_v0 }
 0x14e   : > { %1676 = vrot.lane.b32.xlu1 %v1657_v11, %s2797_s12  ;;  %v1141_v50 = vmax.f32 %v1061_v12, 0.0  ;;  %v1486_v23 = vpack.c.bf16 %v1454_v20, %v1454_v20  ;;  %v2557_v12 = vld [vmem:[%s3360_s19] sm:$0xff]  }
 0x14f   : > { %v2558_v16 = vunpack.c.l.bf16 %v2557_v12  ;;  %v2559_v17 = vunpack.c.h.bf16 %v2557_v12  ;;  %1960 = vmatpush.bf16.msrb.mxu3 %v2552_v60  ;;  %v1552_v20 = vunpack.c.l.b16 %v861_v8 }
 0x150   : > { %v1173_v15 = vpack.c.bf16 %v1141_v50, %v1141_v50  ;;  %v1742_v32 = vunpack.c.l.b16 %v1486_v23  ;;  %v2551_v50 = vld [vmem:[%s3798_s5 + $0x8] sm:$0xff] }
 0x151   : > { %v447_v23 = vmul.f32 %v3369_v18, %v2559_v17  ;;  %2108 = vmatpush.bf16.msrb.mxu0 %v2551_v50  ;;  %2644 = vmatpush.bf16.msrb.mxu2 %v2551_v50 }
 0x152   : > { %v1630_v30 = vunpack.c.l.b16 %v1173_v15  ;;  %v756_v40 = vpop.f32.mrf.mxu0  ;;  %v446_v15 = vmul.f32 %v3369_v18, %v2558_v16  ;;  %2643 = vmatpush.bf16.msrb.mxu1 %v2551_v50 }
 0x153   : > { %v1377_v27 = vpop.f32.mrf.mxu2  ;;  %v830_v13 = vmax.f32 %v756_v40, 0.0  ;;  %v483_v4 = vadd.f32 %v3382_v24, %v447_v23 }
 0x154   : > { %v1455_v29 = vmax.f32 %v1377_v27, 0.0 }
 0x155   : > { %v1064_v25 = vpop.f32.mrf.mxu1  ;;  %v862_v21 = vpack.c.bf16 %v830_v13, %v830_v13  ;;  %2109 = vmatpush.bf16.msrb.mxu0 %v2550_v53  ;;  %2646 = vmatpush.bf16.msrb.mxu2 %v2550_v53 }
 0x156   : > { %1257 = vrot.lane.b32.xlu1 %v3302_v43, %s2794_s23  ;;  %v1142_v26 = vmax.f32 %v1064_v25, 0.0  ;;  %v1487_v33 = vpack.c.bf16 %v1455_v29, %v1455_v29  ;;  %v3384_v25 = vpop.permute.xlu0 %1247  ;;  %v482_v29 = vadd.f32 %v3382_v24, %v446_v15  ;;  %2645 = vmatpush.bf16.msrb.mxu1 %v2550_v53  ;;  %s2389_s23 = sshll.u32 %s352_s14, 8 }
 0x157   : > { %v1553_v27 = vunpack.c.l.b16 %v862_v21  ;;  %s3565_s16 = scalar_lea.vmem [#allocation2], %s2389_s23 }
 0x158   : > { %v1174_v31 = vpack.c.bf16 %v1142_v26, %v1142_v26  ;;  %v1743_v35 = vunpack.c.l.b16 %v1487_v33  ;;  %v515_v33 = vmax.f32 %v483_v4, 0.0 }
 0x15a   : > { %v1631_v34 = vunpack.c.l.b16 %v1174_v31  ;;  %v1770_v39 = vpack.c.b16 %v1743_v35, %v1742_v32  ;;  %v3392_v31 = vpack.c.b16 %v1553_v27, %v1552_v20  ;;  %v514_v32 = vmax.f32 %v482_v29, 0.0  ;;  %v2621_v29 = vld [vmem:[%s3360_s19 + $0x10] sm:$0xff]  }
 0x15b   : > { %v1380_v46 = vpop.f32.mrf.mxu2 }
 0x15c   : > { %v1658_v38 = vpack.c.b16 %v1631_v34, %v1630_v30  ;;  %1790 = vrot.lane.b32.xlu0 %v1770_v39, %s2796_s11  ;;  %v1456_v51 = vmax.f32 %v1380_v46, 0.0  ;;  %v546_v39 = vpack.c.bf16 %v515_v33, %v514_v32  ;;  %v2566_v32 = vunpack.c.l.bf16 %v2621_v29 }
 0x15d   : > { %v1067_v49 = vpop.f32.mrf.mxu1  ;;  %v2567_v33 = vunpack.c.h.bf16 %v2621_v29 }
 0x15e   : > { %943 = vrot.lane.b32.xlu1 %v3302_v43, %s2795_s26  ;;  %1678 = vrot.lane.b32.xlu2 %v1658_v38, %s2797_s12  ;;  %v1551_v43 = vunpack.c.l.b16 %v860_v48  ;;  %v1143_v54 = vmax.f32 %v1067_v49, 0.0  ;;  %v1488_v55 = vpack.c.bf16 %v1456_v51, %v1456_v51  ;;  %v3396_v38 = vpop.f32.mrf.mxu0  ;;  %v934_v44 = vpop.permute.xlu0 %933  ;;  %s2274_s26 = sshll.u32 %s3565_s16, 4  ;;  %s2275_s26 = int_to_ptr.vmem [resolvable:$true] %s2274_s26 }
 0x15f   : > { %2528 = vmatmul.msk.bf16.vlgmr.msrb.gmra.mxu0 %vm1863_vm6, %v546_v39 }
 0x160   : > { %v3345_v52 = vpack.c.b16 %v1551_v43, %v1550_v42  ;;  %v1175_v47 = vpack.c.bf16 %v1143_v54, %v1143_v54  ;;  %v1744_v1 = vunpack.c.l.b16 %v1488_v55  ;;  %v2620_v55 = vld [vmem:[%s3360_s19 + $0x8] sm:$0xff]  }
 0x161   : > { %v2562_v61 = vunpack.c.l.bf16 %v2620_v55 }
 0x162   : > { %v1632_v9 = vunpack.c.l.b16 %v1175_v47 }
 0x163   : > { %v1383_v59 = vpop.f32.mrf.mxu2  ;;  %v448_v47 = vmul.f32 %v3369_v18, %v2562_v61 }
 0x164   : > { %v1457_v37 = vmax.f32 %v1383_v59, 0.0 }
 0x165   : > { %v1070_v5 = vpop.f32.mrf.mxu1 }
 0x166   : > { %v1489_v2 = vpack.c.bf16 %v1457_v37, %v1457_v37  ;;  %v1144_v6 = vmax.f32 %v1070_v5, 0.0  ;;  %v3401_v59 = vpop.f32.mrf.mxu0  ;;  %v2563_v37 = vunpack.c.h.bf16 %v2620_v55  ;;  %v3411_v60 = vpop.permute.xlu0 %1251 }
 0x168   : > { %v1745_v7 = vunpack.c.l.b16 %v1489_v2  ;;  %v1176_v10 = vpack.c.bf16 %v1144_v6, %v1144_v6 }
 0x16a   : > { %v1771_v11 = vpack.c.b16 %v1745_v7, %v1744_v1  ;;  %v1633_v19 = vunpack.c.l.b16 %v1176_v10  ;;  %v449_v1 = vmul.f32 %v3369_v18, %v2563_v37  ;;  %v484_v7 = vadd.f32 %v3382_v24, %v448_v47 }
 0x16b   : > { %v1386_v30 = vpop.f32.mrf.mxu2 }
 0x16c   : > { %1792 = vrot.lane.b32.xlu0 %v1771_v11, %s2796_s11  ;;  %v1659_v26 = vpack.c.b16 %v1633_v19, %v1632_v9  ;;  %v1458_v36 = vmax.f32 %v1386_v30, 0.0  ;;  %v485_v8 = vadd.f32 %v3382_v24, %v449_v1  ;;  %v516_v10 = vmax.f32 %v484_v7, 0.0 }
 0x16d   : > { %v1073_v28 = vpop.f32.mrf.mxu1 }
 0x16e   : > { %1680 = vrot.lane.b32.xlu2 %v1659_v26, %s2797_s12  ;;  %v1145_v35 = vmax.f32 %v1073_v28, 0.0  ;;  %v1490_v45 = vpack.c.bf16 %v1458_v36, %v1458_v36  ;;  %v517_v11 = vmax.f32 %v485_v8, 0.0  ;;  %v3414_v16 = vpop.f32.mrf.mxu0  ;;  %v822_v36 = vmax.f32 %v3282_v14, 0.0 }
 0x170   : > { %v1177_v41 = vpack.c.bf16 %v1145_v35, %v1145_v35  ;;  %v1746_v56 = vunpack.c.l.b16 %v1490_v45  ;;  %v547_v17 = vpack.c.bf16 %v517_v11, %v516_v10  ;;  %v821_v35 = vmax.f32 %v3268_v62, 0.0 }
 0x172   : > { %v1634_v43 = vunpack.c.l.b16 %v1177_v41  ;;  %2529 = vmatmul.msk.bf16.gmra.mxu0 %vm1863_vm6, %v547_v17  ;;  %v938_v41 = vpop.permute.xlu0 %937 }
 0x173   : > { %v1389_v48 = vpop.f32.mrf.mxu2 }
 0x174   : > { %v1459_v49 = vmax.f32 %v1389_v48, 0.0  ;;  %v451_v48 = vmul.f32 %v3369_v18, %v2567_v33 }
 0x175   : > { %v1076_v46 = vpop.f32.mrf.mxu1 }
 0x176   : > { %v3394_v34 = vpop.permute.xlu2 %1782  ;;  %v1146_v42 = vmax.f32 %v1076_v46, 0.0  ;;  %v1491_v57 = vpack.c.bf16 %v1459_v49, %v1459_v49  ;;  %v3419_v53 = vpop.f32.mrf.mxu0 }
 0x178   : > { %v1178_v54 = vpack.c.bf16 %v1146_v42, %v1146_v42  ;;  %v1747_v0 = vunpack.c.l.b16 %v1491_v57  ;;  %v450_v42 = vmul.f32 %v3369_v18, %v2566_v32 }
 0x17a   : > { %v1635_v63 = vunpack.c.l.b16 %v1178_v54  ;;  %v1772_v5 = vpack.c.b16 %v1747_v0, %v1746_v56  ;;  %v487_v54 = vadd.f32 %v3382_v24, %v451_v48  ;;  %v854_v56 = vpack.c.bf16 %v822_v36, %v822_v36 }
 0x17b   : > { %v1392_v9 = vpop.f32.mrf.mxu2 }
 0x17c   : > { %v1660_v2 = vpack.c.b16 %v1635_v63, %v1634_v43  ;;  %1794 = vrot.lane.b32.xlu2 %v1772_v5, %s2796_s11  ;;  %v1460_v13 = vmax.f32 %v1392_v9, 0.0  ;;  %v486_v43 = vadd.f32 %v3382_v24, %v450_v42  ;;  %v519_v61 = vmax.f32 %v487_v54, 0.0 }
 0x17d   : > { %v1079_v6 = vpop.f32.mrf.mxu1  ;;  %v1545_v5 = vunpack.c.l.b16 %v854_v56 }
 0x17e   : > { %v932_v51 = vpop.permute.xlu2 %931  ;;  %1682 = vrot.lane.b32.xlu1 %v1660_v2, %s2797_s12  ;;  %v1147_v12 = vmax.f32 %v1079_v6, 0.0  ;;  %v1492_v50 = vpack.c.bf16 %v1460_v13, %v1460_v13  ;;  %v518_v57 = vmax.f32 %v486_v43, 0.0  ;;  %v771_v0 = vpop.f32.mrf.mxu0 }
 0x17f   : > { %2451 = vmatmul.msk.f32.gmra.mxu1 %vm952_vm4, %v932_v51  ;;  %v3439_v6 = vpop.permute.xlu0 %1255  ;;  %v835_v8 = vmax.f32 %v771_v0, 0.0 }
 0x180   : > { %v1179_v19 = vpack.c.bf16 %v1147_v12, %v1147_v12  ;;  %v1748_v4 = vunpack.c.l.b16 %v1492_v50  ;;  %v548_v47 = vpack.c.bf16 %v519_v61, %v518_v57 }
 0x182   : > { %v1636_v27 = vunpack.c.l.b16 %v1179_v19  ;;  %2530 = vmatmul.msk.bf16.gmra.mxu0 %vm1863_vm6, %v548_v47 }
 0x183   : > { %v1395_v15 = vpop.f32.mrf.mxu2 }
 0x184   : > { %v1461_v23 = vmax.f32 %v1395_v15, 0.0  ;;  %v2622_v15 = vld [vmem:[%s3360_s19 + $0x18] sm:$0xff]  }
 0x185   : > { %v1082_v20 = vpop.f32.mrf.mxu1  ;;  %v2571_v29 = vunpack.c.h.bf16 %v2622_v15 }
 0x186   : > { %v3409_v40 = vpop.permute.xlu2 %1784  ;;  %v1148_v21 = vmax.f32 %v1082_v20, 0.0  ;;  %v1493_v30 = vpack.c.bf16 %v1461_v23, %v1461_v23  ;;  %v867_v20 = vpack.c.bf16 %v835_v8, %v835_v8 }
 0x187   : > { %2452 = vmatmul.msk.f32.gmra.mxu1 %vm952_vm4, %v934_v44 }
 0x188   : > { %v1180_v28 = vpack.c.bf16 %v1148_v21, %v1148_v21  ;;  %v1749_v44 = vunpack.c.l.b16 %v1493_v30 }
 0x18a   : > { %v1637_v45 = vunpack.c.l.b16 %v1180_v28  ;;  %v1773_v62 = vpack.c.b16 %v1749_v44, %v1748_v4  ;;  %v2570_v28 = vunpack.c.l.bf16 %v2622_v15 }
 0x18b   : > { %v1398_v55 = vpop.f32.mrf.mxu2 }
 0x18c   : > { %v1661_v51 = vpack.c.b16 %v1637_v45, %v1636_v27  ;;  %1796 = vrot.lane.b32.xlu1 %v1773_v62, %s2796_s11  ;;  %v1462_v63 = vmax.f32 %v1398_v55, 0.0  ;;  %v774_v27 = vpop.f32.mrf.mxu0  ;;  %v452_v36 = vmul.f32 %v3369_v18, %v2570_v28  ;;  %v1558_v45 = vunpack.c.l.b16 %v867_v20 }
 0x18d   : > { %v1085_v14 = vpop.f32.mrf.mxu1  ;;  %v836_v32 = vmax.f32 %v774_v27, 0.0 }
 0x18e   : > { %v936_v26 = vpop.permute.xlu2 %935  ;;  %1684 = vrot.lane.b32.xlu0 %v1661_v51, %s2797_s12  ;;  %v1494_v9 = vpack.c.bf16 %v1462_v63, %v1462_v63 }
 0x18f   : > { %2453 = vmatmul.msk.f32.gmra.mxu1 %vm952_vm4, %v936_v26  ;;  %v868_v44 = vpack.c.bf16 %v836_v32, %v836_v32 }
 0x190   : > { %v1671_v39 = vpop.permute.xlu1 %1670  ;;  %v1750_v23 = vunpack.c.l.b16 %v1494_v9 }
 0x191   : > { %v1817_v46 = vsel %vm1814_vm7, %v3272_v3, %v1671_v39  ;;  %v853_v3 = vpack.c.bf16 %v821_v35, %v821_v35  ;;  %v453_v39 = vmul.f32 %v3369_v18, %v2571_v29  ;;  %v1559_v62 = vunpack.c.l.b16 %v868_v44 }
 0x192   : > { %v1865_v49 = vsel %vm1863_vm6, %v1817_v46, %v3394_v34  ;;  %v1149_v34 = vmax.f32 %v1085_v14, 0.0 }
 0x193   : > { %2504 = vmatmul.msk.bf16.vlgmr.msrb.gmra.mxu3 %vm1920_vm8, %v1865_v49  ;;  %v1544_v2 = vunpack.c.l.b16 %v853_v3  ;;  %v1401_v12 = vpop.f32.mrf.mxu2  ;;  %v488_v49 = vadd.f32 %v3382_v24, %v452_v36  ;;  %v489_v51 = vadd.f32 %v3382_v24, %v453_v39  ;;  %v3455_v54 = vpack.c.b16 %v1559_v62, %v1558_v45 }
 0x194   : > { %v1181_v7 = vpack.c.bf16 %v1149_v34, %v1149_v34  ;;  %v1463_v17 = vmax.f32 %v1401_v12, 0.0  ;;  %v777_v56 = vpop.f32.mrf.mxu0 }
 0x195   : > { %v1088_v10 = vpop.f32.mrf.mxu1  ;;  %v1575_v13 = vpack.c.b16 %v1545_v5, %v1544_v2  ;;  %v520_v43 = vmax.f32 %v488_v49, 0.0  ;;  %v837_v63 = vmax.f32 %v777_v56, 0.0 }
 0x196   : > { %v3434_v37 = vpop.permute.xlu2 %1786  ;;  %v1150_v11 = vmax.f32 %v1088_v10, 0.0  ;;  %v1638_v50 = vunpack.c.l.b16 %v1181_v7  ;;  %v1495_v26 = vpack.c.bf16 %v1463_v17, %v1463_v17 }
 0x197   : > { %2454 = vmatmul.msk.f32.gmra.mxu1 %vm952_vm4, %v938_v41  ;;  %v869_v8 = vpack.c.bf16 %v837_v63, %v837_v63 }
 0x198   : > { %v1246_v1 = vpop.permute.xlu1 %1245  ;;  %v1182_v21 = vpack.c.bf16 %v1150_v11, %v1150_v11  ;;  %v1751_v35 = vunpack.c.l.b16 %v1495_v26 }
 0x199   : > { %2484 = vmatmul.msk.f32.gmra.mxu2 %vm1266_vm3, %v1246_v1  ;;  %v1560_v15 = vunpack.c.l.b16 %v869_v8 }
 0x19a   : > { %v1639_v30 = vunpack.c.l.b16 %v1182_v21  ;;  %v1774_v42 = vpack.c.b16 %v1751_v35, %v1750_v23 }
 0x19b   : > { %v1404_v14 = vpop.f32.mrf.mxu2 }
 0x19c   : > { %v1662_v46 = vpack.c.b16 %v1639_v30, %v1638_v50  ;;  %1798 = vrot.lane.b32.xlu0 %v1774_v42, %s2796_s11  ;;  %v1464_v3 = vmax.f32 %v1404_v14, 0.0  ;;  %v780_v12 = vpop.f32.mrf.mxu0 }
 0x19d   : > { %v1091_v48 = vpop.f32.mrf.mxu1 }
 0x19e   : > { %v940_v19 = vpop.permute.xlu2 %939  ;;  %1686 = vrot.lane.b32.xlu2 %v1662_v46, %s2797_s12  ;;  %v1151_v55 = vmax.f32 %v1091_v48, 0.0  ;;  %v1496_v0 = vpack.c.bf16 %v1464_v3, %v1464_v3 }
 0x19f   : > { %2455 = vmatmul.msk.f32.gmra.mxu1 %vm952_vm4, %v940_v19  ;;  %v838_v19 = vmax.f32 %v780_v12, 0.0 }
 0x1a0   : > { %v1673_v4 = vpop.permute.xlu1 %1672  ;;  %v1183_v34 = vpack.c.bf16 %v1151_v55, %v1151_v55  ;;  %v1752_v10 = vunpack.c.l.b16 %v1496_v0 }
 0x1a1   : > { %v1820_v33 = vsel %vm1814_vm7, %v1575_v13, %v1673_v4  ;;  %2485 = vmatmul.msk.f32.gmra.mxu2 %vm1266_vm3, %v3384_v25  ;;  %v942_v25 = vpop.permute.xlu0 %941  ;;  %v870_v26 = vpack.c.bf16 %v838_v19, %v838_v19 }
 0x1a2   : > { %v1867_v41 = vsel %vm1863_vm6, %v1820_v33, %v3409_v40  ;;  %v521_v40 = vmax.f32 %v489_v51, 0.0  ;;  %v1640_v7 = vunpack.c.l.b16 %v1183_v34 }
 0x1a3   : > { %2505 = vmatmul.msk.bf16.gmra.mxu3 %vm1920_vm8, %v1867_v41  ;;  %v1407_v2 = vpop.f32.mrf.mxu2  ;;  %v1561_v29 = vunpack.c.l.b16 %v870_v26 }
 0x1a4   : > { %v549_v57 = vpack.c.bf16 %v521_v40, %v520_v43  ;;  %v1465_v5 = vmax.f32 %v1407_v2, 0.0  ;;  %v783_v32 = vpop.f32.mrf.mxu0 }
 0x1a5   : > { %v1094_v47 = vpop.f32.mrf.mxu1  ;;  %v839_v35 = vmax.f32 %v783_v32, 0.0 }
 0x1a6   : > { %2531 = vmatmul.msk.bf16.gmra.mxu0 %vm1863_vm6, %v549_v57  ;;  %v1152_v1 = vmax.f32 %v1094_v47, 0.0  ;;  %v1497_v11 = vpack.c.bf16 %v1465_v5, %v1465_v5  ;;  %v1789_v40 = vpop.permute.xlu2 %1788 }
 0x1a7   : > { %2456 = vmatmul.msk.f32.gmra.mxu1 %vm952_vm4, %v942_v25  ;;  %v871_v42 = vpack.c.bf16 %v839_v35, %v839_v35 }
 0x1a8   : > { %v1250_v61 = vpop.permute.xlu1 %1249  ;;  %v1184_v9 = vpack.c.bf16 %v1152_v1, %v1152_v1  ;;  %v1753_v20 = vunpack.c.l.b16 %v1497_v11 }
 0x1a9   : > { %2486 = vmatmul.msk.f32.gmra.mxu2 %vm1266_vm3, %v1250_v61  ;;  %v1562_v57 = vunpack.c.l.b16 %v871_v42 }
 0x1aa   : > { %v1641_v17 = vunpack.c.l.b16 %v1184_v9  ;;  %v1775_v27 = vpack.c.b16 %v1753_v20, %v1752_v10 }
 0x1ab   : > { %v1410_v4 = vpop.f32.mrf.mxu2 }
 0x1ac   : > { %v1663_v23 = vpack.c.b16 %v1641_v17, %v1640_v7  ;;  %1800 = vrot.lane.b32.xlu2 %v1775_v27, %s2796_s11  ;;  %v1466_v30 = vmax.f32 %v1410_v4, 0.0  ;;  %v786_v25 = vpop.f32.mrf.mxu0 }
 0x1ad   : > { %v1097_v28 = vpop.f32.mrf.mxu1  ;;  %v840_v43 = vmax.f32 %v786_v25, 0.0 }
 0x1ae   : > { %1688 = vrot.lane.b32.xlu1 %v1663_v23, %s2797_s12  ;;  %v1498_v36 = vpack.c.bf16 %v1466_v30, %v1466_v30 }
 0x1af   : > { %v872_v34 = vpack.c.bf16 %v840_v43, %v840_v43  ;;  %v3497_v43 = vpop.f32.mrf.mxu3 }
 0x1b0   : > { %v1675_v13 = vpop.permute.xlu1 %1674  ;;  %v1754_v49 = vunpack.c.l.b16 %v1498_v36 }
 0x1b1   : > { %v1823_v50 = vsel %vm1814_vm7, %v3319_v58, %v1675_v13  ;;  %2487 = vmatmul.msk.f32.gmra.mxu2 %vm1266_vm3, %v3411_v60  ;;  %v3469_v58 = vpack.c.b16 %v1561_v29, %v1560_v15  ;;  %v1153_v60 = vmax.f32 %v1097_v28, 0.0  ;;  %v1563_v0 = vunpack.c.l.b16 %v872_v34 }
 0x1b2   : > { %v1869_v21 = vsel %vm1863_vm6, %v1823_v50, %v3434_v37 }
 0x1b3   : > { %2506 = vmatmul.msk.bf16.gmra.mxu3 %vm1920_vm8, %v1869_v21  ;;  %v1185_v37 = vpack.c.bf16 %v1153_v60, %v1153_v60  ;;  %v1413_v45 = vpop.f32.mrf.mxu2  ;;  %v3480_v1 = vpack.c.b16 %v1563_v0, %v1562_v57 }
 0x1b4   : > { %v1467_v46 = vmax.f32 %v1413_v45, 0.0 }
 0x1b5   : > { %v1100_v39 = vpop.f32.mrf.mxu1  ;;  %v1642_v44 = vunpack.c.l.b16 %v1185_v37 }
 0x1b6   : > { %v1154_v41 = vmax.f32 %v1100_v39, 0.0  ;;  %v1499_v51 = vpack.c.bf16 %v1467_v46, %v1467_v46 }
 0x1b8   : > { %v1254_v33 = vpop.permute.xlu1 %1253  ;;  %v1186_v48 = vpack.c.bf16 %v1154_v41, %v1154_v41  ;;  %v1755_v3 = vunpack.c.l.b16 %v1499_v51  ;;  %v1679_v21 = vpop.permute.xlu2 %1678 }
 0x1b9   : > { %2488 = vmatmul.msk.f32.gmra.mxu2 %vm1266_vm3, %v1254_v33  ;;  %v1829_v33 = vsel %vm1814_vm7, %v3345_v52, %v1679_v21 }
 0x1ba   : > { %v1643_v14 = vunpack.c.l.b16 %v1186_v48  ;;  %v1776_v63 = vpack.c.b16 %v1755_v3, %v1754_v49 }
 0x1bb   : > { %v1416_v47 = vpop.f32.mrf.mxu2 }
 0x1bc   : > { %v1664_v61 = vpack.c.b16 %v1643_v14, %v1642_v44  ;;  %1802 = vrot.lane.b32.xlu1 %v1776_v63, %s2796_s11  ;;  %v1468_v2 = vmax.f32 %v1416_v47, 0.0 }
 0x1bd   : > { %v1103_v13 = vpop.f32.mrf.mxu1 }
 0x1be   : > { %1690 = vrot.lane.b32.xlu0 %v1664_v61, %s2797_s12  ;;  %v1500_v12 = vpack.c.bf16 %v1468_v2, %v1468_v2  ;;  %v1155_v32 = vmax.f32 %v1103_v13, 0.0  ;;  %v2624_v2 = vld [vmem:[%s3360_s19 + $0x28] sm:$0xff]  }
 0x1c0   : > { %v1677_v62 = vpop.permute.xlu1 %1676  ;;  %v1756_v27 = vunpack.c.l.b16 %v1500_v12  ;;  %v1187_v44 = vpack.c.bf16 %v1155_v32, %v1155_v32 }
 0x1c1   : > { %v1826_v55 = vsel %vm1814_vm7, %v3331_v22, %v1677_v62  ;;  %2489 = vmatmul.msk.f32.gmra.mxu2 %vm1266_vm3, %v3439_v6  ;;  %v2623_v22 = vld [vmem:[%s3360_s19 + $0x20] sm:$0xff]   ;;  %v789_v6 = vpop.f32.mrf.mxu0 }
 0x1c2   : > { %v1871_v56 = vsel %vm1863_vm6, %v1826_v55, %v1789_v40  ;;  %v2574_v5 = vunpack.c.l.bf16 %v2623_v22  ;;  %v2575_v7 = vunpack.c.h.bf16 %v2623_v22  ;;  %v841_v11 = vmax.f32 %v789_v6, 0.0 }
 0x1c3   : > { %2507 = vmatmul.msk.bf16.gmra.mxu3 %vm1920_vm8, %v1871_v56  ;;  %v1419_v50 = vpop.f32.mrf.mxu2  ;;  %v1644_v51 = vunpack.c.l.b16 %v1187_v44  ;;  %v2578_v6 = vunpack.c.l.bf16 %v2624_v2 }
 0x1c4   : > { %v454_v9 = vmul.f32 %v3369_v18, %v2574_v5  ;;  %v455_v10 = vmul.f32 %v3369_v18, %v2575_v7  ;;  %v1469_v20 = vmax.f32 %v1419_v50, 0.0  ;;  %v873_v26 = vpack.c.bf16 %v841_v11, %v841_v11  ;;  %v3505_v7 = vpop.f32.mrf.mxu3 }
 0x1c5   : > { %v1106_v42 = vpop.f32.mrf.mxu1  ;;  %v2579_v5 = vunpack.c.h.bf16 %v2624_v2 }
 0x1c6   : > { %v490_v17 = vadd.f32 %v3382_v24, %v454_v9  ;;  %v491_v19 = vadd.f32 %v3382_v24, %v455_v10  ;;  %v1501_v28 = vpack.c.bf16 %v1469_v20, %v1469_v20  ;;  %v1564_v35 = vunpack.c.l.b16 %v873_v26 }
 0x1c7   : > { %v1156_v52 = vmax.f32 %v1106_v42, 0.0  ;;  %v831_v9 = vmax.f32 %v3396_v38, 0.0  ;;  %v832_v10 = vmax.f32 %v3401_v59, 0.0  ;;  %v457_v12 = vmul.f32 %v3369_v18, %v2579_v5 }
 0x1c8   : > { %v1258_v8 = vpop.permute.xlu1 %1257  ;;  %v522_v15 = vmax.f32 %v490_v17, 0.0  ;;  %v523_v23 = vmax.f32 %v491_v19, 0.0  ;;  %v1757_v37 = vunpack.c.l.b16 %v1501_v28  ;;  %v1681_v57 = vpop.permute.xlu2 %1680 }
 0x1c9   : > { %2490 = vmatmul.msk.f32.gmra.mxu2 %vm1266_vm3, %v1258_v8  ;;  %v792_v29 = vpop.f32.mrf.mxu0  ;;  %v1188_v25 = vpack.c.bf16 %v1156_v52, %v1156_v52  ;;  %v1832_v63 = vsel %vm1814_vm7, %v3392_v31, %v1681_v57  ;;  %v456_v31 = vmul.f32 %v3369_v18, %v2578_v6  ;;  %v493_v17 = vadd.f32 %v3382_v24, %v457_v12 }
 0x1ca   : > { %v550_v4 = vpack.c.bf16 %v523_v23, %v522_v15  ;;  %v842_v30 = vmax.f32 %v792_v29, 0.0  ;;  %v1777_v41 = vpack.c.b16 %v1757_v37, %v1756_v27  ;;  %v863_v50 = vpack.c.bf16 %v831_v9, %v831_v9 }
 0x1cb   : > { %v1645_v14 = vunpack.c.l.b16 %v1188_v25  ;;  %v492_v13 = vadd.f32 %v3382_v24, %v456_v31  ;;  %v864_v20 = vpack.c.bf16 %v832_v10, %v832_v10  ;;  %v525_v15 = vmax.f32 %v493_v17, 0.0 }
 0x1cc   : > { %2532 = vmatmul.msk.bf16.gmra.mxu0 %vm1863_vm6, %v550_v4  ;;  %v874_v36 = vpack.c.bf16 %v842_v30, %v842_v30  ;;  %1804 = vrot.lane.b32.xlu0 %v1777_v41, %s2796_s11  ;;  %v1554_v38 = vunpack.c.l.b16 %v863_v50  ;;  %v3516_v28 = vpop.f32.mrf.mxu3 }
 0x1cd   : > { %v1665_v40 = vpack.c.b16 %v1645_v14, %v1644_v51  ;;  %v524_v21 = vmax.f32 %v492_v13, 0.0  ;;  %v1555_v27 = vunpack.c.l.b16 %v864_v20 }
 0x1ce   : > { %v1791_v39 = vpop.permute.xlu0 %1790  ;;  %v1565_v46 = vunpack.c.l.b16 %v874_v36  ;;  %v833_v36 = vmax.f32 %v3414_v16, 0.0 }
 0x1cf   : > { %v1873_v45 = vsel %vm1863_vm6, %v1829_v33, %v1791_v39  ;;  %1692 = vrot.lane.b32.xlu2 %v1665_v40, %s2797_s12  ;;  %v551_v23 = vpack.c.bf16 %v525_v15, %v524_v21  ;;  %v1580_v30 = vpack.c.b16 %v1555_v27, %v1554_v38  ;;  %v2625_v33 = vld [vmem:[%s3360_s19 + $0x30] sm:$0xff]  }
 0x1d0   : > { %v944_v60 = vpop.permute.xlu1 %943  ;;  %v3495_v48 = vpack.c.b16 %v1565_v46, %v1564_v35  ;;  %v2582_v37 = vunpack.c.l.bf16 %v2625_v33  ;;  %v2583_v35 = vunpack.c.h.bf16 %v2625_v33  ;;  %v2627_v33 = vld [vmem:[%s3360_s19 + $0x40] sm:$0xff]  }
 0x1d1   : > { %2457 = vmatmul.msk.f32.gmra.mxu1 %vm952_vm4, %v944_v60  ;;  %v795_v49 = vpop.f32.mrf.mxu0 }
 0x1d2   : > { %v843_v62 = vmax.f32 %v795_v49, 0.0  ;;  %v458_v42 = vmul.f32 %v3369_v18, %v2582_v37  ;;  %v459_v52 = vmul.f32 %v3369_v18, %v2583_v35  ;;  %v3554_v37 = vld [vmem:[%s3800_s7] ss:$0 sm:$0xff] }
 0x1d3   : > { %2508 = vmatmul.msk.bf16.gmra.mxu3 %vm1920_vm8, %v1873_v45  ;;  %v834_v45 = vmax.f32 %v3419_v53, 0.0 }
 0x1d4   : > { %v875_v55 = vpack.c.bf16 %v843_v62, %v843_v62  ;;  %v494_v51 = vadd.f32 %v3382_v24, %v458_v42  ;;  %v495_v16 = vadd.f32 %v3382_v24, %v459_v52  ;;  %v3530_v25 = vpop.f32.mrf.mxu3  ;;  %v865_v62 = vpack.c.bf16 %v833_v36, %v833_v36 }
 0x1d5   : > { %v866_v53 = vpack.c.bf16 %v834_v45, %v834_v45  ;;  %v2590_v36 = vunpack.c.l.bf16 %v2627_v33 }
 0x1d6   : > { %v1566_v61 = vunpack.c.l.b16 %v875_v55  ;;  %v1795_v44 = vpop.permute.xlu2 %1794  ;;  %v526_v14 = vmax.f32 %v494_v51, 0.0  ;;  %v527_v40 = vmax.f32 %v495_v16, 0.0  ;;  %v1556_v57 = vunpack.c.l.b16 %v865_v62 }
 0x1d7   : > { %v462_v16 = vmul.f32 %v3369_v18, %v2590_v36 }
 0x1d9   : > { %v798_v3 = vpop.f32.mrf.mxu0 }
 0x1da   : > { %v844_v56 = vmax.f32 %v798_v3, 0.0  ;;  %v552_v3 = vpack.c.bf16 %v527_v40, %v526_v14 }
 0x1dc   : > { %v876_v34 = vpack.c.bf16 %v844_v56, %v844_v56  ;;  %2533 = vmatmul.msk.bf16.gmra.mxu0 %vm1863_vm6, %v551_v23  ;;  %2534 = vmatmul.msk.bf16.vlgmr.msrb.gmra.mxu1 %vm1863_vm6, %v552_v3  ;;  %v498_v3 = vadd.f32 %v3382_v24, %v462_v16 }
 0x1de   : > { %v1793_v0 = vpop.permute.xlu0 %1792  ;;  %v1567_v22 = vunpack.c.l.b16 %v876_v34 }
 0x1df   : > { %v1875_v47 = vsel %vm1863_vm6, %v1832_v63, %v1793_v0  ;;  %v3533_v0 = vpop.f32.mrf.mxu3 }
 0x1e0   : > { %v3507_v8 = vpack.c.b16 %v1567_v22, %v1566_v61  ;;  %v1557_v61 = vunpack.c.l.b16 %v866_v53  ;;  %v2626_v22 = vld [vmem:[%s3360_s19 + $0x38] sm:$0xff]  }
 0x1e1   : > { %v801_v11 = vpop.f32.mrf.mxu0  ;;  %v2586_v5 = vunpack.c.l.bf16 %v2626_v22  ;;  %v2587_v9 = vunpack.c.h.bf16 %v2626_v22 }
 0x1e2   : > { %v845_v19 = vmax.f32 %v801_v11, 0.0  ;;  %v1581_v63 = vpack.c.b16 %v1557_v61, %v1556_v57  ;;  %v530_v57 = vmax.f32 %v498_v3, 0.0 }
 0x1e3   : > { %2509 = vmatmul.msk.bf16.gmra.mxu3 %vm1920_vm8, %v1875_v47  ;;  %v460_v17 = vmul.f32 %v3369_v18, %v2586_v5 }
 0x1e4   : > { %v877_v26 = vpack.c.bf16 %v845_v19, %v845_v19  ;;  %v461_v19 = vmul.f32 %v3369_v18, %v2587_v9 }
 0x1e5   : > { %v496_v21 = vadd.f32 %v3382_v24, %v460_v17 }
 0x1e6   : > { %v1568_v4 = vunpack.c.l.b16 %v877_v26  ;;  %v497_v15 = vadd.f32 %v3382_v24, %v461_v19 }
 0x1e7   : > { %v528_v26 = vmax.f32 %v496_v21, 0.0 }
 0x1e8   : > { %v529_v38 = vmax.f32 %v497_v15, 0.0 }
 0x1e9   : > { %v804_v59 = vpop.f32.mrf.mxu0 }
 0x1ea   : > { %v846_v29 = vmax.f32 %v804_v59, 0.0  ;;  %v553_v59 = vpack.c.bf16 %v529_v38, %v528_v26 }
 0x1ec   : > { %v878_v60 = vpack.c.bf16 %v846_v29, %v846_v29  ;;  %v3544_v29 = vpop.f32.mrf.mxu3  ;;  %2535 = vmatmul.msk.bf16.gmra.mxu1 %vm1863_vm6, %v553_v59 }
 0x1ee   : > { %v1569_v32 = vunpack.c.l.b16 %v878_v60 }
 0x1f0   : > { %v3520_v39 = vpack.c.b16 %v1569_v32, %v1568_v4  ;;  %v1683_v41 = vpop.permute.xlu1 %1682 }
 0x1f1   : > { %v1835_v46 = vsel %vm1814_vm7, %v1580_v30, %v1683_v41  ;;  %v2111_v6 = vpop.f32.mrf.mxu0  ;;  %v2591_v41 = vunpack.c.h.bf16 %v2627_v33 }
 0x1f2   : > { %v1877_v49 = vsel %vm1863_vm6, %v1835_v46, %v1795_v44 }
 0x1f3   : > { %2510 = vmatmul.msk.bf16.gmra.mxu3 %vm1920_vm8, %v1877_v49  ;;  %v463_v53 = vmul.f32 %v3369_v18, %v2591_v41 }
 0x1f8   : > { %v1687_v44 = vpop.permute.xlu2 %1686 }
 0x1f9   : > { %v2113_v60 = vpop.f32.mrf.mxu0  ;;  %v1841_v49 = vsel %vm1814_vm7, %v3455_v54, %v1687_v44 }
 0x1fc   : > { %v1109_v55 = vpop.f32.mrf.mxu1 }
 0x1fd   : > { %v1157_v56 = vmax.f32 %v1109_v55, 0.0 }
 0x1fe   : > { %v1797_v13 = vpop.permute.xlu1 %1796 }
 0x1ff   : > { %v1189_v34 = vpack.c.bf16 %v1157_v56, %v1157_v56  ;;  %v499_v56 = vadd.f32 %v3382_v24, %v463_v53 }
 0x200   : > { %v1685_v11 = vpop.permute.xlu0 %1684 }
 0x201   : > { %v1646_v10 = vunpack.c.l.b16 %v1189_v34  ;;  %v1838_v12 = vsel %vm1814_vm7, %v1581_v63, %v1685_v11  ;;  %v2116_v55 = vpop.f32.mrf.mxu0  ;;  %v531_v63 = vmax.f32 %v499_v56, 0.0 }
 0x202   : > { %v1879_v50 = vsel %vm1863_vm6, %v1838_v12, %v1797_v13  ;;  %v2628_v13 = vld [vmem:[%s3360_s19 + $0x48] sm:$0xff]  }
 0x203   : > { %2511 = vmatmul.msk.bf16.gmra.mxu3 %vm1920_vm8, %v1879_v50  ;;  %v554_v22 = vpack.c.bf16 %v531_v63, %v530_v57  ;;  %v2594_v50 = vunpack.c.l.bf16 %v2628_v13 }
 0x204   : > { %v1112_v47 = vpop.f32.mrf.mxu1 }
 0x205   : > { %v1158_v2 = vmax.f32 %v1112_v47, 0.0  ;;  %2536 = vmatmul.msk.bf16.gmra.mxu1 %vm1863_vm6, %v554_v22 }
 0x207   : > { %v1190_v31 = vpack.c.bf16 %v1158_v2, %v1158_v2 }
 0x209   : > { %v1647_v20 = vunpack.c.l.b16 %v1190_v31  ;;  %v2118_v9 = vpop.f32.mrf.mxu0 }
 0x20b   : > { %v1666_v23 = vpack.c.b16 %v1647_v20, %v1646_v10  ;;  %v2595_v20 = vunpack.c.h.bf16 %v2628_v13 }
 0x20c   : > { %v1115_v27 = vpop.f32.mrf.mxu1 }
 0x20d   : > { %1694 = vrot.lane.b32.xlu1 %v1666_v23, %s2797_s12  ;;  %v1159_v4 = vmax.f32 %v1115_v27, 0.0  ;;  %v1801_v27 = vpop.permute.xlu2 %1800 }
 0x20e   : > { %v1799_v51 = vpop.permute.xlu0 %1798 }
 0x20f   : > { %v1191_v30 = vpack.c.bf16 %v1159_v4, %v1159_v4  ;;  %v1881_v62 = vsel %vm1863_vm6, %v1841_v49, %v1799_v51 }
 0x211   : > { %v1648_v45 = vunpack.c.l.b16 %v1191_v30  ;;  %v465_v30 = vmul.f32 %v3369_v18, %v2595_v20  ;;  %v2121_v51 = vpop.f32.mrf.mxu0 }
 0x213   : > { %2512 = vmatmul.msk.bf16.gmra.mxu3 %vm1920_vm8, %v1881_v62 }
 0x214   : > { %v1118_v32 = vpop.f32.mrf.mxu1 }
 0x215   : > { %v1160_v35 = vmax.f32 %v1118_v32, 0.0 }
 0x216   : > { %v1962_v46 = vpop.f32.mrf.mxu3 }
 0x217   : > { %v2112_v42 = vadd.f32 %v2111_v6, %v1962_v46  ;;  %v1192_v52 = vpack.c.bf16 %v1160_v35, %v1160_v35 }
 0x219   : > { %v2195_v14 = vadd.f32 %v3554_v37, %v2112_v42  ;;  %v1649_v40 = vunpack.c.l.b16 %v1192_v52 }
 0x21b   : > { %2227 = vst.msk [vmem:[%s3565_s16] sm:$0xff] %vm1863_vm6, %v2195_v14  ;;  %v1667_v54 = vpack.c.b16 %v1649_v40, %v1648_v45  ;;  %v501_v45 = vadd.f32 %v3382_v24, %v465_v30 }
 0x21c   : > { %v1422_v61 = vpop.f32.mrf.mxu2  ;;  %v1121_v34 = vpop.f32.mrf.mxu1 }
 0x21d   : > { %1696 = vrot.lane.b32.xlu0 %v1667_v54, %s2797_s12  ;;  %v1470_v6 = vmax.f32 %v1422_v61, 0.0  ;;  %v1161_v11 = vmax.f32 %v1121_v34, 0.0  ;;  %v533_v42 = vmax.f32 %v501_v45, 0.0 }
 0x21e   : > { %v1964_v47 = vpop.f32.mrf.mxu3 }
 0x21f   : > { %v2114_v2 = vadd.f32 %v2113_v60, %v1964_v47  ;;  %v1502_v10 = vpack.c.bf16 %v1470_v6, %v1470_v6  ;;  %v1193_v59 = vpack.c.bf16 %v1161_v11, %v1161_v11  ;;  %v464_v60 = vmul.f32 %v3369_v18, %v2594_v50  ;;  %v2123_v47 = vpop.f32.mrf.mxu0  ;;  %v2630_v6 = vld [vmem:[%s3360_s19 + $0x58] sm:$0xff]  }
 0x220   : > { %v1689_v15 = vpop.permute.xlu1 %1688  ;;  %v2603_v11 = vunpack.c.h.bf16 %v2630_v6 }
 0x221   : > { %v2196_v5 = vadd.f32 %v3554_v37, %v2114_v2  ;;  %v1844_v38 = vsel %vm1814_vm7, %v3469_v58, %v1689_v15  ;;  %v1758_v32 = vunpack.c.l.b16 %v1502_v10  ;;  %v500_v41 = vadd.f32 %v3382_v24, %v464_v60 }
 0x222   : > { %v1883_v4 = vsel %vm1863_vm6, %v1844_v38, %v1801_v27  ;;  %v1650_v52 = vunpack.c.l.b16 %v1193_v59  ;;  %v2602_v10 = vunpack.c.l.bf16 %v2630_v6 }
 0x223   : > { %2228 = vst.msk [vmem:[%s3565_s16 + $0x8] sm:$0xff] %vm1863_vm6, %v2196_v5  ;;  %2513 = vmatmul.msk.bf16.gmra.mxu3 %vm1920_vm8, %v1883_v4  ;;  %v532_v44 = vmax.f32 %v500_v41, 0.0  ;;  %v2629_v5 = vld [vmem:[%s3360_s19 + $0x50] sm:$0xff]  }
 0x224   : > { %v1425_v31 = vpop.f32.mrf.mxu2  ;;  %v1124_v12 = vpop.f32.mrf.mxu1  ;;  %v468_v50 = vmul.f32 %v3369_v18, %v2602_v10 }
 0x225   : > { %v1471_v17 = vmax.f32 %v1425_v31, 0.0  ;;  %v1162_v19 = vmax.f32 %v1124_v12, 0.0  ;;  %v555_v62 = vpack.c.bf16 %v533_v42, %v532_v44  ;;  %v2598_v31 = vunpack.c.l.bf16 %v2629_v5 }
 0x226   : > { %v1967_v21 = vpop.f32.mrf.mxu3 }
 0x227   : > { %v1503_v23 = vpack.c.bf16 %v1471_v17, %v1471_v17  ;;  %v2117_v26 = vadd.f32 %v2116_v55, %v1967_v21  ;;  %v1194_v36 = vpack.c.bf16 %v1162_v19, %v1162_v19  ;;  %2537 = vmatmul.msk.bf16.gmra.mxu1 %vm1863_vm6, %v555_v62  ;;  %v2599_v19 = vunpack.c.h.bf16 %v2629_v5  ;;  %v2126_v45 = vpop.f32.mrf.mxu0 }
 0x228   : > { %v466_v20 = vmul.f32 %v3369_v18, %v2598_v31 }
 0x229   : > { %v1759_v33 = vunpack.c.l.b16 %v1503_v23  ;;  %v2197_v35 = vadd.f32 %v3554_v37, %v2117_v26  ;;  %v1651_v49 = vunpack.c.l.b16 %v1194_v36  ;;  %v467_v15 = vmul.f32 %v3369_v18, %v2599_v19 }
 0x22a   : > { %v504_v26 = vadd.f32 %v3382_v24, %v468_v50  ;;  %v502_v27 = vadd.f32 %v3382_v24, %v466_v20 }
 0x22b   : > { %v1778_v58 = vpack.c.b16 %v1759_v33, %v1758_v32  ;;  %2229 = vst.msk [vmem:[%s3565_s16 + $0x10] sm:$0xff] %vm1863_vm6, %v2197_v35  ;;  %v1668_v14 = vpack.c.b16 %v1651_v49, %v1650_v52  ;;  %v503_v59 = vadd.f32 %v3382_v24, %v467_v15 }
 0x22c   : > { %v1428_v46 = vpop.f32.mrf.mxu2  ;;  %v536_v60 = vmax.f32 %v504_v26, 0.0  ;;  %v534_v32 = vmax.f32 %v502_v27, 0.0  ;;  %v3637_v27 = vld [vmem:[%s3796_s3] ss:$0 sm:$0xff] }
 0x22d   : > { %1806 = vrot.lane.b32.xlu2 %v1778_v58, %s2796_s11  ;;  %v1472_v40 = vmax.f32 %v1428_v46, 0.0  ;;  %v535_v35 = vmax.f32 %v503_v59, 0.0  ;;  %v1693_v46 = vpop.permute.xlu2 %1692 }
 0x22e   : > { %v1969_v16 = vpop.f32.mrf.mxu3  ;;  %v1803_v2 = vpop.permute.xlu1 %1802  ;;  %v1850_v52 = vsel %vm1814_vm7, %v3495_v48, %v1693_v46 }
 0x22f   : > { %v2119_v53 = vadd.f32 %v2118_v9, %v1969_v16  ;;  %v1504_v56 = vpack.c.bf16 %v1472_v40, %v1472_v40  ;;  %v556_v58 = vpack.c.bf16 %v535_v35, %v534_v32  ;;  %v2128_v48 = vpop.f32.mrf.mxu0 }
 0x230   : > { %v1691_v61 = vpop.permute.xlu0 %1690 }
 0x231   : > { %v2198_v55 = vadd.f32 %v3554_v37, %v2119_v53  ;;  %v1847_v22 = vsel %vm1814_vm7, %v3480_v1, %v1691_v61  ;;  %v1760_v12 = vunpack.c.l.b16 %v1504_v56  ;;  %v469_v1 = vmul.f32 %v3369_v18, %v2603_v11 }
 0x232   : > { %v1885_v9 = vsel %vm1863_vm6, %v1847_v22, %v1803_v2  ;;  %v1164_v56 = vmax.f32 %v3533_v0, 0.0 }
 0x233   : > { %2230 = vst.msk [vmem:[%s3565_s16 + $0x18] sm:$0xff] %vm1863_vm6, %v2198_v55  ;;  %2514 = vmatmul.msk.bf16.gmra.mxu3 %vm1920_vm8, %v1885_v9  ;;  %v505_v38 = vadd.f32 %v3382_v24, %v469_v1 }
 0x234   : > { %v1431_v3 = vpop.f32.mrf.mxu2 }
 0x235   : > { %v1473_v54 = vmax.f32 %v1431_v3, 0.0  ;;  %1698 = vrot.lane.b32.xlu2 %v1668_v14, %s2797_s12  ;;  %v537_v30 = vmax.f32 %v505_v38, 0.0  ;;  %v1477_v14 = vmax.f32 %v3544_v29, 0.0 }
 0x236   : > { %v1972_v57 = vpop.f32.mrf.mxu3 }
 0x237   : > { %v1505_v34 = vpack.c.bf16 %v1473_v54, %v1473_v54  ;;  %v2122_v63 = vadd.f32 %v2121_v51, %v1972_v57  ;;  %v557_v36 = vpack.c.bf16 %v537_v30, %v536_v60  ;;  %2538 = vmatmul.msk.bf16.gmra.mxu1 %vm1863_vm6, %v556_v58  ;;  %v1509_v61 = vpack.c.bf16 %v1477_v14, %v1477_v14  ;;  %v3645_v30 = vld [vmem:[%s3797_s4] ss:$0 sm:$0xff] }
 0x239   : > { %v1761_v13 = vunpack.c.l.b16 %v1505_v34  ;;  %v2199_v17 = vadd.f32 %v3554_v37, %v2122_v63  ;;  %2539 = vmatmul.msk.bf16.vlgmr.msrb.gmra.mxu2 %vm1863_vm6, %v557_v36  ;;  %v1765_v5 = vunpack.c.l.b16 %v1509_v61 }
 0x23b   : > { %v1779_v21 = vpack.c.b16 %v1761_v13, %v1760_v12  ;;  %2231 = vst.msk [vmem:[%s3565_s16 + $0x20] sm:$0xff] %vm1863_vm6, %v2199_v17 }
 0x23c   : > { %v1434_v23 = vpop.f32.mrf.mxu2 }
 0x23d   : > { %1808 = vrot.lane.b32.xlu1 %v1779_v21, %s2796_s11  ;;  %v1474_v18 = vmax.f32 %v1434_v23, 0.0  ;;  %v2631_v21 = vld [vmem:[%s3360_s19 + $0x60] sm:$0xff]  }
 0x23e   : > { %v1974_v4 = vpop.f32.mrf.mxu3  ;;  %v1805_v62 = vpop.permute.xlu0 %1804  ;;  %v2606_v23 = vunpack.c.l.bf16 %v2631_v21  ;;  %v2607_v26 = vunpack.c.h.bf16 %v2631_v21 }
 0x23f   : > { %v2124_v33 = vadd.f32 %v2123_v47, %v1974_v4  ;;  %v1506_v44 = vpack.c.bf16 %v1474_v18, %v1474_v18  ;;  %v1887_v53 = vsel %vm1863_vm6, %v1850_v52, %v1805_v62  ;;  %v1196_v47 = vpack.c.bf16 %v1164_v56, %v1164_v56 }
 0x240   : > { %v470_v59 = vmul.f32 %v3637_v27, %v2606_v23  ;;  %v471_v4 = vmul.f32 %v3637_v27, %v2607_v26 }
 0x241   : > { %v2200_v41 = vadd.f32 %v3554_v37, %v2124_v33  ;;  %v1762_v40 = vunpack.c.l.b16 %v1506_v44  ;;  %v1653_v11 = vunpack.c.l.b16 %v1196_v47 }
 0x242   : > { %v506_v32 = vadd.f32 %v3645_v30, %v470_v59  ;;  %v507_v33 = vadd.f32 %v3645_v30, %v471_v4 }
 0x243   : > { %2232 = vst.msk [vmem:[%s3565_s16 + $0x28] sm:$0xff] %vm1863_vm6, %v2200_v41  ;;  %2515 = vmatmul.msk.bf16.gmra.mxu3 %vm1920_vm8, %v1887_v53 }
 0x244   : > { %v1437_v24 = vpop.f32.mrf.mxu2  ;;  %v538_v35 = vmax.f32 %v506_v32, 0.0  ;;  %v539_v36 = vmax.f32 %v507_v33, 0.0  ;;  %v2634_v32 = vld [vmem:[%s3360_s19 + $0x78] sm:$0xff]  }
 0x245   : > { %v1475_v42 = vmax.f32 %v1437_v24, 0.0  ;;  %v2632_v24 = vld [vmem:[%s3360_s19 + $0x68] sm:$0xff]   ;;  %v2618_v33 = vunpack.c.l.bf16 %v2634_v32 }
 0x246   : > { %v1977_v49 = vpop.f32.mrf.mxu3  ;;  %v558_v18 = vpack.c.bf16 %v539_v36, %v538_v35  ;;  %v2610_v44 = vunpack.c.l.bf16 %v2632_v24  ;;  %v2619_v35 = vunpack.c.h.bf16 %v2634_v32 }
 0x247   : > { %v1507_v51 = vpack.c.bf16 %v1475_v42, %v1475_v42  ;;  %v2127_v16 = vadd.f32 %v2126_v45, %v1977_v49  ;;  %v2611_v42 = vunpack.c.h.bf16 %v2632_v24 }
 0x248   : > { %v472_v49 = vmul.f32 %v3637_v27, %v2610_v44 }
 0x249   : > { %v1763_v55 = vunpack.c.l.b16 %v1507_v51  ;;  %v2201_v3 = vadd.f32 %v3554_v37, %v2127_v16  ;;  %v2131_v13 = vpop.f32.mrf.mxu0  ;;  %2540 = vmatmul.msk.bf16.gmra.mxu2 %vm1863_vm6, %v558_v18  ;;  %v473_v51 = vmul.f32 %v3637_v27, %v2611_v42  ;;  %v476_v18 = vmul.f32 %v3637_v27, %v2618_v33 }
 0x24a   : > { %v508_v53 = vadd.f32 %v3645_v30, %v472_v49 }
 0x24b   : > { %v1780_v54 = vpack.c.b16 %v1763_v55, %v1762_v40  ;;  %2233 = vst.msk [vmem:[%s3565_s16 + $0x30] sm:$0xff] %vm1863_vm6, %v2201_v3  ;;  %v509_v14 = vadd.f32 %v3645_v30, %v473_v51 }
 0x24c   : > { %v1440_v57 = vpop.f32.mrf.mxu2  ;;  %v540_v55 = vmax.f32 %v508_v53, 0.0 }
 0x24d   : > { %v1476_v34 = vmax.f32 %v1440_v57, 0.0  ;;  %1810 = vrot.lane.b32.xlu0 %v1780_v54, %s2796_s11  ;;  %v541_v3 = vmax.f32 %v509_v14, 0.0 }
 0x24e   : > { %v1127_v63 = vpop.f32.mrf.mxu1  ;;  %v1979_v29 = vpop.f32.mrf.mxu3 }
 0x24f   : > { %v1508_v22 = vpack.c.bf16 %v1476_v34, %v1476_v34  ;;  %v1163_v2 = vmax.f32 %v1127_v63, 0.0  ;;  %v2129_v6 = vadd.f32 %v2128_v48, %v1979_v29  ;;  %v559_v56 = vpack.c.bf16 %v541_v3, %v540_v55 }
 0x250   : > { %v847_v3 = vmax.f32 %v3497_v43, 0.0 }
 0x251   : > { %v1764_v9 = vunpack.c.l.b16 %v1508_v22  ;;  %v1195_v0 = vpack.c.bf16 %v1163_v2, %v1163_v2  ;;  %v2202_v10 = vadd.f32 %v3554_v37, %v2129_v6  ;;  %v2133_v20 = vpop.f32.mrf.mxu0 }
 0x253   : > { %v1781_v31 = vpack.c.b16 %v1765_v5, %v1764_v9  ;;  %v1652_v12 = vunpack.c.l.b16 %v1195_v0  ;;  %2234 = vst.msk [vmem:[%s3565_s16 + $0x38] sm:$0xff] %vm1863_vm6, %v2202_v10 }
 0x255   : > { %v1669_v17 = vpack.c.b16 %v1653_v11, %v1652_v12  ;;  %1812 = vrot.lane.b32.xlu2 %v1781_v31, %s2796_s11  ;;  %v2633_v11 = vld [vmem:[%s3360_s19 + $0x70] sm:$0xff]   ;;  %s2555_s19 = sshll.u32 %s2784_s30, 8  ;;  %s2260_s30 = scalar_lea.sflag [#allocation3], %s352_s14 }
 0x256   : > { %v1982_v19 = vpop.f32.mrf.mxu3  ;;  %v2614_v12 = vunpack.c.l.bf16 %v2633_v11  ;;  %s2273_s23 = scalar_lea.hbm %s3801_s8, %s2555_s19  ;;  %s2734_s19 = scalar_lea.hbm %s3801_s8, 512 }
 0x257   : > { %1700 = vrot.lane.b32.xlu1 %v1669_v17, %s2797_s12  ;;  %v2132_v50 = vadd.f32 %v2131_v13, %v1982_v19  ;;  %v2615_v13 = vunpack.c.h.bf16 %v2633_v11  ;;  %s2276_s24 = sshll.u32 %s2273_s23, 4  ;;  %s2277_s24 = int_to_ptr.hbm [resolvable:$true] %s2276_s24 }
 0x258   : > { %s2728_s20 = sshra.s32 %s2277_s24, 4  ;;  %s2729_s20 = int_to_ptr.hbm [resolvable:$true] %s2728_s20 }
 0x259   : > { %v2203_v1 = vadd.f32 %v3554_v37, %v2132_v50  ;;  %v2136_v45 = vpop.f32.mrf.mxu0  ;;  %2541 = vmatmul.msk.bf16.gmra.mxu2 %vm1863_vm6, %v559_v56  ;;  %v2141_v48 = vpop.f32.mrf.mxu1  ;;  %v475_v17 = vmul.f32 %v3637_v27, %v2615_v13  ;;  %v848_v56 = vmax.f32 %v3505_v7, 0.0  ;;  %v849_v7 = vmax.f32 %v3516_v28, 0.0  ;;  %s2730_s21 = scalar_lea.hbm %s2729_s20, 256  ;;  %p2735_p1 = scmp.lt.s32.totalorder %s2729_s20, %s3801_s8 }
 0x25a   : > { %p2731_p12 = scmp.ne.s32.totalorder %s2729_s20, %s2730_s21  ;;  %p2736_p2 = scmp.lt.s32.totalorder %s2734_s19, %s2730_s21 }
 0x25b   : > { %2235 = vst.msk [vmem:[%s3565_s16 + $0x40] sm:$0xff] %vm1863_vm6, %v2203_v1  ;;  %v511_v50 = vadd.f32 %v3645_v30, %v475_v17  ;;  %v881_v11 = vpack.c.bf16 %v849_v7, %v849_v7 }
 0x25c   : > { %p2732_p13 = pnand %p2731_p12, %p2885_p4  ;;  %p2737_p3 = por %p2736_p2, %p2735_p1 }
 0x25d   : > { %v543_v23 = vmax.f32 %v511_v50, 0.0  ;;  %v1572_v28 = vunpack.c.l.b16 %v881_v11 }
 0x25e   : > { %v1984_v15 = vpop.f32.mrf.mxu3  ;;  %p2733_p0 = pneg %p2732_p13 }
 0x25f   : > { %v2134_v38 = vadd.f32 %v2133_v20, %v1984_v15 }
 0x260   : > { %p2738_p5 = pnand %p2737_p3, %p2733_p0 }
 0x261   : > { %v2204_v60 = vadd.f32 %v3554_v37, %v2134_v38  ;;  %v2138_v16 = vpop.f32.mrf.mxu0  ;;  %v2143_v29 = vpop.f32.mrf.mxu1 }
 0x263   : > { %2236 = vst.msk [vmem:[%s3565_s16 + $0x48] sm:$0xff] %vm1863_vm6, %v2204_v60 }
 0x266   : > { %v1987_v41 = vpop.f32.mrf.mxu3 }
 0x267   : > { %v2137_v58 = vadd.f32 %v2136_v45, %v1987_v41  ;;  %v477_v41 = vmul.f32 %v3637_v27, %v2619_v35  ;;  %v512_v45 = vadd.f32 %v3645_v30, %v476_v18 }
 0x269   : > { %v2205_v46 = vadd.f32 %v3554_v37, %v2137_v58  ;;  %v2146_v0 = vpop.f32.mrf.mxu1  ;;  %v513_v58 = vadd.f32 %v3645_v30, %v477_v41  ;;  %v544_v44 = vmax.f32 %v512_v45, 0.0 }
 0x26b   : > { %2237 = vst.msk [vmem:[%s3565_s16 + $0x50] sm:$0xff] %vm1863_vm6, %v2205_v46  ;;  %v545_v42 = vmax.f32 %v513_v58, 0.0 }
 0x26d   : > { %v561_v49 = vpack.c.bf16 %v545_v42, %v544_v44 }
 0x26e   : > { %v1989_v52 = vpop.f32.mrf.mxu3 }
 0x26f   : > { %v2139_v62 = vadd.f32 %v2138_v16, %v1989_v52 }
 0x271   : > { %v2206_v40 = vadd.f32 %v3554_v37, %v2139_v62  ;;  %v2148_v20 = vpop.f32.mrf.mxu1 }
 0x273   : > { %2238 = vst.msk [vmem:[%s3565_s16 + $0x58] sm:$0xff] %vm1863_vm6, %v2206_v40 }
 0x276   : > { %v1992_v54 = vpop.f32.mrf.mxu3 }
 0x277   : > { %v2142_v57 = vadd.f32 %v2141_v48, %v1992_v54  ;;  %v879_v48 = vpack.c.bf16 %v847_v3, %v847_v3 }
 0x279   : > { %v2207_v61 = vadd.f32 %v3554_v37, %v2142_v57  ;;  %v880_v57 = vpack.c.bf16 %v848_v56, %v848_v56 }
 0x27b   : > { %2239 = vst.msk [vmem:[%s3565_s16 + $0x60] sm:$0xff] %vm1863_vm6, %v2207_v61 }
 0x27e   : > { %v1994_v63 = vpop.f32.mrf.mxu3 }
 0x27f   : > { %v1695_v34 = vpop.permute.xlu1 %1694  ;;  %v2144_v22 = vadd.f32 %v2143_v29, %v1994_v63  ;;  %v1570_v63 = vunpack.c.l.b16 %v879_v48  ;;  %v1571_v29 = vunpack.c.l.b16 %v880_v57 }
 0x280   : > { %v1853_v47 = vsel %vm1814_vm7, %v3507_v8, %v1695_v34  ;;  %v474_v8 = vmul.f32 %v3637_v27, %v2614_v12 }
 0x281   : > { %v2208_v6 = vadd.f32 %v3554_v37, %v2144_v22  ;;  %v1588_v22 = vpack.c.b16 %v1571_v29, %v1570_v63 }
 0x282   : > { %v510_v19 = vadd.f32 %v3645_v30, %v474_v8  ;;  %v2151_v4 = vpop.f32.mrf.mxu1 }
 0x283   : > { %2240 = vst.msk [vmem:[%s3565_s16 + $0x68] sm:$0xff] %vm1863_vm6, %v2208_v6 }
 0x284   : > { %v542_v15 = vmax.f32 %v510_v19, 0.0 }
 0x286   : > { %v1997_v9 = vpop.f32.mrf.mxu3  ;;  %v560_v38 = vpack.c.bf16 %v543_v23, %v542_v15 }
 0x287   : > { %v1807_v2 = vpop.permute.xlu2 %1806  ;;  %v2147_v10 = vadd.f32 %v2146_v0, %v1997_v9 }
 0x288   : > { %v1889_v5 = vsel %vm1863_vm6, %v1853_v47, %v1807_v2  ;;  %2542 = vmatmul.msk.bf16.gmra.mxu2 %vm1863_vm6, %v560_v38  ;;  %v850_v2 = vmax.f32 %v3530_v25, 0.0 }
 0x289   : > { %2516 = vmatmul.msk.bf16.gmra.mxu3 %vm1920_vm8, %v1889_v5  ;;  %v2209_v31 = vadd.f32 %v3554_v37, %v2147_v10 }
 0x28a   : > { %v2153_v24 = vpop.f32.mrf.mxu1 }
 0x28b   : > { %2241 = vst.msk [vmem:[%s3565_s16 + $0x70] sm:$0xff] %vm1863_vm6, %v2209_v31  ;;  %v882_v31 = vpack.c.bf16 %v850_v2, %v850_v2 }
 0x28d   : > { %v1573_v25 = vunpack.c.l.b16 %v882_v31 }
 0x28e   : > { %v1999_v1 = vpop.f32.mrf.mxu3 }
 0x28f   : > { %v2149_v21 = vadd.f32 %v2148_v20, %v1999_v1  ;;  %v1697_v27 = vpop.permute.xlu0 %1696  ;;  %v1699_v47 = vpop.permute.xlu2 %1698  ;;  %v1589_v1 = vpack.c.b16 %v1573_v25, %v1572_v28 }
 0x290   : > { %v1856_v30 = vsel %vm1814_vm7, %v3520_v39, %v1697_v27  ;;  %v1859_v6 = vsel %vm1814_vm7, %v1588_v22, %v1699_v47 }
 0x291   : > { %v2210_v26 = vadd.f32 %v3554_v37, %v2149_v21 }
 0x293   : > { %2242 = vst.msk [vmem:[%s3565_s16 + $0x78] sm:$0xff] %vm1863_vm6, %v2210_v26 }
 0x296   : > { %v2002_v59 = vpop.f32.mrf.mxu3 }
 0x297   : > { %v2152_v60 = vadd.f32 %v2151_v4, %v2002_v59 }
 0x298   : > { %2543 = vmatmul.msk.bf16.gmra.mxu2 %vm1863_vm6, %v561_v49 }
 0x299   : > { %v2211_v36 = vadd.f32 %v3554_v37, %v2152_v60 }
 0x29b   : > { %2243 = vst.msk [vmem:[%s3565_s16 + $0x80] sm:$0xff] %vm1863_vm6, %v2211_v36 }
 0x29e   : > { %v2004_v46 = vpop.f32.mrf.mxu3 }
 0x29f   : > { %v2154_v52 = vadd.f32 %v2153_v24, %v2004_v46 }
 0x2a1   : > { %v2212_v51 = vadd.f32 %v3554_v37, %v2154_v52 }
 0x2a3   : > { %2244 = vst.msk [vmem:[%s3565_s16 + $0x88] sm:$0xff] %vm1863_vm6, %v2212_v51 }
 0x2a4   : > { %v2156_v62 = vpop.f32.mrf.mxu1 }
 0x2a6   : > { %v2007_v16 = vpop.f32.mrf.mxu3 }
 0x2a7   : > { %v2157_v53 = vadd.f32 %v2156_v62, %v2007_v16 }
 0x2a9   : > { %v2213_v55 = vadd.f32 %v3554_v37, %v2157_v53 }
 0x2ab   : > { %2245 = vst.msk [vmem:[%s3565_s16 + $0x90] sm:$0xff] %vm1863_vm6, %v2213_v55 }
 0x2ac   : > { %v2158_v61 = vpop.f32.mrf.mxu1 }
 0x2ae   : > { %v2009_v54 = vpop.f32.mrf.mxu3 }
 0x2af   : > { %v1809_v14 = vpop.permute.xlu1 %1808  ;;  %v2159_v34 = vadd.f32 %v2158_v61, %v2009_v54  ;;  %v1813_v26 = vpop.permute.xlu2 %1812 }
 0x2b0   : > { %v1891_v40 = vsel %vm1863_vm6, %v1856_v30, %v1809_v14 }
 0x2b1   : > { %2517 = vmatmul.msk.bf16.gmra.mxu3 %vm1920_vm8, %v1891_v40  ;;  %v2214_v39 = vadd.f32 %v3554_v37, %v2159_v34 }
 0x2b3   : > { %2246 = vst.msk [vmem:[%s3565_s16 + $0x98] sm:$0xff] %vm1863_vm6, %v2214_v39 }
 0x2b4   : > { %v2161_v0 = vpop.f32.mrf.mxu1 }
 0x2b6   : > { %v2012_v43 = vpop.f32.mrf.mxu3 }
 0x2b7   : > { %v2162_v10 = vadd.f32 %v2161_v0, %v2012_v43 }
 0x2b9   : > { %v2215_v12 = vadd.f32 %v3554_v37, %v2162_v10 }
 0x2bb   : > { %2247 = vst.msk [vmem:[%s3565_s16 + $0xa0] sm:$0xff] %vm1863_vm6, %v2215_v12 }
 0x2bc   : > { %v2166_v8 = vpop.f32.mrf.mxu2  ;;  %v2163_v17 = vpop.f32.mrf.mxu1 }
 0x2be   : > { %v2014_v13 = vpop.f32.mrf.mxu3 }
 0x2bf   : > { %v1811_v5 = vpop.permute.xlu0 %1810  ;;  %v2164_v19 = vadd.f32 %v2163_v17, %v2014_v13 }
 0x2c0   : > { %v1893_v9 = vsel %vm1863_vm6, %v1859_v6, %v1811_v5 }
 0x2c1   : > { %2518 = vmatmul.msk.bf16.gmra.mxu3 %vm1920_vm8, %v1893_v9  ;;  %v2216_v20 = vadd.f32 %v3554_v37, %v2164_v19 }
 0x2c3   : > { %2248 = vst.msk [vmem:[%s3565_s16 + $0xa8] sm:$0xff] %vm1863_vm6, %v2216_v20 }
 0x2c4   : > { %v2168_v4 = vpop.f32.mrf.mxu2 }
 0x2c6   : > { %v2017_v21 = vpop.f32.mrf.mxu3 }
 0x2c7   : > { %v2167_v23 = vadd.f32 %v2166_v8, %v2017_v21 }
 0x2c9   : > { %v1701_v50 = vpop.permute.xlu1 %1700  ;;  %v2217_v38 = vadd.f32 %v3554_v37, %v2167_v23 }
 0x2ca   : > { %v1862_v15 = vsel %vm1814_vm7, %v1589_v1, %v1701_v50 }
 0x2cb   : > { %v1895_v59 = vsel %vm1863_vm6, %v1862_v15, %v1813_v26  ;;  %2249 = vst.msk [vmem:[%s3565_s16 + $0xb0] sm:$0xff] %vm1863_vm6, %v2217_v38 }
 0x2cc   : > { %v2171_v35 = vpop.f32.mrf.mxu2 }
 0x2ce   : > { %v2019_v60 = vpop.f32.mrf.mxu3 }
 0x2cf   : > { %v2169_v32 = vadd.f32 %v2168_v4, %v2019_v60 }
 0x2d1   : > { %2519 = vmatmul.msk.bf16.gmra.mxu3 %vm1920_vm8, %v1895_v59  ;;  %v2218_v33 = vadd.f32 %v3554_v37, %v2169_v32 }
 0x2d3   : > { %2250 = vst.msk [vmem:[%s3565_s16 + $0xb8] sm:$0xff] %vm1863_vm6, %v2218_v33 }
 0x2d4   : > { %v2173_v45 = vpop.f32.mrf.mxu2 }
 0x2dc   : > { %v2176_v44 = vpop.f32.mrf.mxu2 }
 0x2e4   : > { %v2178_v52 = vpop.f32.mrf.mxu2 }
 0x30b   : > { %v2181_v62 = vpop.f32.mrf.mxu2 }
 0x30c   : > { %v2022_v36 = vpop.f32.mrf.mxu3 }
 0x30d   : > { %v2172_v18 = vadd.f32 %v2171_v35, %v2022_v36 }
 0x30f   : > { %v2219_v41 = vadd.f32 %v3554_v37, %v2172_v18 }
 0x311   : > { %2251 = vst.msk [vmem:[%s3565_s16 + $0xc0] sm:$0xff] %vm1863_vm6, %v2219_v41 }
 0x313   : > { %v2183_v55 = vpop.f32.mrf.mxu2 }
 0x314   : > { %v2024_v58 = vpop.f32.mrf.mxu3 }
 0x315   : > { %v2174_v46 = vadd.f32 %v2173_v45, %v2024_v58 }
 0x317   : > { %v2220_v24 = vadd.f32 %v3554_v37, %v2174_v46 }
 0x319   : > { %2252 = vst.msk [vmem:[%s3565_s16 + $0xc8] sm:$0xff] %vm1863_vm6, %v2220_v24 }
 0x31b   : > { %v2186_v48 = vpop.f32.mrf.mxu2 }
 0x323   : > { %v2188_v39 = vpop.f32.mrf.mxu2 }
 0x334   : > { %v2027_v42 = vpop.f32.mrf.mxu3 }
 0x335   : > { %v2177_v49 = vadd.f32 %v2176_v44, %v2027_v42 }
 0x337   : > { %v2221_v51 = vadd.f32 %v3554_v37, %v2177_v49 }
 0x339   : > { %2253 = vst.msk [vmem:[%s3565_s16 + $0xd0] sm:$0xff] %vm1863_vm6, %v2221_v51 }
 0x33c   : > { %v2029_v27 = vpop.f32.mrf.mxu3 }
 0x33d   : > { %v2179_v16 = vadd.f32 %v2178_v52, %v2029_v27 }
 0x33f   : > { %v2222_v53 = vadd.f32 %v3554_v37, %v2179_v16 }
 0x341   : > { %2254 = vst.msk [vmem:[%s3565_s16 + $0xd8] sm:$0xff] %vm1863_vm6, %v2222_v53 }
 0x344   : > { %v2032_v30 = vpop.f32.mrf.mxu3 }
 0x345   : > { %v2182_v14 = vadd.f32 %v2181_v62, %v2032_v30 }
 0x347   : > { %v2223_v40 = vadd.f32 %v3554_v37, %v2182_v14 }
 0x349   : > { %2255 = vst.msk [vmem:[%s3565_s16 + $0xe0] sm:$0xff] %vm1863_vm6, %v2223_v40 }
 0x34c   : > { %v2034_v3 = vpop.f32.mrf.mxu3 }
 0x34d   : > { %v2184_v56 = vadd.f32 %v2183_v55, %v2034_v3 }
 0x34f   : > { %v2224_v54 = vadd.f32 %v3554_v37, %v2184_v56 }
 0x351   : > { %2256 = vst.msk [vmem:[%s3565_s16 + $0xe8] sm:$0xff] %vm1863_vm6, %v2224_v54 }
 0x354   : > { %v2037_v57 = vpop.f32.mrf.mxu3 }
 0x355   : > { %v2187_v61 = vadd.f32 %v2186_v48, %v2037_v57 }
 0x357   : > { %v2225_v34 = vadd.f32 %v3554_v37, %v2187_v61 }
 0x359   : > { %2257 = vst.msk [vmem:[%s3565_s16 + $0xf0] sm:$0xff] %vm1863_vm6, %v2225_v34 }
 0x35c   : > { %v2039_v63 = vpop.f32.mrf.mxu3 }
 0x35d   : > { %v2189_v29 = vadd.f32 %v2188_v39, %v2039_v63 }
 0x35f   : > { %v2226_v47 = vadd.f32 %v3554_v37, %v2189_v29 }
 0x361   : > { %2258 = vst.msk [vmem:[%s3565_s16 + $0xf8] sm:$0xff] %vm1863_vm6, %v2226_v47 }
 0x362   : > { %2741 = shalt.err (!%p2738_p5)
}
 0x363   : > { %s2798_s14 = smov 128   ;;  %s2799_s16 = smov 8  }
 0x364   : > { %2648 = dma.vmem_to_hbm [thread:$0]  (%p2885_p4), %s2275_s26, 4096, %s2277_s24, %s2260_s30, %s2798_s14, %s2798_s14, %s2799_s16  }
 0x365 PF: > { %p2654_p6 = scmp.ge.s32.totalorder %s2792_s10, 2  ;;  %s2291_s23 = sand.u32 1, %s2772_s27  }
 0x366   : > { %s2292_s11 = scalar_lea.sflag [#allocation3], %s2291_s23 }
 0x367   : > { %p2651_p7 = pnand %p2654_p6, %p2892_p8 }
 0x369   : > { %p2652_p9 = pneg %p2651_p7 }
 0x36b   : > { %2767 = dma.done.wait (%p2652_p9), %s2292_s11, 4096  }
 0x36c   : > { %2769 = vsyncadd (%p2652_p9), %s2292_s11, 4294963200  ;;  %s21_s10 = sadd.s32 1, %s2792_s10   ;;  %s3804_s27 = smov %s2776_s28 }
 0x36d   : > { %p18_p10 = scmp.ge.s32.totalorder %s21_s10, 4   ;;  %s3805_s28 = smov %s2780_s29 }
 0x36e   : > { %s3806_s29 = smov %s2898_s18  ;;  %s3807_s30 = smov %s2788_s9 }
 0x36f   : > { %s3808_s9 = smov %s3810_s13  ;;  %20 = sbr.rel (!%p18_p10) target bundleno = 4 (0x4), region = 93 }
 0x374   :  { %2298 = vsyncpa [#allocation3], 1 }
 0x375   :  { %2300 = vsyncpa [#allocation3 + $0x1], 1 }

</bundles_post_ra>
